<compile_context>
chip_gen: v7x
topology: tpu7x:2x2x1
jax: 0.10.0
libtpu: 0.0.40
codegen_flags: <defaults>
</compile_context>

<pallas_src>
import jax
import jax.numpy as jnp
from jax import lax
from jax.experimental import pallas as pl
from jax.experimental.pallas import tpu as pltpu

CIN_PAD = 8        # xyz channel dim zero-padded 3 -> 8 (aligned first matmul / loads)
OUT_PAD = 128      # fc3 output columns zero-padded 3 -> 128 (lane-dense output)
OUT_SUBLANES = 8   # output padded to a full (8, 128) tile per batch element


def frame_estimator_kernel(x_ref,
                           w1_ref, b1_ref, w2_ref, b2_ref, w3_ref, b3_ref,
                           w4_ref, b4_ref, w5_ref, b5_ref,
                           wf1_ref, bf1_ref, wf2_ref, bf2_ref, wf3_ref, bf3_ref,
                           out_ref):
    m_rows, _ = x_ref.shape                    # (bblk*N, CIN_PAD)
    bblk = out_ref.shape[0]
    n_pts = m_rows // bblk

    x = x_ref[...]                             # f32 (bblk*N, 8)

    # x - x.mean(dim=1, keepdim=True): per-cloud mean over its N contiguous rows.
    # Static, sublane-aligned slices (N % 8 == 0) -- no reshape, no materialized copy.
    parts = []
    for b in range(bblk):
        xb = x[b * n_pts:(b + 1) * n_pts, :]
        parts.append(xb - jnp.mean(xb, axis=0, keepdims=True))
    h = parts[0] if bblk == 1 else jnp.concatenate(parts, axis=0)

    def layer(v, w_ref, b_ref):
        # bf16 operands on the MXU with f32 accumulation; bias add / ReLU in f32;
        # activation emitted in bf16 at the producer (halves VMEM + vld/vst traffic).
        y = jnp.dot(v.astype(jnp.bfloat16), w_ref[...],
                    preferred_element_type=jnp.float32) + b_ref[...]
        return jnp.maximum(y, 0.0).astype(jnp.bfloat16)

    # Pointwise conv (+ folded eval-mode BN) + ReLU stack on the whole slab.
    h = layer(h, w1_ref, b1_ref)               # (M, 64)
    h = layer(h, w2_ref, b2_ref)               # (M, 128)
    h = layer(h, w3_ref, b3_ref)               # (M, 256)
    h = layer(h, w4_ref, b4_ref)               # (M, 512)
    h = layer(h, w5_ref, b5_ref)               # (M, 1024)

    # torch.max(x, dim=2)[0]: per-cloud global max-pool, again via static slices.
    g_parts = []
    for b in range(bblk):
        g_parts.append(jnp.max(h[b * n_pts:(b + 1) * n_pts, :], axis=0, keepdims=True))
    g = g_parts[0] if bblk == 1 else jnp.concatenate(g_parts, axis=0)   # (bblk, 1024)

    # FC head batched over the block (GEMMs, not one GEMV per cloud).
    f = layer(g, wf1_ref, bf1_ref)             # (bblk, 512)
    f = layer(f, wf2_ref, bf2_ref)             # (bblk, 256)

    # Last FC + normalization fully f32 (direction accuracy).  wf3/bf3 are zero-padded
    # 3 -> OUT_PAD output columns, so the padded columns are exactly zero (they do not
    # perturb the norm) and the final store is a full, unmasked lane tile.
    n = jnp.dot(f.astype(jnp.float32), wf3_ref[...],
                preferred_element_type=jnp.float32) + bf3_ref[...]      # (bblk, 128)

    # F.normalize(n, p=2, dim=1) via rsqrt on the EUP (eps = 1e-12 on the norm).
    sumsq = jnp.sum(n * n, axis=1, keepdims=True)
    n_hat = n * lax.rsqrt(jnp.maximum(sumsq, 1e-24))

    # Full (bblk, 8, 128) tile store: lane-dense, sublane-dense, unmasked.
    out_ref[...] = jnp.broadcast_to(n_hat[:, None, :], out_ref.shape)


def frame_estimator_forward(x, params, block_b=None):
    """x: (B, N, 3) float32.  params: list of 8 (w, b) f32 pairs (BN already folded)."""
    B, N, C = x.shape
    assert C == 3
    assert N % 8 == 0, "point count must be a multiple of 8 (sublane-aligned slices)"

    # Hardware-aware sizing: v7x has 64 MiB VMEM/TC (live data capped ~48 MiB, slab
    # M <= 2048 rows); v5e/v6e have 128 MiB (limit 96 MiB, slab up to 4096 rows).
    try:
        vmem_cap = int(pltpu.get_tpu_info().vmem_capacity_bytes)
    except Exception:
        vmem_cap = 64 * 1024 * 1024            # conservative default (v7x-sized)
    vmem_limit = min(96 * 1024 * 1024, (vmem_cap * 3) // 4)
    max_rows = 2048 if vmem_cap <= 64 * 1024 * 1024 else 4096

    if block_b is None:
        # Largest slab that (a) keeps M = bblk*N within the VMEM-derived row cap and
        # (b) leaves >= 2 grid steps so both v7x TensorCores get work ("parallel").
        block_b = max(1, min(max(1, B // 2), max_rows // N)) if B > 1 else 1
    bblk = max(1, min(block_b, B))
    B_pad = ((B + bblk - 1) // bblk) * bblk

    # Zero-pad batch to a multiple of bblk and channels 3 -> CIN_PAD; flatten the
    # (batch, point) axes here so the kernel never reshapes the slab.
    x_p = jnp.zeros((B_pad, N, CIN_PAD), jnp.float32).at[:B, :, :3].set(x)
    x2d = x_p.reshape(B_pad * N, CIN_PAD)

    flat_params = []
    in_specs = [pl.BlockSpec((bblk * N, CIN_PAD), lambda b: (b, 0))]
    for idx, (w, b) in enumerate(params):
        if idx == 0:        # pad first-layer K dim 3 -> CIN_PAD with zero rows
            w = jnp.zeros((CIN_PAD, w.shape[1]), jnp.float32).at[:3, :].set(w)
        if idx == 7:        # fc3 stays f32; pad output columns 3 -> OUT_PAD with zeros
            w = jnp.zeros((w.shape[0], OUT_PAD), jnp.float32).at[:, :3].set(w)
            b = jnp.zeros((1, OUT_PAD), jnp.float32).at[:, :3].set(b)
        else:
            w = w.astype(jnp.bfloat16)          # halve weight DMA/VMEM, native MXU rate
        b = b.astype(jnp.float32)               # bias add / ReLU stay f32
        flat_params += [w, b]
        # Constant index_map => weights/biases are fetched once and stay resident.
        in_specs += [pl.BlockSpec(w.shape, lambda b_: (0, 0)),
                     pl.BlockSpec(b.shape, lambda b_: (0, 0))]

    # Advisory cost so XLA schedules this small kernel sensibly.
    conv_dims = [(CIN_PAD, 64), (64, 128), (128, 256), (256, 512), (512, 1024)]
    fc_dims = [(1024, 512), (512, 256), (256, OUT_PAD)]
    flops = (2 * B_pad * N * sum(ci * co for ci, co in conv_dims)
             + 2 * B_pad * sum(ci * co for ci, co in fc_dims))
    weight_bytes = sum(int(a.size) * a.dtype.itemsize for a in flat_params)
    bytes_accessed = (int(x2d.size) * 4 + weight_bytes
                      + B_pad * OUT_SUBLANES * OUT_PAD * 4)
    cost = pl.CostEstimate(flops=int(flops), transcendentals=int(B_pad),
                           bytes_accessed=int(bytes_accessed))

    out = pl.pallas_call(
        frame_estimator_kernel,
        out_shape=jax.ShapeDtypeStruct((B_pad, OUT_SUBLANES, OUT_PAD), jnp.float32),
        grid_spec=pltpu.PrefetchScalarGridSpec(
            num_scalar_prefetch=0,
            grid=(B_pad // bblk,),
            in_specs=in_specs,
            out_specs=pl.BlockSpec((bblk, OUT_SUBLANES, OUT_PAD), lambda b: (b, 0, 0)),
        ),
        compiler_params=pltpu.CompilerParams(
            dimension_semantics=("parallel",),   # batch steps are independent (megacore)
            vmem_limit_bytes=int(vmem_limit),
        ),
        cost_estimate=cost,
    )(x2d, *flat_params)
    return out[:B, 0, :3]                        # (B, 3)


def init_params(key):
    """Deterministic synthetic parameters; BN (eval-mode) folded into conv/linear form.

    Returns list of 8 (w, b):  w is (C_in, C_out) f32, b is (1, C_out) f32.
    """
    eps = 1e-5
    params = []

    # conv1..conv5 with BatchNorm folded.
    dims = [3, 64, 128, 256, 512, 1024]
    for i in range(5):
        cin, cout = dims[i], dims[i + 1]
        key, k1, k2, k3, k4, k5, k6 = jax.random.split(key, 7)
        conv_w = jax.random.normal(k1, (cout, cin), dtype=jnp.float32) * 0.1  # (Cout,Cin,1)[...,0]
        conv_b = jax.random.normal(k2, (cout,), dtype=jnp.float32) * 0.1
        gamma = jax.random.uniform(k3, (cout,), minval=0.5, maxval=1.5, dtype=jnp.float32)
        beta = jax.random.normal(k4, (cout,), dtype=jnp.float32) * 0.1
        rmean = jax.random.normal(k5, (cout,), dtype=jnp.float32) * 0.1
        rvar = jax.random.uniform(k6, (cout,), minval=0.5, maxval=1.5, dtype=jnp.float32)
        scale = gamma / jnp.sqrt(rvar + eps)
        w = (conv_w * scale[:, None]).T                       # (Cin, Cout)
        b = (scale * (conv_b - rmean) + beta)[None, :]        # (1, Cout)
        params.append((w, b))

    # fc1, fc2, fc3 (no BN).
    for cin, cout in [(1024, 512), (512, 256), (256, 3)]:
        key, k1, k2 = jax.random.split(key, 3)
        w = (jax.random.normal(k1, (cout, cin), dtype=jnp.float32) / jnp.sqrt(cin)).T
        b = (jax.random.normal(k2, (cout,), dtype=jnp.float32) * 0.1)[None, :]
        params.append((w, b))
    return params


def reference_forward(x, params):
    """Pure-JAX reference mirroring the kernel numerics (bf16 producer-side activations,
    f32 accumulation, f32 last FC + normalization)."""
    x = x - jnp.mean(x, axis=1, keepdims=True)
    h = x
    for i in range(5):
        w, b = params[i]
        y = jnp.einsum("bnc,cd->bnd", h.astype(jnp.bfloat16), w.astype(jnp.bfloat16),
                       preferred_element_type=jnp.float32) + b
        h = jnp.maximum(y, 0.0).astype(jnp.bfloat16)
    g = jnp.max(h, axis=1)                                   # (B, 1024) bf16
    for i in (5, 6):
        w, b = params[i]
        y = jnp.dot(g.astype(jnp.bfloat16), w.astype(jnp.bfloat16),
                    preferred_element_type=jnp.float32) + b[0]
        g = jnp.maximum(y, 0.0).astype(jnp.bfloat16)
    w, b = params[7]
    n = jnp.dot(g.astype(jnp.float32), w, preferred_element_type=jnp.float32) + b[0]
    norm = jnp.linalg.norm(n, axis=1, keepdims=True)
    return n / jnp.maximum(norm, 1e-12)


if __name__ == "__main__":
    key = jax.random.PRNGKey(0)
    kx, kp = jax.random.split(key)

    B, N = 2, 128                                            # 2 clouds, 128 points each
    x = jax.random.normal(kx, (B, N, 3), dtype=jnp.float32)
    params = init_params(kp)

    out = jax.block_until_ready(frame_estimator_forward(x, params))
    ref = reference_forward(x, params)

    assert out.shape == (B, 3), out.shape
    assert bool(jnp.allclose(out, ref, atol=1e-2, rtol=1e-2)), (out, ref)
    assert bool(jnp.allclose(jnp.linalg.norm(out, axis=1), 1.0, atol=1e-3))

    print("KERNEL_OK")
</pallas_src>

<mosaic_0001>
module attributes {stable_mosaic.version = 11 : i64} {
  func.func @frame_estimator_kernel(%arg0: i32, %arg1: memref<128x8xf32, #tpu.memory_space<vmem>>, %arg2: memref<8x64xbf16, #tpu.memory_space<vmem>>, %arg3: memref<1x64xf32, #tpu.memory_space<vmem>>, %arg4: memref<64x128xbf16, #tpu.memory_space<vmem>>, %arg5: memref<1x128xf32, #tpu.memory_space<vmem>>, %arg6: memref<128x256xbf16, #tpu.memory_space<vmem>>, %arg7: memref<1x256xf32, #tpu.memory_space<vmem>>, %arg8: memref<256x512xbf16, #tpu.memory_space<vmem>>, %arg9: memref<1x512xf32, #tpu.memory_space<vmem>>, %arg10: memref<512x1024xbf16, #tpu.memory_space<vmem>>, %arg11: memref<1x1024xf32, #tpu.memory_space<vmem>>, %arg12: memref<1024x512xbf16, #tpu.memory_space<vmem>>, %arg13: memref<1x512xf32, #tpu.memory_space<vmem>>, %arg14: memref<512x256xbf16, #tpu.memory_space<vmem>>, %arg15: memref<1x256xf32, #tpu.memory_space<vmem>>, %arg16: memref<256x128xf32, #tpu.memory_space<vmem>>, %arg17: memref<1x128xf32, #tpu.memory_space<vmem>>, %arg18: memref<1x8x128xf32, #tpu.memory_space<vmem>>) attributes {dimension_semantics = [#tpu.dimension_semantics<parallel>], iteration_bounds = array<i64: 2>, scalar_prefetch = 0 : i64, scratch_operands = 0 : i64, tpu.core_type = #tpu.core_type<tc>, window_params = [{transform_indices = @transform_0, window_bounds = array<i64: 128, 8>}, {pipeline_mode = #tpu.pipeline_mode<synchronous>, transform_indices = @transform_1, window_bounds = array<i64: 8, 64>}, {pipeline_mode = #tpu.pipeline_mode<synchronous>, transform_indices = @transform_2, window_bounds = array<i64: 1, 64>}, {pipeline_mode = #tpu.pipeline_mode<synchronous>, transform_indices = @transform_3, window_bounds = array<i64: 64, 128>}, {pipeline_mode = #tpu.pipeline_mode<synchronous>, transform_indices = @transform_4, window_bounds = array<i64: 1, 128>}, {pipeline_mode = #tpu.pipeline_mode<synchronous>, transform_indices = @transform_5, window_bounds = array<i64: 128, 256>}, {pipeline_mode = #tpu.pipeline_mode<synchronous>, transform_indices = @transform_6, window_bounds = array<i64: 1, 256>}, {pipeline_mode = #tpu.pipeline_mode<synchronous>, transform_indices = @transform_7, window_bounds = array<i64: 256, 512>}, {pipeline_mode = #tpu.pipeline_mode<synchronous>, transform_indices = @transform_8, window_bounds = array<i64: 1, 512>}, {pipeline_mode = #tpu.pipeline_mode<synchronous>, transform_indices = @transform_9, window_bounds = array<i64: 512, 1024>}, {pipeline_mode = #tpu.pipeline_mode<synchronous>, transform_indices = @transform_10, window_bounds = array<i64: 1, 1024>}, {pipeline_mode = #tpu.pipeline_mode<synchronous>, transform_indices = @transform_11, window_bounds = array<i64: 1024, 512>}, {pipeline_mode = #tpu.pipeline_mode<synchronous>, transform_indices = @transform_12, window_bounds = array<i64: 1, 512>}, {pipeline_mode = #tpu.pipeline_mode<synchronous>, transform_indices = @transform_13, window_bounds = array<i64: 512, 256>}, {pipeline_mode = #tpu.pipeline_mode<synchronous>, transform_indices = @transform_14, window_bounds = array<i64: 1, 256>}, {pipeline_mode = #tpu.pipeline_mode<synchronous>, transform_indices = @transform_15, window_bounds = array<i64: 256, 128>}, {pipeline_mode = #tpu.pipeline_mode<synchronous>, transform_indices = @transform_16, window_bounds = array<i64: 1, 128>}, {transform_indices = @transform_17, window_bounds = array<i64: 1, 8, 128>}]} {
    %c0 = arith.constant 0 : index
    %c0_0 = arith.constant 0 : index
    %0 = vector.load %arg1[%c0, %c0_0] : memref<128x8xf32, #tpu.memory_space<vmem>>, vector<128x8xf32>
    %cst = arith.constant dense<0.000000e+00> : vector<8xf32>
    %1 = vector.multi_reduction <add>, %0, %cst [0] : vector<128x8xf32> to vector<8xf32>
    %2 = vector.shape_cast %1 : vector<8xf32> to vector<1x8xf32>
    %cst_1 = arith.constant 1.280000e+02 : f32
    %3 = vector.broadcast %cst_1 : f32 to vector<1x8xf32>
    %4 = arith.divf %2, %3 : vector<1x8xf32>
    %5 = vector.broadcast %4 : vector<1x8xf32> to vector<128x8xf32>
    %6 = arith.subf %0, %5 : vector<128x8xf32>
    %7 = arith.truncf %6 : vector<128x8xf32> to vector<128x8xbf16>
    %c0_2 = arith.constant 0 : index
    %c0_3 = arith.constant 0 : index
    %8 = vector.load %arg2[%c0_2, %c0_3] : memref<8x64xbf16, #tpu.memory_space<vmem>>, vector<8x64xbf16>
    %cst_4 = arith.constant dense<0.000000e+00> : vector<128x64xf32>
    %9 = tpu.matmul %7, %8, %cst_4 {dimension_numbers = #tpu.dot_dimension_numbers<[1], [0], [0], [1], [0, 0, 1, 1], [], []>} : vector<128x8xbf16>, vector<8x64xbf16>, vector<128x64xf32> -> vector<128x64xf32>
    %c0_5 = arith.constant 0 : index
    %c0_6 = arith.constant 0 : index
    %10 = vector.load %arg3[%c0_5, %c0_6] : memref<1x64xf32, #tpu.memory_space<vmem>>, vector<1x64xf32>
    %11 = vector.broadcast %10 : vector<1x64xf32> to vector<128x64xf32>
    %12 = arith.addf %9, %11 : vector<128x64xf32>
    %cst_7 = arith.constant 0.000000e+00 : f32
    %13 = vector.broadcast %cst_7 : f32 to vector<128x64xf32>
    %14 = arith.maximumf %12, %13 : vector<128x64xf32>
    %15 = arith.truncf %14 : vector<128x64xf32> to vector<128x64xbf16>
    %c0_8 = arith.constant 0 : index
    %c0_9 = arith.constant 0 : index
    %16 = vector.load %arg4[%c0_8, %c0_9] : memref<64x128xbf16, #tpu.memory_space<vmem>>, vector<64x128xbf16>
    %cst_10 = arith.constant dense<0.000000e+00> : vector<128x128xf32>
    %17 = tpu.matmul %15, %16, %cst_10 {dimension_numbers = #tpu.dot_dimension_numbers<[1], [0], [0], [1], [0, 0, 1, 1], [], []>} : vector<128x64xbf16>, vector<64x128xbf16>, vector<128x128xf32> -> vector<128x128xf32>
    %c0_11 = arith.constant 0 : index
    %c0_12 = arith.constant 0 : index
    %18 = vector.load %arg5[%c0_11, %c0_12] : memref<1x128xf32, #tpu.memory_space<vmem>>, vector<1x128xf32>
    %19 = vector.broadcast %18 : vector<1x128xf32> to vector<128x128xf32>
    %20 = arith.addf %17, %19 : vector<128x128xf32>
    %cst_13 = arith.constant 0.000000e+00 : f32
    %21 = vector.broadcast %cst_13 : f32 to vector<128x128xf32>
    %22 = arith.maximumf %20, %21 : vector<128x128xf32>
    %23 = arith.truncf %22 : vector<128x128xf32> to vector<128x128xbf16>
    %c0_14 = arith.constant 0 : index
    %c0_15 = arith.constant 0 : index
    %24 = vector.load %arg6[%c0_14, %c0_15] : memref<128x256xbf16, #tpu.memory_space<vmem>>, vector<128x256xbf16>
    %cst_16 = arith.constant dense<0.000000e+00> : vector<128x256xf32>
    %25 = tpu.matmul %23, %24, %cst_16 {dimension_numbers = #tpu.dot_dimension_numbers<[1], [0], [0], [1], [0, 0, 1, 1], [], []>} : vector<128x128xbf16>, vector<128x256xbf16>, vector<128x256xf32> -> vector<128x256xf32>
    %c0_17 = arith.constant 0 : index
    %c0_18 = arith.constant 0 : index
    %26 = vector.load %arg7[%c0_17, %c0_18] : memref<1x256xf32, #tpu.memory_space<vmem>>, vector<1x256xf32>
    %27 = vector.broadcast %26 : vector<1x256xf32> to vector<128x256xf32>
    %28 = arith.addf %25, %27 : vector<128x256xf32>
    %cst_19 = arith.constant 0.000000e+00 : f32
    %29 = vector.broadcast %cst_19 : f32 to vector<128x256xf32>
    %30 = arith.maximumf %28, %29 : vector<128x256xf32>
    %31 = arith.truncf %30 : vector<128x256xf32> to vector<128x256xbf16>
    %c0_20 = arith.constant 0 : index
    %c0_21 = arith.constant 0 : index
    %32 = vector.load %arg8[%c0_20, %c0_21] : memref<256x512xbf16, #tpu.memory_space<vmem>>, vector<256x512xbf16>
    %cst_22 = arith.constant dense<0.000000e+00> : vector<128x512xf32>
    %33 = tpu.matmul %31, %32, %cst_22 {dimension_numbers = #tpu.dot_dimension_numbers<[1], [0], [0], [1], [0, 0, 1, 1], [], []>} : vector<128x256xbf16>, vector<256x512xbf16>, vector<128x512xf32> -> vector<128x512xf32>
    %c0_23 = arith.constant 0 : index
    %c0_24 = arith.constant 0 : index
    %34 = vector.load %arg9[%c0_23, %c0_24] : memref<1x512xf32, #tpu.memory_space<vmem>>, vector<1x512xf32>
    %35 = vector.broadcast %34 : vector<1x512xf32> to vector<128x512xf32>
    %36 = arith.addf %33, %35 : vector<128x512xf32>
    %cst_25 = arith.constant 0.000000e+00 : f32
    %37 = vector.broadcast %cst_25 : f32 to vector<128x512xf32>
    %38 = arith.maximumf %36, %37 : vector<128x512xf32>
    %39 = arith.truncf %38 : vector<128x512xf32> to vector<128x512xbf16>
    %c0_26 = arith.constant 0 : index
    %c0_27 = arith.constant 0 : index
    %40 = vector.load %arg10[%c0_26, %c0_27] : memref<512x1024xbf16, #tpu.memory_space<vmem>>, vector<512x1024xbf16>
    %cst_28 = arith.constant dense<0.000000e+00> : vector<128x1024xf32>
    %41 = tpu.matmul %39, %40, %cst_28 {dimension_numbers = #tpu.dot_dimension_numbers<[1], [0], [0], [1], [0, 0, 1, 1], [], []>} : vector<128x512xbf16>, vector<512x1024xbf16>, vector<128x1024xf32> -> vector<128x1024xf32>
    %c0_29 = arith.constant 0 : index
    %c0_30 = arith.constant 0 : index
    %42 = vector.load %arg11[%c0_29, %c0_30] : memref<1x1024xf32, #tpu.memory_space<vmem>>, vector<1x1024xf32>
    %43 = vector.broadcast %42 : vector<1x1024xf32> to vector<128x1024xf32>
    %44 = arith.addf %41, %43 : vector<128x1024xf32>
    %cst_31 = arith.constant 0.000000e+00 : f32
    %45 = vector.broadcast %cst_31 : f32 to vector<128x1024xf32>
    %46 = arith.maximumf %44, %45 : vector<128x1024xf32>
    %47 = arith.truncf %46 : vector<128x1024xf32> to vector<128x1024xbf16>
    %cst_32 = arith.constant dense<0xFF80> : vector<1024xbf16>
    %48 = vector.multi_reduction <maximumf>, %47, %cst_32 [0] : vector<128x1024xbf16> to vector<1024xbf16>
    %49 = vector.shape_cast %48 : vector<1024xbf16> to vector<1x1024xbf16>
    %c0_33 = arith.constant 0 : index
    %c0_34 = arith.constant 0 : index
    %50 = vector.load %arg12[%c0_33, %c0_34] : memref<1024x512xbf16, #tpu.memory_space<vmem>>, vector<1024x512xbf16>
    %cst_35 = arith.constant dense<0.000000e+00> : vector<1x512xf32>
    %51 = tpu.matmul %49, %50, %cst_35 {dimension_numbers = #tpu.dot_dimension_numbers<[1], [0], [0], [1], [0, 0, 1, 1], [], []>} : vector<1x1024xbf16>, vector<1024x512xbf16>, vector<1x512xf32> -> vector<1x512xf32>
    %c0_36 = arith.constant 0 : index
    %c0_37 = arith.constant 0 : index
    %52 = vector.load %arg13[%c0_36, %c0_37] : memref<1x512xf32, #tpu.memory_space<vmem>>, vector<1x512xf32>
    %53 = arith.addf %51, %52 : vector<1x512xf32>
    %cst_38 = arith.constant 0.000000e+00 : f32
    %54 = vector.broadcast %cst_38 : f32 to vector<1x512xf32>
    %55 = arith.maximumf %53, %54 : vector<1x512xf32>
    %56 = arith.truncf %55 : vector<1x512xf32> to vector<1x512xbf16>
    %c0_39 = arith.constant 0 : index
    %c0_40 = arith.constant 0 : index
    %57 = vector.load %arg14[%c0_39, %c0_40] : memref<512x256xbf16, #tpu.memory_space<vmem>>, vector<512x256xbf16>
    %cst_41 = arith.constant dense<0.000000e+00> : vector<1x256xf32>
    %58 = tpu.matmul %56, %57, %cst_41 {dimension_numbers = #tpu.dot_dimension_numbers<[1], [0], [0], [1], [0, 0, 1, 1], [], []>} : vector<1x512xbf16>, vector<512x256xbf16>, vector<1x256xf32> -> vector<1x256xf32>
    %c0_42 = arith.constant 0 : index
    %c0_43 = arith.constant 0 : index
    %59 = vector.load %arg15[%c0_42, %c0_43] : memref<1x256xf32, #tpu.memory_space<vmem>>, vector<1x256xf32>
    %60 = arith.addf %58, %59 : vector<1x256xf32>
    %cst_44 = arith.constant 0.000000e+00 : f32
    %61 = vector.broadcast %cst_44 : f32 to vector<1x256xf32>
    %62 = arith.maximumf %60, %61 : vector<1x256xf32>
    %63 = arith.truncf %62 : vector<1x256xf32> to vector<1x256xbf16>
    %64 = arith.extf %63 : vector<1x256xbf16> to vector<1x256xf32>
    %c0_45 = arith.constant 0 : index
    %c0_46 = arith.constant 0 : index
    %65 = vector.load %arg16[%c0_45, %c0_46] : memref<256x128xf32, #tpu.memory_space<vmem>>, vector<256x128xf32>
    %cst_47 = arith.constant dense<0.000000e+00> : vector<1x128xf32>
    %66 = tpu.matmul %64, %65, %cst_47 {dimension_numbers = #tpu.dot_dimension_numbers<[1], [0], [0], [1], [0, 0, 1, 1], [], []>} : vector<1x256xf32>, vector<256x128xf32>, vector<1x128xf32> -> vector<1x128xf32>
    %c0_48 = arith.constant 0 : index
    %c0_49 = arith.constant 0 : index
    %67 = vector.load %arg17[%c0_48, %c0_49] : memref<1x128xf32, #tpu.memory_space<vmem>>, vector<1x128xf32>
    %68 = arith.addf %66, %67 : vector<1x128xf32>
    %69 = arith.mulf %68, %68 : vector<1x128xf32>
    %cst_50 = arith.constant dense<0.000000e+00> : vector<1xf32>
    %70 = vector.multi_reduction <add>, %69, %cst_50 [1] : vector<1x128xf32> to vector<1xf32>
    %71 = vector.shape_cast %70 : vector<1xf32> to vector<1x1xf32>
    %cst_51 = arith.constant 1.000000e-24 : f32
    %72 = vector.broadcast %cst_51 : f32 to vector<1x1xf32>
    %73 = arith.maximumf %71, %72 : vector<1x1xf32>
    %74 = math.rsqrt %73 : vector<1x1xf32>
    %75 = vector.broadcast %74 : vector<1x1xf32> to vector<1x128xf32>
    %76 = arith.mulf %68, %75 : vector<1x128xf32>
    %77 = vector.shape_cast %76 : vector<1x128xf32> to vector<1x1x128xf32>
    %78 = vector.shape_cast %77 : vector<1x1x128xf32> to vector<1x1x128xf32>
    %79 = vector.broadcast %78 : vector<1x1x128xf32> to vector<1x8x128xf32>
    %c0_52 = arith.constant 0 : index
    %c0_53 = arith.constant 0 : index
    %c0_54 = arith.constant 0 : index
    %80 = vector.load %arg18[%c0_52, %c0_53, %c0_54] : memref<1x8x128xf32, #tpu.memory_space<vmem>>, vector<1x8x128xf32>
    tpu.vector_store %arg18[%c0_52, %c0_53, %c0_54], %79 {strides = array<i32>} : memref<1x8x128xf32, #tpu.memory_space<vmem>>, vector<1x8x128xf32>,
    return
  }
  func.func @transform_0(%arg0: i32) -> (i32, i32) {
    %c0_i32 = arith.constant 0 : i32
    %c0_i32_0 = arith.constant 0 : i32
    return %arg0, %c0_i32 : i32, i32
  }
  func.func @transform_1(%arg0: i32) -> (i32, i32) {
    %c0_i32 = arith.constant 0 : i32
    %c0_i32_0 = arith.constant 0 : i32
    %c0_i32_1 = arith.constant 0 : i32
    return %c0_i32, %c0_i32_0 : i32, i32
  }
  func.func @transform_2(%arg0: i32) -> (i32, i32) {
    %c0_i32 = arith.constant 0 : i32
    %c0_i32_0 = arith.constant 0 : i32
    %c0_i32_1 = arith.constant 0 : i32
    return %c0_i32, %c0_i32_0 : i32, i32
  }
  func.func @transform_3(%arg0: i32) -> (i32, i32) {
    %c0_i32 = arith.constant 0 : i32
    %c0_i32_0 = arith.constant 0 : i32
    %c0_i32_1 = arith.constant 0 : i32
    return %c0_i32, %c0_i32_0 : i32, i32
  }
  func.func @transform_4(%arg0: i32) -> (i32, i32) {
    %c0_i32 = arith.constant 0 : i32
    %c0_i32_0 = arith.constant 0 : i32
    %c0_i32_1 = arith.constant 0 : i32
    return %c0_i32, %c0_i32_0 : i32, i32
  }
  func.func @transform_5(%arg0: i32) -> (i32, i32) {
    %c0_i32 = arith.constant 0 : i32
    %c0_i32_0 = arith.constant 0 : i32
    %c0_i32_1 = arith.constant 0 : i32
    return %c0_i32, %c0_i32_0 : i32, i32
  }
  func.func @transform_6(%arg0: i32) -> (i32, i32) {
    %c0_i32 = arith.constant 0 : i32
    %c0_i32_0 = arith.constant 0 : i32
    %c0_i32_1 = arith.constant 0 : i32
    return %c0_i32, %c0_i32_0 : i32, i32
  }
  func.func @transform_7(%arg0: i32) -> (i32, i32) {
    %c0_i32 = arith.constant 0 : i32
    %c0_i32_0 = arith.constant 0 : i32
    %c0_i32_1 = arith.constant 0 : i32
    return %c0_i32, %c0_i32_0 : i32, i32
  }
  func.func @transform_8(%arg0: i32) -> (i32, i32) {
    %c0_i32 = arith.constant 0 : i32
    %c0_i32_0 = arith.constant 0 : i32
    %c0_i32_1 = arith.constant 0 : i32
    return %c0_i32, %c0_i32_0 : i32, i32
  }
  func.func @transform_9(%arg0: i32) -> (i32, i32) {
    %c0_i32 = arith.constant 0 : i32
    %c0_i32_0 = arith.constant 0 : i32
    %c0_i32_1 = arith.constant 0 : i32
    return %c0_i32, %c0_i32_0 : i32, i32
  }
  func.func @transform_10(%arg0: i32) -> (i32, i32) {
    %c0_i32 = arith.constant 0 : i32
    %c0_i32_0 = arith.constant 0 : i32
    %c0_i32_1 = arith.constant 0 : i32
    return %c0_i32, %c0_i32_0 : i32, i32
  }
  func.func @transform_11(%arg0: i32) -> (i32, i32) {
    %c0_i32 = arith.constant 0 : i32
    %c0_i32_0 = arith.constant 0 : i32
    %c0_i32_1 = arith.constant 0 : i32
    return %c0_i32, %c0_i32_0 : i32, i32
  }
  func.func @transform_12(%arg0: i32) -> (i32, i32) {
    %c0_i32 = arith.constant 0 : i32
    %c0_i32_0 = arith.constant 0 : i32
    %c0_i32_1 = arith.constant 0 : i32
    return %c0_i32, %c0_i32_0 : i32, i32
  }
  func.func @transform_13(%arg0: i32) -> (i32, i32) {
    %c0_i32 = arith.constant 0 : i32
    %c0_i32_0 = arith.constant 0 : i32
    %c0_i32_1 = arith.constant 0 : i32
    return %c0_i32, %c0_i32_0 : i32, i32
  }
  func.func @transform_14(%arg0: i32) -> (i32, i32) {
    %c0_i32 = arith.constant 0 : i32
    %c0_i32_0 = arith.constant 0 : i32
    %c0_i32_1 = arith.constant 0 : i32
    return %c0_i32, %c0_i32_0 : i32, i32
  }
  func.func @transform_15(%arg0: i32) -> (i32, i32) {
    %c0_i32 = arith.constant 0 : i32
    %c0_i32_0 = arith.constant 0 : i32
    %c0_i32_1 = arith.constant 0 : i32
    return %c0_i32, %c0_i32_0 : i32, i32
  }
  func.func @transform_16(%arg0: i32) -> (i32, i32) {
    %c0_i32 = arith.constant 0 : i32
    %c0_i32_0 = arith.constant 0 : i32
    %c0_i32_1 = arith.constant 0 : i32
    return %c0_i32, %c0_i32_0 : i32, i32
  }
  func.func @transform_17(%arg0: i32) -> (i32, i32, i32) {
    %c0_i32 = arith.constant 0 : i32
    %c0_i32_0 = arith.constant 0 : i32
    %c0_i32_1 = arith.constant 0 : i32
    return %arg0, %c0_i32, %c0_i32_0 : i32, i32, i32
  }
}

</mosaic_0001>

<bundles_post_ra>
// kernel: tpu_custom_call.1
= control target key start
LH: loop header
LB: loop body
LE: loop exit
PB: predicated region body
PF: predicated region fallthrough
CT: control target
= control target key end

     0   :  { %s10998_s0 = inlined_call_operand.vmem [shape: f32[256,8], index: 0, kind: input, shape index: {}]   ;;  %s10999_s1 = inlined_call_operand.vmem [shape: bf16[8,64], index: 1, kind: input, shape index: {}]   ;;  %s11000_s2 = inlined_call_operand.vmem [shape: f32[1,64], index: 2, kind: input, shape index: {}]   ;;  %s11001_s3 = inlined_call_operand.vmem [shape: bf16[64,128], index: 3, kind: input, shape index: {}]   ;;  %s11002_s4 = inlined_call_operand.vmem [shape: f32[1,128], index: 4, kind: input, shape index: {}]   ;;  %s11003_s5 = inlined_call_operand.hbm [shape: bf16[128,256], index: 5, kind: input, shape index: {}]   ;;  %s11004_s6 = inlined_call_operand.vmem [shape: f32[1,256], index: 6, kind: input, shape index: {}]   ;;  %s11005_s7 = inlined_call_operand.hbm [shape: bf16[256,512], index: 7, kind: input, shape index: {}]   ;;  %s11006_s8 = inlined_call_operand.vmem [shape: f32[1,512], index: 8, kind: input, shape index: {}]   ;;  %s11007_s9 = inlined_call_operand.hbm [shape: bf16[512,1024], index: 9, kind: input, shape index: {}]   ;;  %s11008_s10 = inlined_call_operand.vmem [shape: f32[1,1024], index: 10, kind: input, shape index: {}]   ;;  %s11009_s11 = inlined_call_operand.hbm [shape: bf16[1024,512], index: 11, kind: input, shape index: {}]   ;;  %s11010_s12 = inlined_call_operand.vmem [shape: f32[1,512], index: 12, kind: input, shape index: {}]   ;;  %s11011_s13 = inlined_call_operand.hbm [shape: bf16[512,256], index: 13, kind: input, shape index: {}]   ;;  %s11012_s14 = inlined_call_operand.vmem [shape: f32[1,256], index: 14, kind: input, shape index: {}]   ;;  %s11013_s15 = inlined_call_operand.vmem [shape: f32[256,128], index: 15, kind: input, shape index: {}]   ;;  %s11014_s16 = inlined_call_operand.vmem [shape: f32[1,128], index: 16, kind: input, shape index: {}]   ;;  %s11015_s17 = inlined_call_operand.hbm [shape: f32[2,8,128], index: 17, kind: output, shape index: {}]  }
   0x1   :  { %11039 = sst [smem:[#allocation28_spill]] %s10998_s0 }
   0x2   :  { %11040 = sst [smem:[#allocation29_spill]] %s10999_s1 }
   0x3   :  { %11041 = sst [smem:[#allocation30_spill]] %s11012_s14 }
   0x4   :  { %11042 = sst [smem:[#allocation31_spill]] %s11014_s16 }
   0x5   :  { %11043 = sst [smem:[#allocation32_spill]] %s11015_s17 }
   0x6   :  { %22 = vsyncpa [#allocation3], 0 }
   0x7   :  { %23 = vsyncpa [#allocation6], 0 }
   0x8   :  { %24 = vsyncpa [#allocation9], 0 }
   0x9   :  { %25 = vsyncpa [#allocation4], 0 }
   0xa   :  { %27 = vsyncpa [#allocation4 + $0x1], 0  ;;  %s9611_s24 = smov 0   ;;  %s9613_s25 = smov 0  }
   0xb   :  { %s9615_s26 = smov 0   ;;  %s9617_s27 = smov 0  }
   0xc LB: > { %11044 = sst [smem:[#allocation16_spill]] %s9494_s24  ;;  %s9632_s28 = sadd.s32 4294967295, %s9506_s27   ;;  %s9506_s27 = sphi %s9617_s27, %s11086_s27   ;;  %s9502_s26 = sphi %s9615_s26, %s11089_s26   ;;  %s9498_s25 = sphi %s9613_s25, %s11088_s25   ;;  %s9494_s24 = sphi %s9611_s24, %s11087_s24  }
   0xd   : > { %11045 = sst [smem:[#allocation17_spill]] %s9498_s25  ;;  %s7469_s29 = sadd.s32 4294967294, %s9506_s27  }
   0xe   : > { %11046 = sst [smem:[#allocation18_spill]] %s9502_s26  ;;  %s9636_s0 = sadd.s32 1, %s9506_s27  }
   0xf   : > { %11047 = sst [smem:[#allocation19_spill]] %s9506_s27  ;;  %s402_s30 = sadd.s32 1, %s9502_s26 }
  0x10   : > { %11048 = sst [smem:[#allocation20_spill]] %s9636_s0  ;;  %s399_s18 = ssub.s32 %s9506_s27, %s9636_s0 }
  0x11   : > { %p412_p0 = scmp.ne.s32.totalorder %s9502_s26, %s9498_s25  ;;  %p400_p1 = scmp.eq.s32.totalorder %s399_s18, 0 }
  0x12   : > { %p413_p2 = scmp.eq.s32.totalorder %s9632_s28, 1  ;;  %p418_p3 = scmp.ne.s32.totalorder %s9498_s25, %s9494_s24 }
  0x13   : > { %p419_p4 = scmp.eq.s32.totalorder %s7469_s29, 1  ;;  %p7470_p7 = scmp.ge.s32.totalorder %s9506_s27, 1 }
  0x14   : > { %s9647_s19 = scalar_select %p400_p1, %s9502_s26, %s402_s30  }
  0x15   : > { %p9649_p5 = por %p413_p2, %p412_p0  ;;  %p9653_p6 = por %p419_p4, %p418_p3 }
  0x16   : > { %11049 = sst [smem:[#allocation21_spill]] %s9647_s19  ;;  %p426_p8 = scmp.lt.s32.totalorder %s9506_s27, 3 }
  0x17   : > { %s11050_s1 = scalar_select %p9649_p5, 1, 0 }
  0x18   : > { %s11052_s20 = scalar_select %p9653_p6, 1, 0 }
  0x19   : > { %11051 = sst [smem:[#allocation22_spill]] %s11050_s1  ;;  %p11023_p9 = scmp.eq.s32.totalorder %s9632_s28, 0 }
  0x1a   : > { %11053 = sst [smem:[#allocation23_spill]] %s11052_s20  ;;  %p9660_p10 = pnand %p7470_p7, %p426_p8 }
  0x1b   : > { %s9508_s22 = smov [#allocation5]   ;;  %s9509_s30 = smov [#allocation8]  }
  0x1c   : > { %s11054_s21 = scalar_select %p9660_p10, 1, 0 }
  0x1d   : > { %s466_s23 = sshll.u32 %s9508_s22, 4  ;;  %p8611_p11 = pneg %p9660_p10  ;;  %s9666_s23 = int_to_ptr.vmem [resolvable:$true] %s466_s23 }
  0x1e   : > { %s498_s18 = sshll.u32 %s9509_s30, 4  ;;  %s9510_s19 = smov [#allocation2]   ;;  %s9674_s18 = int_to_ptr.vmem [resolvable:$true] %s498_s18 }
  0x1f   : > { %p9670_p12 = pnand %p11023_p9, %p8611_p11  ;;  %s9676_s26 = sshll.u32 %s9510_s19, 4  ;;  %s451_s26 = int_to_ptr.vmem [resolvable:$true] %s9676_s26 }
  0x20   : > { %s9292_s22 = scalar_lea.hbm %s11005_s7, 8192 }
  0x21   : > { %p9293_p13 = scmp.ne.s32.totalorder %s11005_s7, %s9292_s22  ;;  %p9686_p0 = pneg %p9670_p12 }
  0x22   : > { %p9299_p3 = scmp.lt.u32.totalorder %s9292_s22, %s11005_s7 }
  0x23   : > { %p9295_p1 = pnand %p9686_p0, %p9293_p13 }
  0x25   : > { %p9296_p2 = pneg %p9295_p1 }
  0x27   : > { %p9301_p4 = pnand %p9299_p3, %p9296_p2 }
  0x29   : > { %9304 = shalt.err (!%p9301_p4)
}
  0x2a   : > { %s9305_s24 = scalar_lea.vmem %s9666_s23, 8192  ;;  %p9313_p9 = scmp.lt.s32.totalorder %s9666_s23, %s9666_s23 }
  0x2b   : > { %p9306_p7 = scmp.ne.s32.totalorder %s9666_s23, %s9305_s24  ;;  %p9314_p6 = scmp.lt.s32.totalorder %s9305_s24, %s9305_s24 }
  0x2d   : > { %p9308_p8 = pnand %p9306_p7, %p9686_p0  ;;  %p9315_p13 = por %p9314_p6, %p9313_p9 }
  0x2f   : > { %p9309_p11 = pneg %p9308_p8 }
  0x31   : > { %p9316_p1 = pnand %p9315_p13, %p9309_p11 }
  0x33   : > { %9319 = shalt.err (!%p9316_p1)
}
  0x34   : > { %s9511_s27 = smov 256   ;;  %s9512_s0 = smov 16  }
  0x35   : > { %8617 = dma.hbm_to_vmem [thread:$0]  (!%p9670_p12), %s11005_s7, 8192, %s9666_s23, [#allocation6], %s9511_s27, %s9511_s27, %s9512_s0  }
  0x36   : > { %s9320_s1 = scalar_lea.hbm %s11009_s11, 32768 }
  0x37   : > { %p9321_p6 = scmp.ne.s32.totalorder %s11009_s11, %s9320_s1  ;;  %p9327_p3 = scmp.lt.u32.totalorder %s9320_s1, %s11009_s11 }
  0x39   : > { %p9323_p9 = pnand %p9321_p6, %p9686_p0 }
  0x3b   : > { %p9324_p2 = pneg %p9323_p9 }
  0x3d   : > { %p9329_p4 = pnand %p9327_p3, %p9324_p2 }
  0x3f   : > { %9332 = shalt.err (!%p9329_p4)
}
  0x40   : > { %s9333_s23 = scalar_lea.vmem %s9674_s18, 32768  ;;  %p9341_p13 = scmp.lt.s32.totalorder %s9674_s18, %s9674_s18 }
  0x41   : > { %p9334_p7 = scmp.ne.s32.totalorder %s9674_s18, %s9333_s23  ;;  %p9342_p1 = scmp.lt.s32.totalorder %s9333_s23, %s9333_s23 }
  0x43   : > { %p9336_p8 = pnand %p9334_p7, %p9686_p0  ;;  %p9343_p6 = por %p9342_p1, %p9341_p13 }
  0x45   : > { %p9337_p11 = pneg %p9336_p8 }
  0x47   : > { %p9344_p9 = pnand %p9343_p6, %p9337_p11 }
  0x49   : > { %9347 = shalt.err (!%p9344_p9)
}
  0x4a   : > { %8623 = dma.hbm_to_vmem [thread:$0]  (!%p9670_p12), %s11009_s11, 32768, %s9674_s18, [#allocation9], %s9511_s27, %s9511_s27, %s9512_s0  }
  0x4b   : > { %s9348_s20 = scalar_lea.hbm %s11003_s5, 2048 }
  0x4c   : > { %p9349_p2 = scmp.ne.s32.totalorder %s11003_s5, %s9348_s20  ;;  %p9355_p7 = scmp.lt.u32.totalorder %s9348_s20, %s11003_s5 }
  0x4e   : > { %p9351_p3 = pnand %p9349_p2, %p9686_p0 }
  0x50   : > { %p9352_p4 = pneg %p9351_p3 }
  0x52   : > { %p9357_p8 = pnand %p9355_p7, %p9352_p4 }
  0x54   : > { %9360 = shalt.err (!%p9357_p8)
}
  0x55   : > { %s9361_s23 = scalar_lea.vmem %s451_s26, 2048  ;;  %p9369_p6 = scmp.lt.s32.totalorder %s451_s26, %s451_s26 }
  0x56   : > { %p9362_p11 = scmp.ne.s32.totalorder %s451_s26, %s9361_s23  ;;  %p9370_p9 = scmp.lt.s32.totalorder %s9361_s23, %s9361_s23 }
  0x58   : > { %p9364_p13 = pnand %p9362_p11, %p9686_p0  ;;  %p9371_p5 = por %p9370_p9, %p9369_p6 }
  0x5a   : > { %p9365_p1 = pneg %p9364_p13 }
  0x5c   : > { %p9372_p10 = pnand %p9371_p5, %p9365_p1 }
  0x5e   : > { %9375 = shalt.err (!%p9372_p10)
}
  0x5f   : > { %s11029_s18 = smov 128   ;;  %s11030_s27 = smov 8  }
  0x60   : > { %8614 = dma.hbm_to_vmem [thread:$0]  (!%p9670_p12), %s11003_s5, 2048, %s451_s26, [#allocation3], %s11029_s18, %s11029_s18, %s11030_s27  }
  0x61   : > { %s9515_s16 = smov [#allocation7]   ;;  %s9376_s22 = scalar_lea.hbm %s11007_s9, 32768 }
  0x62   : > { %s482_s25 = sshll.u32 %s9515_s16, 4  ;;  %p9377_p5 = scmp.ne.s32.totalorder %s11007_s9, %s9376_s22  ;;  %s483_s25 = int_to_ptr.vmem [resolvable:$true] %s482_s25 }
  0x63   : > { %p9383_p3 = scmp.lt.u32.totalorder %s9376_s22, %s11007_s9 }
  0x64   : > { %p9379_p10 = pnand %p9377_p5, %p9686_p0 }
  0x66   : > { %p9380_p2 = pneg %p9379_p10 }
  0x68   : > { %p9385_p4 = pnand %p9383_p3, %p9380_p2 }
  0x6a   : > { %9388 = shalt.err (!%p9385_p4)
}
  0x6b   : > { %s9389_s26 = scalar_lea.vmem %s483_s25, 32768  ;;  %p9397_p13 = scmp.lt.s32.totalorder %s483_s25, %s483_s25 }
  0x6c   : > { %p9390_p7 = scmp.ne.s32.totalorder %s483_s25, %s9389_s26  ;;  %p9398_p1 = scmp.lt.s32.totalorder %s9389_s26, %s9389_s26 }
  0x6e   : > { %p9392_p8 = pnand %p9390_p7, %p9686_p0  ;;  %p9399_p6 = por %p9398_p1, %p9397_p13 }
  0x70   : > { %p9393_p11 = pneg %p9392_p8 }
  0x72   : > { %p9400_p9 = pnand %p9399_p6, %p9393_p11 }
  0x74   : > { %9403 = shalt.err (!%p9400_p9)
}
  0x75   : > { %s9516_s0 = smov 512   ;;  %s9517_s14 = smov 32  }
  0x76   : > { %8620 = dma.hbm_to_vmem [thread:$0]  (!%p9670_p12), %s11007_s9, 32768, %s483_s25, [#allocation6], %s9516_s0, %s9516_s0, %s9517_s14  }
  0x77   : > { %s9518_s20 = smov [#allocation10]   ;;  %s9404_s24 = scalar_lea.hbm %s11011_s13, 8192 }
  0x78   : > { %s514_s22 = sshll.u32 %s9518_s20, 4  ;;  %p9405_p5 = scmp.ne.s32.totalorder %s11011_s13, %s9404_s24  ;;  %s515_s22 = int_to_ptr.vmem [resolvable:$true] %s514_s22 }
  0x79   : > { %p9411_p3 = scmp.lt.u32.totalorder %s9404_s24, %s11011_s13 }
  0x7a   : > { %p9407_p10 = pnand %p9405_p5, %p9686_p0 }
  0x7c   : > { %p9408_p2 = pneg %p9407_p10 }
  0x7e   : > { %p9413_p4 = pnand %p9411_p3, %p9408_p2 }
  0x80   : > { %9416 = shalt.err (!%p9413_p4)
}
  0x81   : > { %s9417_s25 = scalar_lea.vmem %s515_s22, 8192  ;;  %p9425_p13 = scmp.lt.s32.totalorder %s515_s22, %s515_s22 }
  0x82   : > { %p9418_p7 = scmp.ne.s32.totalorder %s515_s22, %s9417_s25  ;;  %p9426_p1 = scmp.lt.s32.totalorder %s9417_s25, %s9417_s25 }
  0x84   : > { %p9420_p8 = pnand %p9418_p7, %p9686_p0  ;;  %p9427_p6 = por %p9426_p1, %p9425_p13 }
  0x86   : > { %p9421_p11 = pneg %p9420_p8 }
  0x88   : > { %p9428_p9 = pnand %p9427_p6, %p9421_p11 }
  0x8a   : > { %9431 = shalt.err (!%p9428_p9)
}
  0x8b   : > { %s11057_s0 = smov 8   ;;  %s11058_s14 = smov 128  }
  0x8c   : > { %8626 = dma.hbm_to_vmem [thread:$0]  (!%p9670_p12), %s11011_s13, 8192, %s515_s22, [#allocation9], %s11058_s14, %s11058_s14, %s11057_s0  }
  0x8d   : > { %p11059_p5 = scmp.ne.s32.totalorder %s11054_s21, 0 }
  0x8f   : > { %548 = sbr.rel (%p11059_p5) target bundleno = 2554 (0x9fa), region = 88 }
  0x96   : > { %p11060_p0 = scmp.eq.s32.totalorder %s9632_s28, 0 }
  0x98   : > { %9477 = dma.done.wait (%p11060_p0), [#allocation3], 2048   ;;  %p11061_p10 = pmov %p11060_p0 }
  0x99   : > { %p11062_p2 = pmov %p11060_p0 }
  0x9a   : > { %9479 = vsyncadd (%p11061_p10), [#allocation3], 4294965248 }
  0x9b   : > { %9481 = dma.done.wait (%p11062_p2), [#allocation6], 40960   ;;  %p11063_p3 = pmov %p11060_p0 }
  0x9c   : > { %p11064_p4 = pmov %p11060_p0 }
  0x9d   : > { %9483 = vsyncadd (%p11063_p3), [#allocation6], 4294926336 }
  0x9e   : > { %9485 = dma.done.wait (%p11064_p4), [#allocation9], 40960   ;;  %p11065_p12 = pmov %p11060_p0 }
  0x9f   : > { %s7484_s17 = sshll.u32 %s9632_s28, 4  ;;  %vm735_vm0 = vcmask 1043456   ;;  %vm639_vm1 = vcmask 64512   ;;  %s11066_s1 = sld [smem:[#allocation28_spill]]  ;;  %v8686_v15 = vld [vmem:[%s11001_s3] sm:$0xff]   ;;  %v8687_v63 = vld [vmem:[%s11001_s3 + $0x8] sm:$0xff]  }
  0xa0   : > { %9487 = vsyncadd (%p11065_p12), [#allocation9], 4294926336  ;;  %p617_p7 = scmp.lt.s32.totalorder %s7484_s17, 31  ;;  %s11067_s19 = sld [smem:[#allocation29_spill]]  ;;  %vm899_vm2 = vcmask 523264   ;;  %vm7334_vm3 = vcmask 1040384  }
  0xa1   : > { %s11076_s23 = sld [smem:[#allocation30_spill]]  ;;  %s11077_s26 = sld [smem:[#allocation17_spill]] }
  0xa2   : > { %s11091_s17 = smov (!%p617_p7, %s7484_s17), 31  ;;  %s11078_s14 = sld [smem:[#allocation31_spill]] }
  0xa3   : > { %s7485_s21 = sshll.u32 %s11091_s17, 3  ;;  %s11079_s18 = sld [smem:[#allocation22_spill]] }
  0xa4   : > { %s11080_s22 = sld [smem:[#allocation32_spill]] }
  0xa5   : > { %s9809_s20 = scalar_lea.vmem %s11066_s1, %s7485_s21  ;;  %s8165_s21 = sshll.u32 %s9632_s28, 7 }
  0xa6   : > { %v703_v0 = vld [vmem:[%s11067_s19] sm:$0xf]  ;;  %v9818_v2 = vld [vmem:[%s9809_s20 + $0x8] sm:$0xff]  ;;  %v9821_v4 = vld [vmem:[%s9809_s20 + $0x10] sm:$0xff]  ;;  %s9520_s28 = smov [#allocation11]  }
  0xa7   : > { %v9815_v1 = vld [vmem:[%s9809_s20] sm:$0xff]  ;;  %8588 = vmatprep.subr.msk.bf16.mxu0 %vm735_vm0, %v703_v0  ;;  %v737_v3 = vsel %vm735_vm0, %v703_v0, 0  ;;  %v9824_v5 = vld [vmem:[%s9809_s20 + $0x18] sm:$0xff]  ;;  %v641_v7 = vsel %vm639_vm1, %v9818_v2, 0.0  ;;  %v643_v10 = vsel %vm639_vm1, %v9821_v4, 0.0  ;;  %v628_v12 = vld [vmem:[%s9809_s20 + $0x28] sm:$0xff] }
  0xa8   : > { %v640_v6 = vsel %vm639_vm1, %v9815_v1, 0.0  ;;  %8225 = vmatpush3.bf16.msra.mxu0 %v737_v3  ;;  %v627_v8 = vld [vmem:[%s9809_s20 + $0x20] sm:$0xff]  ;;  %v645_v11 = vsel %vm639_vm1, %v9824_v5, 0.0  ;;  %v9841_v16 = vld [vmem:[%s9809_s20 + $0x30] sm:$0xff]  ;;  %v630_v18 = vld [vmem:[%s9809_s20 + $0x38] sm:$0xff]  ;;  %v649_v19 = vsel %vm639_vm1, %v628_v12, 0.0 }
  0xa9   : > { %v642_v9 = vadd.f32 %v641_v7, %v640_v6  ;;  %v647_v14 = vsel %vm639_vm1, %v627_v8, 0.0  ;;  %8242 = vmatprep.subr.bf16.mxu0 %v8686_v15  ;;  %v631_v20 = vld [vmem:[%s9809_s20 + $0x40] sm:$0xff]  ;;  %v651_v22 = vsel %vm639_vm1, %v9841_v16, 0.0  ;;  %v632_v23 = vld [vmem:[%s9809_s20 + $0x48] sm:$0xff]  ;;  %v653_v25 = vsel %vm639_vm1, %v630_v18, 0.0  ;;  %v9851_v26 = vld [vmem:[%s9809_s20 + $0x50] sm:$0xff] }
  0xaa   : > { %v655_v28 = vsel %vm639_vm1, %v631_v20, 0.0  ;;  %v634_v29 = vld [vmem:[%s9809_s20 + $0x58] sm:$0xff]  ;;  %v657_v31 = vsel %vm639_vm1, %v632_v23, 0.0  ;;  %v635_v32 = vld [vmem:[%s9809_s20 + $0x60] sm:$0xff]  ;;  %v659_v34 = vsel %vm639_vm1, %v9851_v26, 0.0  ;;  %v636_v35 = vld [vmem:[%s9809_s20 + $0x68] sm:$0xff]  ;;  %s10956_s30 = scalar_lea.hbm %s11080_s22, %s8165_s21 }
  0xab   : > { %v644_v13 = vadd.f32 %v643_v10, %v642_v9  ;;  %v661_v37 = vsel %vm639_vm1, %v634_v29, 0.0  ;;  %v637_v38 = vld [vmem:[%s9809_s20 + $0x70] sm:$0xff]  ;;  %v663_v40 = vsel %vm639_vm1, %v635_v32, 0.0  ;;  %v638_v41 = vld [vmem:[%s9809_s20 + $0x78] sm:$0xff]  ;;  %v665_v43 = vsel %vm639_vm1, %v636_v35, 0.0  ;;  %s613_s27 = sand.u32 1, %s11077_s26  }
  0xac   : > { %v667_v45 = vsel %vm639_vm1, %v637_v38, 0.0  ;;  %v669_v47 = vsel %vm639_vm1, %v638_v41, 0.0  ;;  %s7483_s17 = sshll.u32 %s613_s27, 3  ;;  %s7347_s19 = scalar_lea.sflag [#allocation4], %s613_s27 }
  0xad   : > { %v646_v17 = vadd.f32 %v645_v11, %v644_v13  ;;  %s615_s29 = scalar_lea.vmem [#allocation11], %s7483_s17  ;;  %p11081_p11 = scmp.ne.s32.totalorder %s11079_s18, 0 }
  0xae   : > { %s7360_s16 = sshll.u32 %s615_s29, 4  ;;  %s10958_s16 = int_to_ptr.vmem [resolvable:$true] %s7360_s16 }
  0xaf   : > { %v648_v21 = vadd.f32 %v647_v14, %v646_v17  ;;  %s9432_s24 = scalar_lea.vmem %s10958_s16, 128 }
  0xb0   : > { %p9433_p8 = scmp.ne.s32.totalorder %s10958_s16, %s9432_s24 }
  0xb1   : > { %v650_v24 = vadd.f32 %v649_v19, %v648_v21  ;;  %v8689_v19 = vld [vmem:[%s11001_s3 + $0x18] sm:$0xff]   ;;  %v9893_v21 = vld [vmem:[%s11000_s2] ss:$0 sm:$0xff] }
  0xb2   : > { %p9434_p13 = pnand %p9433_p8, %p11081_p11 }
  0xb3   : > { %v652_v27 = vadd.f32 %v651_v22, %v650_v24 }
  0xb4   : > { %p9435_p1 = pneg %p9434_p13 }
  0xb5   : > { %v654_v30 = vadd.f32 %v653_v25, %v652_v27 }
  0xb7   : > { %v656_v33 = vadd.f32 %v655_v28, %v654_v30 }
  0xb9   : > { %v658_v36 = vadd.f32 %v657_v31, %v656_v33 }
  0xbb   : > { %v660_v39 = vadd.f32 %v659_v34, %v658_v36 }
  0xbd   : > { %v662_v42 = vadd.f32 %v661_v37, %v660_v39  ;;  %v8690_v37 = vld [vmem:[#allocation2] ss:$8 sps:$4 sm:$0xff]  }
  0xbf   : > { %v664_v44 = vadd.f32 %v663_v40, %v662_v42  ;;  %v8695_v40 = vld [vmem:[#allocation2 + $0x14] ss:$8 sps:$4 sm:$0xff]  }
  0xc1   : > { %v666_v46 = vadd.f32 %v665_v43, %v664_v44 }
  0xc3   : > { %v668_v48 = vadd.f32 %v667_v45, %v666_v46 }
  0xc5   : > { %v670_v49 = vadd.f32 %v669_v47, %v668_v48  ;;  %v8693_v48 = vld [vmem:[#allocation2 + $0x10] ss:$8 sps:$4 sm:$0xff]  }
  0xc7   : > { %v671_v50 = vrot.slane %v670_v49, 4 }
  0xc9   : > { %v672_v51 = vadd.f32 %v671_v50, %v670_v49  ;;  %v8698_v50 = vld [vmem:[#allocation2 + $0x24] ss:$8 sps:$4 sm:$0xff]  }
  0xcb   : > { %v673_v52 = vrot.slane %v672_v51, 2 }
  0xcd   : > { %v674_v53 = vadd.f32 %v673_v52, %v672_v51 }
  0xcf   : > { %v675_v54 = vrot.slane %v674_v53, 1 }
  0xd1   : > { %v676_v55 = vadd.f32 %v675_v54, %v674_v53 }
  0xd3   : > { %v678_v56 = vmul.f32 0.0078125, %v676_v55  ;;  %v8696_v55 = vld [vmem:[#allocation2 + $0x20] ss:$8 sps:$4 sm:$0xff]  }
  0xd5   : > { %v679_v57 = vsub.f32 %v9815_v1, %v678_v56  ;;  %v680_v58 = vsub.f32 %v9818_v2, %v678_v56  ;;  %v681_v59 = vsub.f32 %v9821_v4, %v678_v56  ;;  %v682_v60 = vsub.f32 %v9824_v5, %v678_v56  ;;  %v8688_v4 = vld [vmem:[%s11001_s3 + $0x10] sm:$0xff]  }
  0xd6   : > { %v683_v61 = vsub.f32 %v627_v8, %v678_v56  ;;  %v684_v62 = vsub.f32 %v628_v12, %v678_v56  ;;  %v685_v1 = vsub.f32 %v9841_v16, %v678_v56  ;;  %v686_v2 = vsub.f32 %v630_v18, %v678_v56 }
  0xd7   : > { %v695_v0 = vpack.c.bf16 %v680_v58, %v679_v57  ;;  %v696_v3 = vpack.c.bf16 %v682_v60, %v681_v59  ;;  %v687_v5 = vsub.f32 %v631_v20, %v678_v56  ;;  %v688_v7 = vsub.f32 %v632_v23, %v678_v56  ;;  %v8692_v20 = vld [vmem:[#allocation2 + $0x4] ss:$8 sps:$4 sm:$0xff]   ;;  %v8701_v58 = vld [vmem:[#allocation2 + $0x34] ss:$8 sps:$4 sm:$0xff]  }
  0xd8   : > { %v697_v6 = vpack.c.bf16 %v684_v62, %v683_v61  ;;  %v698_v8 = vpack.c.bf16 %v686_v2, %v685_v1  ;;  %v689_v10 = vsub.f32 %v9851_v26, %v678_v56  ;;  %v690_v11 = vsub.f32 %v634_v29, %v678_v56  ;;  %v8704_v2 = vld [vmem:[#allocation2 + $0x44] ss:$8 sps:$4 sm:$0xff]  }
  0xd9   : > { %8226 = vmatprep.mubr.msk.bf16.mxu0 %vm639_vm1, %v695_v0  ;;  %v699_v9 = vpack.c.bf16 %v688_v7, %v687_v5  ;;  %v691_v12 = vsub.f32 %v635_v32, %v678_v56  ;;  %v692_v13 = vsub.f32 %v636_v35, %v678_v56  ;;  %v694_v17 = vsub.f32 %v638_v41, %v678_v56 }
  0xda   : > { %8227 = vmatmul.mubr.msk.bf16.vlgmr.msra.gmra.mrb[0].mxu0 %vm639_vm1, %v696_v3  ;;  %v700_v14 = vpack.c.bf16 %v690_v11, %v689_v10 }
  0xdb   : > { %8230 = vmatprep.mubr.msk.bf16.mxu0 %vm639_vm1, %v697_v6  ;;  %8243 = vmatpush3.bf16.msra.mxu0 %v8686_v15  ;;  %v701_v16 = vpack.c.bf16 %v692_v13, %v691_v12  ;;  %v693_v15 = vsub.f32 %v637_v38, %v678_v56  ;;  %v8699_v6 = vld [vmem:[#allocation2 + $0x30] ss:$8 sps:$4 sm:$0xff]   ;;  %v8707_v12 = vld [vmem:[#allocation2 + $0x54] ss:$8 sps:$4 sm:$0xff]  }
  0xdc   : > { %8244 = vmatprep.subr.bf16.mxu0 %v8687_v63 }
  0xdd   : > { %v702_v18 = vpack.c.bf16 %v694_v17, %v693_v15 }
  0xdf   : > { %8245 = vmatpush3.bf16.msra.mxu0 %v8687_v63 }
  0xe0   : > { %8246 = vmatprep.subr.bf16.mxu0 %v8688_v4 }
  0xe2   : > { %8231 = vmatmul.mubr.msk.bf16.gmra.mrb[4].mxu0 %vm639_vm1, %v698_v8 }
  0xe3   : > { %8234 = vmatprep.mubr.msk.bf16.mxu0 %vm639_vm1, %v699_v9  ;;  %8247 = vmatpush3.bf16.msra.mxu0 %v8688_v4  ;;  %v8702_v9 = vld [vmem:[#allocation2 + $0x40] ss:$8 sps:$4 sm:$0xff]  }
  0xe4   : > { %8248 = vmatprep.subr.bf16.mxu0 %v8689_v19 }
  0xe7   : > { %8249 = vmatpush3.bf16.msra.mxu0 %v8689_v19 }
  0xe8   : > { %1153 = vmatprep.subr.bf16.mxu0 %v8692_v20  ;;  %v8705_v20 = vld [vmem:[#allocation2 + $0x50] ss:$8 sps:$4 sm:$0xff]  }
  0xea   : > { %8235 = vmatmul.mubr.msk.bf16.gmra.mrb[8].mxu0 %vm639_vm1, %v700_v14 }
  0xeb   : > { %8238 = vmatprep.mubr.msk.bf16.mxu0 %vm639_vm1, %v701_v16 }
  0xf2   : > { %8239 = vmatmul.mubr.msk.bf16.gmra.mrb[12].mxu0 %vm639_vm1, %v702_v18 }
 0x1ad   : > { %v8228_v22 = vpop.f32.mrb[0].mxu0 }
 0x1ae   : > { %v782_v23 = vadd.f32 %v8228_v22, %v9893_v21  ;;  %v773_v24 = vpop.f32.mrb[1].mxu0 }
 0x1af   : > { %v774_v25 = vadd.f32 %v9893_v21, %v773_v24  ;;  %v8229_v26 = vpop.f32.mrb[2].mxu0 }
 0x1b0   : > { %v785_v27 = vadd.f32 %v8229_v26, %v9893_v21  ;;  %v776_v28 = vpop.f32.mrb[3].mxu0  ;;  %v838_v30 = vmax.f32 %v782_v23, 0.0  ;;  %v8710_v26 = vld [vmem:[#allocation2 + $0x64] ss:$8 sps:$4 sm:$0xff]  }
 0x1b1   : > { %v777_v29 = vadd.f32 %v9893_v21, %v776_v28  ;;  %v836_v32 = vmax.f32 %v774_v25, 0.0  ;;  %v8713_v28 = vld [vmem:[#allocation2 + $0x74] ss:$8 sps:$4 sm:$0xff]  }
 0x1b2   : > { %v839_v31 = vmax.f32 %v785_v27, 0.0  ;;  %v8708_v27 = vld [vmem:[#allocation2 + $0x60] ss:$8 sps:$4 sm:$0xff]  }
 0x1b3   : > { %v837_v33 = vmax.f32 %v777_v29, 0.0  ;;  %v8711_v29 = vld [vmem:[#allocation2 + $0x70] ss:$8 sps:$4 sm:$0xff]  }
 0x1b4   : > { %v853_v34 = vpack.c.bf16 %v839_v31, %v838_v30  ;;  %v8714_v30 = vld [vmem:[#allocation5 + $0x4] ss:$16 sps:$4 sm:$0xff]   ;;  %v8718_v31 = vld [vmem:[#allocation5 + $0xc] ss:$16 sps:$4 sm:$0xff]  }
 0x1b5   : > { %v852_v35 = vpack.c.bf16 %v837_v33, %v836_v32  ;;  %v8232_v36 = vpop.f32.mrb[4].mxu0  ;;  %v8719_v32 = vld [vmem:[#allocation5] ss:$16 sps:$4 sm:$0xff]   ;;  %v8720_v33 = vld [vmem:[#allocation5 + $0x24] ss:$16 sps:$4 sm:$0xff]   ;;  %1720 = vmatprep.subr.bf16.mxu1 %v8714_v30 }
 0x1b6   : > { %v798_v38 = vadd.f32 %v8232_v36, %v9893_v21  ;;  %v789_v39 = vpop.f32.mrb[5].mxu0  ;;  %1721 = vmatpush1.bf16.msra.mxu1 %v8719_v32  ;;  %v8731_v36 = vld [vmem:[#allocation5 + $0x40] ss:$16 sps:$4 sm:$0xff]   ;;  %v8736_v30 = vld [vmem:[#allocation5 + $0x6c] ss:$16 sps:$4 sm:$0xff]  }
 0x1b7   : > { %v790_v41 = vadd.f32 %v9893_v21, %v789_v39  ;;  %8250 = vmatprep.mubr.msk.bf16.mxu0 %vm899_vm2, %v852_v35  ;;  %v8233_v42 = vpop.f32.mrb[6].mxu0  ;;  %1722 = vmatprep.subr.bf16.mxu1 %v8720_v33  ;;  %v8726_v35 = vld [vmem:[#allocation5 + $0x44] ss:$16 sps:$4 sm:$0xff]  }
 0x1b8   : > { %v842_v43 = vmax.f32 %v798_v38, 0.0  ;;  %v801_v44 = vadd.f32 %v8233_v42, %v9893_v21  ;;  %8251 = vmatmul.mubr.msk.bf16.vlgmr.msra.gmra.mrb[16].mxu0 %vm899_vm2, %v853_v34  ;;  %v792_v45 = vpop.f32.mrb[7].mxu0  ;;  %v8725_v34 = vld [vmem:[#allocation5 + $0x20] ss:$16 sps:$4 sm:$0xff]   ;;  %v8738_v39 = vld [vmem:[#allocation5 + $0x84] ss:$16 sps:$4 sm:$0xff]  }
 0x1b9   : > { %v840_v46 = vmax.f32 %v790_v41, 0.0  ;;  %v793_v47 = vadd.f32 %v9893_v21, %v792_v45  ;;  %1154 = vmatpush1.bf16.msra.mxu0 %v8690_v37  ;;  %v8732_v37 = vld [vmem:[#allocation5 + $0x64] ss:$16 sps:$4 sm:$0xff]   ;;  %v8737_v38 = vld [vmem:[#allocation5 + $0x60] ss:$16 sps:$4 sm:$0xff]  }
 0x1ba   : > { %v843_v49 = vmax.f32 %v801_v44, 0.0  ;;  %1155 = vmatprep.subr.bf16.mxu0 %v8695_v40  ;;  %1723 = vmatpush1.bf16.msra.mxu1 %v8725_v34  ;;  %v8743_v40 = vld [vmem:[#allocation5 + $0x80] ss:$16 sps:$4 sm:$0xff]   ;;  %v8744_v41 = vld [vmem:[#allocation5 + $0xa4] ss:$16 sps:$4 sm:$0xff]  }
 0x1bb   : > { %v841_v51 = vmax.f32 %v793_v47, 0.0  ;;  %1724 = vmatprep.subr.bf16.mxu1 %v8726_v35  ;;  %v8749_v42 = vld [vmem:[#allocation5 + $0xa0] ss:$16 sps:$4 sm:$0xff]   ;;  %v8756_v45 = vld [vmem:[#allocation5 + $0xe4] ss:$16 sps:$4 sm:$0xff]  }
 0x1bc   : > { %v855_v52 = vpack.c.bf16 %v843_v49, %v842_v43  ;;  %v8750_v43 = vld [vmem:[#allocation5 + $0xc4] ss:$16 sps:$4 sm:$0xff]   ;;  %v8755_v44 = vld [vmem:[#allocation5 + $0xc0] ss:$16 sps:$4 sm:$0xff]  }
 0x1bd   : > { %v854_v53 = vpack.c.bf16 %v841_v51, %v840_v46  ;;  %v8236_v54 = vpop.f32.mrb[8].mxu0  ;;  %1156 = vmatpush1.bf16.msra.mxu0 %v8693_v48  ;;  %v8761_v46 = vld [vmem:[#allocation5 + $0xe0] ss:$16 sps:$4 sm:$0xff]   ;;  %v8762_v47 = vld [vmem:[#allocation5 + $0x104] ss:$16 sps:$4 sm:$0xff]  }
 0x1be   : > { %v814_v56 = vadd.f32 %v8236_v54, %v9893_v21  ;;  %v805_v57 = vpop.f32.mrb[9].mxu0  ;;  %1157 = vmatprep.subr.bf16.mxu0 %v8698_v50  ;;  %1725 = vmatpush1.bf16.msra.mxu1 %v8731_v36  ;;  %v8767_v48 = vld [vmem:[#allocation5 + $0x100] ss:$16 sps:$4 sm:$0xff]   ;;  %v8768_v49 = vld [vmem:[#allocation5 + $0x124] ss:$16 sps:$4 sm:$0xff]  }
 0x1bf   : > { %8254 = vmatprep.mubr.msk.bf16.mxu0 %vm899_vm2, %v854_v53  ;;  %v806_v59 = vadd.f32 %v9893_v21, %v805_v57  ;;  %v8237_v60 = vpop.f32.mrb[10].mxu0  ;;  %1726 = vmatprep.subr.bf16.mxu1 %v8732_v37  ;;  %v8773_v50 = vld [vmem:[#allocation5 + $0x120] ss:$16 sps:$4 sm:$0xff]   ;;  %v8774_v51 = vld [vmem:[#allocation5 + $0x144] ss:$16 sps:$4 sm:$0xff]  }
 0x1c0   : > { %8255 = vmatmul.mubr.msk.bf16.gmra.mrb[20].mxu0 %vm899_vm2, %v855_v52  ;;  %v846_v61 = vmax.f32 %v814_v56, 0.0  ;;  %v817_v62 = vadd.f32 %v8237_v60, %v9893_v21  ;;  %v808_v63 = vpop.f32.mrb[11].mxu0  ;;  %v8779_v52 = vld [vmem:[#allocation5 + $0x140] ss:$16 sps:$4 sm:$0xff]   ;;  %v8780_v53 = vld [vmem:[#allocation5 + $0x164] ss:$16 sps:$4 sm:$0xff]  }
 0x1c1   : > { %v844_v0 = vmax.f32 %v806_v59, 0.0  ;;  %v809_v3 = vadd.f32 %v9893_v21, %v808_v63  ;;  %1158 = vmatpush1.bf16.msra.mxu0 %v8696_v55  ;;  %v8785_v54 = vld [vmem:[#allocation5 + $0x160] ss:$16 sps:$4 sm:$0xff]   ;;  %v8786_v55 = vld [vmem:[#allocation5 + $0x184] ss:$16 sps:$4 sm:$0xff]  }
 0x1c2   : > { %v847_v1 = vmax.f32 %v817_v62, 0.0  ;;  %1159 = vmatprep.subr.bf16.mxu0 %v8701_v58  ;;  %1727 = vmatpush1.bf16.msra.mxu1 %v8737_v38  ;;  %v8791_v56 = vld [vmem:[#allocation5 + $0x180] ss:$16 sps:$4 sm:$0xff]   ;;  %v8792_v57 = vld [vmem:[#allocation5 + $0x1a4] ss:$16 sps:$4 sm:$0xff]  }
 0x1c3   : > { %v845_v4 = vmax.f32 %v809_v3, 0.0  ;;  %1728 = vmatprep.subr.bf16.mxu1 %v8738_v39  ;;  %v9923_v58 = vld [vmem:[%s11002_s4] ss:$0 sm:$0xff]  ;;  %v8734_v38 = vld [vmem:[#allocation5 + $0x68] ss:$16 sps:$4 sm:$0xff]  }
 0x1c4   : > { %v857_v5 = vpack.c.bf16 %v847_v1, %v846_v61 }
 0x1c5   : > { %v856_v7 = vpack.c.bf16 %v845_v4, %v844_v0  ;;  %v8240_v8 = vpop.f32.mrb[12].mxu0  ;;  %1160 = vmatpush1.bf16.msra.mxu0 %v8699_v6 }
 0x1c6   : > { %v830_v10 = vadd.f32 %v8240_v8, %v9893_v21  ;;  %v821_v11 = vpop.f32.mrb[13].mxu0  ;;  %1161 = vmatprep.subr.bf16.mxu0 %v8704_v2  ;;  %1729 = vmatpush1.bf16.msra.mxu1 %v8743_v40  ;;  %v8716_v8 = vld [vmem:[#allocation5 + $0x8] ss:$16 sps:$4 sm:$0xff]  }
 0x1c7   : > { %8258 = vmatprep.mubr.msk.bf16.mxu0 %vm899_vm2, %v856_v7  ;;  %v822_v13 = vadd.f32 %v9893_v21, %v821_v11  ;;  %v8241_v14 = vpop.f32.mrb[14].mxu0  ;;  %1730 = vmatprep.subr.bf16.mxu1 %v8744_v41  ;;  %v8724_v11 = vld [vmem:[#allocation5 + $0x2c] ss:$16 sps:$4 sm:$0xff]  }
 0x1c8   : > { %8259 = vmatmul.mubr.msk.bf16.gmra.mrb[24].mxu0 %vm899_vm2, %v857_v5  ;;  %v850_v16 = vmax.f32 %v830_v10, 0.0  ;;  %v833_v15 = vadd.f32 %v8241_v14, %v9893_v21  ;;  %v824_v17 = vpop.f32.mrb[15].mxu0  ;;  %v8742_v41 = vld [vmem:[#allocation5 + $0x8c] ss:$16 sps:$4 sm:$0xff]  }
 0x1c9   : > { %v848_v18 = vmax.f32 %v822_v13, 0.0  ;;  %v825_v19 = vadd.f32 %v9893_v21, %v824_v17  ;;  %1162 = vmatpush1.bf16.msra.mxu0 %v8702_v9  ;;  %v9519_v21 = vmov 0  }
 0x1ca   : > { %v851_v22 = vmax.f32 %v833_v15, 0.0  ;;  %1163 = vmatprep.subr.bf16.mxu0 %v8707_v12  ;;  %1731 = vmatpush1.bf16.msra.mxu1 %v8749_v42 }
 0x1cb   : > { %v849_v23 = vmax.f32 %v825_v19, 0.0  ;;  %1732 = vmatprep.subr.bf16.mxu1 %v8750_v43  ;;  %v8722_v19 = vld [vmem:[#allocation5 + $0x28] ss:$16 sps:$4 sm:$0xff]  }
 0x1cc   : > { %v859_v24 = vpack.c.bf16 %v851_v22, %v850_v16 }
 0x1cd   : > { %v858_v25 = vpack.c.bf16 %v849_v23, %v848_v18  ;;  %1164 = vmatpush1.bf16.msra.mxu0 %v8705_v20  ;;  %v8730_v23 = vld [vmem:[#allocation5 + $0x4c] ss:$16 sps:$4 sm:$0xff]  }
 0x1ce   : > { %1165 = vmatprep.subr.bf16.mxu0 %v8710_v26  ;;  %1733 = vmatpush1.bf16.msra.mxu1 %v8755_v44 }
 0x1cf   : > { %8262 = vmatprep.mubr.msk.bf16.mxu0 %vm899_vm2, %v858_v25  ;;  %1734 = vmatprep.subr.bf16.mxu1 %v8756_v45  ;;  %v8740_v45 = vld [vmem:[#allocation5 + $0x88] ss:$16 sps:$4 sm:$0xff]  }
 0x1d0   : > { %8263 = vmatmul.mubr.msk.bf16.gmra.mrb[28].mxu0 %vm899_vm2, %v859_v24 }
 0x1d1   : > { %1166 = vmatpush1.bf16.msra.mxu0 %v8708_v27  ;;  %1185 = vmatprep.mubr.bf16.mxu0 %v9519_v21  ;;  %v8728_v27 = vld [vmem:[#allocation5 + $0x48] ss:$16 sps:$4 sm:$0xff]  }
 0x1d2   : > { %1167 = vmatprep.subr.bf16.mxu0 %v8713_v28  ;;  %1735 = vmatpush1.bf16.msra.mxu1 %v8761_v46 }
 0x1d3   : > { %1736 = vmatprep.subr.bf16.mxu1 %v8762_v47 }
 0x1d5   : > { %1168 = vmatpush1.bf16.msra.mxu0 %v8711_v29 }
 0x1d6   : > { %1833 = vmatprep.subr.bf16.mxu0 %v8718_v31  ;;  %1737 = vmatpush1.bf16.msra.mxu1 %v8767_v48  ;;  %v8748_v48 = vld [vmem:[#allocation5 + $0xac] ss:$16 sps:$4 sm:$0xff]  }
 0x1d7   : > { %1738 = vmatprep.subr.bf16.mxu1 %v8768_v49 }
 0x1da   : > { %1739 = vmatpush1.bf16.msra.mxu1 %v8773_v50 }
 0x1db   : > { %1740 = vmatprep.subr.bf16.mxu1 %v8774_v51 }
 0x1de   : > { %1741 = vmatpush1.bf16.msra.mxu1 %v8779_v52 }
 0x1df   : > { %1742 = vmatprep.subr.bf16.mxu1 %v8780_v53 }
 0x1e2   : > { %1743 = vmatpush1.bf16.msra.mxu1 %v8785_v54 }
 0x1e3   : > { %1744 = vmatprep.subr.bf16.mxu1 %v8786_v55 }
 0x1e6   : > { %1745 = vmatpush1.bf16.msra.mxu1 %v8791_v56  ;;  %v8746_v56 = vld [vmem:[#allocation5 + $0xa8] ss:$16 sps:$4 sm:$0xff]  }
 0x1e7   : > { %1746 = vmatprep.subr.bf16.mxu1 %v8792_v57 }
 0x28b   : > { %v8252_v59 = vpop.f32.mrb[16].mxu0 }
 0x28c   : > { %v967_v60 = vadd.f32 %v8252_v59, %v9923_v58  ;;  %v958_v61 = vpop.f32.mrb[17].mxu0 }
 0x28d   : > { %v959_v62 = vadd.f32 %v9923_v58, %v958_v61  ;;  %v8253_v63 = vpop.f32.mrb[18].mxu0 }
 0x28e   : > { %v970_v0 = vadd.f32 %v8253_v63, %v9923_v58  ;;  %v961_v3 = vpop.f32.mrb[19].mxu0  ;;  %v1023_v1 = vmax.f32 %v967_v60, 0.0  ;;  %v8754_v60 = vld [vmem:[#allocation5 + $0xcc] ss:$16 sps:$4 sm:$0xff]  }
 0x28f   : > { %v962_v6 = vadd.f32 %v9923_v58, %v961_v3  ;;  %v1021_v4 = vmax.f32 %v959_v62, 0.0 }
 0x290   : > { %v1024_v2 = vmax.f32 %v970_v0, 0.0  ;;  %v8752_v0 = vld [vmem:[#allocation5 + $0xc8] ss:$16 sps:$4 sm:$0xff]  }
 0x291   : > { %v1022_v5 = vmax.f32 %v962_v6, 0.0  ;;  %v8760_v6 = vld [vmem:[#allocation5 + $0xec] ss:$16 sps:$4 sm:$0xff]  }
 0x292   : > { %v1038_v7 = vpack.c.bf16 %v1024_v2, %v1023_v1  ;;  %v8758_v1 = vld [vmem:[#allocation5 + $0xe8] ss:$16 sps:$4 sm:$0xff]   ;;  %v8766_v2 = vld [vmem:[#allocation5 + $0x10c] ss:$16 sps:$4 sm:$0xff]  }
 0x293   : > { %v1037_v9 = vpack.c.bf16 %v1022_v5, %v1021_v4  ;;  %v8256_v10 = vpop.f32.mrb[20].mxu0  ;;  %v8764_v4 = vld [vmem:[#allocation5 + $0x108] ss:$16 sps:$4 sm:$0xff]  }
 0x294   : > { %v983_v12 = vadd.f32 %v8256_v10, %v9923_v58  ;;  %v974_v13 = vpop.f32.mrb[21].mxu0  ;;  %v8770_v5 = vld [vmem:[#allocation5 + $0x128] ss:$16 sps:$4 sm:$0xff]  }
 0x295   : > { %v975_v14 = vadd.f32 %v9923_v58, %v974_v13  ;;  %1186 = vmatmul.mubr.bf16.vlgmr.msra.gmra.mrb[32].mxu0 %v1037_v9  ;;  %v8257_v16 = vpop.f32.mrb[22].mxu0  ;;  %v8784_v9 = vld [vmem:[#allocation5 + $0x16c] ss:$16 sps:$4 sm:$0xff]   ;;  %v8782_v10 = vld [vmem:[#allocation5 + $0x168] ss:$16 sps:$4 sm:$0xff]  }
 0x296   : > { %v1027_v15 = vmax.f32 %v983_v12, 0.0  ;;  %v986_v17 = vadd.f32 %v8257_v16, %v9923_v58  ;;  %v977_v18 = vpop.f32.mrb[23].mxu0  ;;  %1195 = vmatprep.mubr.bf16.mxu0 %v9519_v21  ;;  %1834 = vmatpush1.bf16.msra.mxu0 %v8716_v8  ;;  %v8776_v8 = vld [vmem:[#allocation5 + $0x148] ss:$16 sps:$4 sm:$0xff]   ;;  %v8796_v13 = vld [vmem:[#allocation5 + $0x1ac] ss:$16 sps:$4 sm:$0xff]  }
 0x297   : > { %v1025_v20 = vmax.f32 %v975_v14, 0.0  ;;  %v978_v22 = vadd.f32 %v9923_v58, %v977_v18  ;;  %1835 = vmatprep.subr.bf16.mxu0 %v8724_v11  ;;  %v8790_v11 = vld [vmem:[#allocation5 + $0x18c] ss:$16 sps:$4 sm:$0xff]   ;;  %v8788_v12 = vld [vmem:[#allocation5 + $0x188] ss:$16 sps:$4 sm:$0xff]  }
 0x298   : > { %v1028_v24 = vmax.f32 %v986_v17, 0.0  ;;  %v8794_v14 = vld [vmem:[#allocation5 + $0x1a8] ss:$16 sps:$4 sm:$0xff]   ;;  %v8797_v16 = vld [vmem:[#allocation5 + $0x1a0] ss:$16 sps:$4 sm:$0xff]  }
 0x299   : > { %v1026_v25 = vmax.f32 %v978_v22, 0.0  ;;  %1747 = vmatpush1.bf16.msra.mxu1 %v8797_v16  ;;  %v8802_v17 = vld [vmem:[#allocation5 + $0x1cc] ss:$16 sps:$4 sm:$0xff]   ;;  %v8800_v18 = vld [vmem:[#allocation5 + $0x1c8] ss:$16 sps:$4 sm:$0xff]  }
 0x29a   : > { %v1040_v26 = vpack.c.bf16 %v1028_v24, %v1027_v15  ;;  %1836 = vmatpush1.bf16.msra.mxu0 %v8722_v19  ;;  %v8798_v15 = vld [vmem:[#allocation5 + $0x1c4] ss:$16 sps:$4 sm:$0xff]   ;;  %v8803_v19 = vld [vmem:[#allocation5 + $0x1c0] ss:$16 sps:$4 sm:$0xff]   ;;  %v8808_v22 = vld [vmem:[#allocation5 + $0x1ec] ss:$16 sps:$4 sm:$0xff]  }
 0x29b   : > { %v1039_v28 = vpack.c.bf16 %v1026_v25, %v1025_v20  ;;  %v8260_v29 = vpop.f32.mrb[24].mxu0  ;;  %1837 = vmatprep.subr.bf16.mxu0 %v8730_v23  ;;  %1748 = vmatprep.subr.bf16.mxu1 %v8798_v15  ;;  %v8804_v20 = vld [vmem:[#allocation5 + $0x1e4] ss:$16 sps:$4 sm:$0xff]   ;;  %v8806_v23 = vld [vmem:[#allocation5 + $0x1e8] ss:$16 sps:$4 sm:$0xff]  }
 0x29c   : > { %v999_v31 = vadd.f32 %v8260_v29, %v9923_v58  ;;  %v990_v32 = vpop.f32.mrb[25].mxu0  ;;  %v8809_v24 = vld [vmem:[#allocation5 + $0x1e0] ss:$16 sps:$4 sm:$0xff]   ;;  %v2047_v29 = vld [vmem:[#allocation7 + $0x28] sm:$0xff] }
 0x29d   : > { %1196 = vmatmul.mubr.bf16.gmra.mrb[36].mxu0 %v1038_v7  ;;  %v991_v33 = vadd.f32 %v9923_v58, %v990_v32  ;;  %v8261_v34 = vpop.f32.mrb[26].mxu0  ;;  %v8778_v7 = vld [vmem:[#allocation5 + $0x14c] ss:$16 sps:$4 sm:$0xff]   ;;  %1749 = vmatpush1.bf16.msra.mxu1 %v8803_v19  ;;  %v2046_v25 = vld [vmem:[#allocation7 + $0x20] sm:$0xff]  ;;  %v1063_v32 = vlaneseq }
 0x29e   : > { %v1031_v35 = vmax.f32 %v999_v31, 0.0  ;;  %1205 = vmatprep.mubr.bf16.mxu0 %v9519_v21  ;;  %v1002_v36 = vadd.f32 %v8261_v34, %v9923_v58  ;;  %v993_v37 = vpop.f32.mrb[27].mxu0  ;;  %1838 = vmatpush1.bf16.msra.mxu0 %v8728_v27  ;;  %v2070_v15 = vld [vmem:[#allocation7 + $0xe0] sm:$0xff] }
 0x29f   : > { %v1029_v39 = vmax.f32 %v991_v33, 0.0  ;;  %v994_v40 = vadd.f32 %v9923_v58, %v993_v37  ;;  %1839 = vmatprep.subr.bf16.mxu0 %v8736_v30  ;;  %1750 = vmatprep.subr.bf16.mxu1 %v8804_v20  ;;  %v9948_v33 = vshrl.u32 %v1063_v32, 7  ;;  %v2075_v32 = vld [vmem:[#allocation7 + $0x108] sm:$0xff] }
 0x2a0   : > { %v1032_v42 = vmax.f32 %v1002_v36, 0.0 }
 0x2a1   : > { %v1030_v43 = vmax.f32 %v994_v40, 0.0  ;;  %1751 = vmatpush1.bf16.msra.mxu1 %v8809_v24  ;;  %11068 = vst [vmem:[#allocation24_spill] sm:$0xff] %v9948_v33  ;;  %v9951_v34 = vsub.s32 0, %v9948_v33  ;;  %v9957_v36 = vsub.s32 1, %v9948_v33 }
 0x2a2   : > { %v1042_v44 = vpack.c.bf16 %v1032_v42, %v1031_v35  ;;  %1840 = vmatpush1.bf16.msra.mxu0 %v8734_v38  ;;  %v1061_v35 = vld [vmem:[%s11004_s6] sm:$0x3] }
 0x2a3   : > { %v1041_v46 = vpack.c.bf16 %v1030_v43, %v1029_v39  ;;  %v8264_v47 = vpop.f32.mrb[28].mxu0  ;;  %1841 = vmatprep.subr.bf16.mxu0 %v8742_v41  ;;  %11069 = vst [vmem:[#allocation25_spill] sm:$0xff] %v9957_v36  ;;  %v9960_v37 = vrot.slane %v1061_v35, %v9951_v34  ;;  %v9963_v38 = vrot.slane %v1061_v35, %v9957_v36  ;;  %v2079_v35 = vld [vmem:[#allocation7 + $0x128] sm:$0xff] }
 0x2a4   : > { %v1015_v49 = vadd.f32 %v8264_v47, %v9923_v58  ;;  %v1006_v50 = vpop.f32.mrb[29].mxu0 }
 0x2a5   : > { %1206 = vmatmul.mubr.bf16.gmra.mrb[40].mxu0 %v1039_v28  ;;  %v1007_v51 = vadd.f32 %v9923_v58, %v1006_v50  ;;  %v8265_v52 = vpop.f32.mrb[30].mxu0 }
 0x2a6   : > { %1215 = vmatprep.mubr.bf16.mxu0 %v9519_v21  ;;  %v1035_v53 = vmax.f32 %v1015_v49, 0.0  ;;  %v1018_v54 = vadd.f32 %v8265_v52, %v9923_v58  ;;  %v1009_v55 = vpop.f32.mrb[31].mxu0  ;;  %1842 = vmatpush1.bf16.msra.mxu0 %v8740_v45  ;;  %v2050_v49 = vld [vmem:[#allocation7 + $0x40] sm:$0xff] }
 0x2a7   : > { %v1033_v57 = vmax.f32 %v1007_v51, 0.0  ;;  %v1010_v59 = vadd.f32 %v9923_v58, %v1009_v55  ;;  %1843 = vmatprep.subr.bf16.mxu0 %v8748_v48  ;;  %v8772_v58 = vld [vmem:[#allocation5 + $0x12c] ss:$16 sps:$4 sm:$0xff]   ;;  %v2054_v52 = vld [vmem:[#allocation7 + $0x60] sm:$0xff] }
 0x2a8   : > { %v1036_v61 = vmax.f32 %v1018_v54, 0.0  ;;  %v2055_v54 = vld [vmem:[#allocation7 + $0x68] sm:$0xff] }
 0x2a9   : > { %v1034_v62 = vmax.f32 %v1010_v59, 0.0 }
 0x2aa   : > { %v1044_v63 = vpack.c.bf16 %v1036_v61, %v1035_v53  ;;  %1844 = vmatpush1.bf16.msra.mxu0 %v8746_v56  ;;  %v2051_v53 = vld [vmem:[#allocation7 + $0x48] sm:$0xff]  ;;  %v7597_v61 = vcombine.high %v2050_v49, %v2054_v52 }
 0x2ab   : > { %v1043_v3 = vpack.c.bf16 %v1034_v62, %v1033_v57  ;;  %1845 = vmatprep.subr.bf16.mxu0 %v8754_v60  ;;  %v7599_v62 = vcombine.high %v2051_v53, %v2055_v54 }
 0x2ad   : > { %1216 = vmatmul.mubr.bf16.gmra.mrb[44].mxu0 %v1040_v26  ;;  %v2043_v26 = vld [vmem:[#allocation7 + $0x8] sm:$0xff] }
 0x2ae   : > { %1225 = vmatprep.mubr.bf16.mxu0 %v9519_v21  ;;  %1846 = vmatpush1.bf16.msra.mxu0 %v8752_v0  ;;  %v7590_v30 = vcombine.low %v2043_v26, %v2047_v29  ;;  %v7591_v31 = vcombine.high %v2043_v26, %v2047_v29 }
 0x2af   : > { %1847 = vmatprep.subr.bf16.mxu0 %v8760_v6  ;;  %v2062_v6 = vld [vmem:[#allocation7 + $0xa0] sm:$0xff] }
 0x2b2   : > { %1848 = vmatpush1.bf16.msra.mxu0 %v8758_v1  ;;  %v2059_v1 = vld [vmem:[#allocation7 + $0x88] sm:$0xff] }
 0x2b3   : > { %1849 = vmatprep.subr.bf16.mxu0 %v8766_v2  ;;  %v2063_v2 = vld [vmem:[#allocation7 + $0xa8] sm:$0xff] }
 0x2b4   : > { %v7606_v24 = vcombine.low %v2059_v1, %v2063_v2 }
 0x2b5   : > { %1226 = vmatmul.mubr.bf16.gmra.mrb[48].mxu0 %v1041_v46 }
 0x2b6   : > { %1235 = vmatprep.mubr.bf16.mxu0 %v9519_v21  ;;  %1850 = vmatpush1.bf16.msra.mxu0 %v8764_v4 }
 0x2b7   : > { %1851 = vmatprep.subr.bf16.mxu0 %v8772_v58 }
 0x2ba   : > { %1852 = vmatpush1.bf16.msra.mxu0 %v8770_v5 }
 0x2bb   : > { %1853 = vmatprep.subr.bf16.mxu0 %v8778_v7  ;;  %v7596_v7 = vcombine.low %v2050_v49, %v2054_v52  ;;  %v2083_v52 = vld [vmem:[#allocation7 + $0x148] sm:$0xff] }
 0x2bd   : > { %1236 = vmatmul.mubr.bf16.gmra.mrb[52].mxu0 %v1042_v44 }
 0x2be   : > { %1245 = vmatprep.mubr.bf16.mxu0 %v9519_v21  ;;  %1854 = vmatpush1.bf16.msra.mxu0 %v8776_v8  ;;  %v7598_v8 = vcombine.low %v2051_v53, %v2055_v54  ;;  %v2087_v53 = vld [vmem:[#allocation7 + $0x168] sm:$0xff] }
 0x2bf   : > { %1855 = vmatprep.subr.bf16.mxu0 %v8784_v9 }
 0x2c2   : > { %1856 = vmatpush1.bf16.msra.mxu0 %v8782_v10 }
 0x2c3   : > { %1857 = vmatprep.subr.bf16.mxu0 %v8790_v11 }
 0x2c5   : > { %1246 = vmatmul.mubr.bf16.gmra.mrb[56].mxu0 %v1043_v3 }
 0x2c6   : > { %1255 = vmatprep.mubr.bf16.mxu0 %v9519_v21  ;;  %1858 = vmatpush1.bf16.msra.mxu0 %v8788_v12  ;;  %v2042_v21 = vld [vmem:[#allocation7] sm:$0xff]  ;;  %v7607_v12 = vcombine.high %v2059_v1, %v2063_v2  ;;  %v2091_v2 = vld [vmem:[#allocation7 + $0x188] sm:$0xff] }
 0x2c7   : > { %1859 = vmatprep.subr.bf16.mxu0 %v8796_v13  ;;  %v7588_v27 = vcombine.low %v2042_v21, %v2046_v25  ;;  %v7589_v28 = vcombine.high %v2042_v21, %v2046_v25  ;;  %v2066_v13 = vld [vmem:[#allocation7 + $0xc0] sm:$0xff] }
 0x2c8   : > { %v7613_v26 = vcombine.high %v2066_v13, %v2070_v15  ;;  %v2094_v1 = vld [vmem:[#allocation7 + $0x1a0] sm:$0xff] }
 0x2c9   : > { %3620 = vmatprep.subr.bf16.mxu1 %v7589_v28  ;;  %v2074_v28 = vld [vmem:[#allocation7 + $0x100] sm:$0xff] }
 0x2ca   : > { %1860 = vmatpush1.bf16.msra.mxu0 %v8794_v14 }
 0x2cb   : > { %1861 = vmatprep.subr.bf16.mxu0 %v8802_v17  ;;  %v2067_v17 = vld [vmem:[#allocation7 + $0xc8] sm:$0xff] }
 0x2cd   : > { %1256 = vmatmul.mubr.bf16.gmra.mrb[60].mxu0 %v1044_v63  ;;  %v2058_v63 = vld [vmem:[#allocation7 + $0x80] sm:$0xff] }
 0x2ce   : > { %1862 = vmatpush1.bf16.msra.mxu0 %v8800_v18  ;;  %v7605_v11 = vcombine.high %v2058_v63, %v2062_v6  ;;  %v2071_v18 = vld [vmem:[#allocation7 + $0xe8] sm:$0xff] }
 0x2cf   : > { %1863 = vmatprep.subr.bf16.mxu0 %v8808_v22 }
 0x2d2   : > { %1864 = vmatpush1.bf16.msra.mxu0 %v8806_v23  ;;  %v7604_v23 = vcombine.low %v2058_v63, %v2062_v6  ;;  %v7631_v63 = vcombine.high %v2083_v52, %v2087_v53 }
 0x2d3   : > { %3846 = vmatprep.subr.bf16.mxu0 %v7591_v31  ;;  %v2078_v31 = vld [vmem:[#allocation7 + $0x120] sm:$0xff] }
 0x368   : > { %v1187_v39 = vpop.f32.mrb[32].mxu0 }
 0x369   : > { %v1188_v40 = vadd.f32 %v1187_v39, %v9960_v37  ;;  %v1189_v41 = vpop.f32.mrb[33].mxu0 }
 0x36a   : > { %v1190_v42 = vadd.f32 %v1189_v41, %v9963_v38  ;;  %v1191_v43 = vpop.f32.mrb[34].mxu0 }
 0x36b   : > { %v1192_v44 = vadd.f32 %v1191_v43, %v9960_v37  ;;  %v1193_v45 = vpop.f32.mrb[35].mxu0  ;;  %v1266_v47 = vmax.f32 %v1188_v40, 0.0  ;;  %v7614_v43 = vcombine.low %v2067_v17, %v2071_v18 }
 0x36c   : > { %v1194_v46 = vadd.f32 %v1193_v45, %v9963_v38  ;;  %v1267_v50 = vmax.f32 %v1190_v42, 0.0  ;;  %v7612_v42 = vcombine.low %v2066_v13, %v2070_v15 }
 0x36d   : > { %v1268_v48 = vmax.f32 %v1192_v44, 0.0 }
 0x36e   : > { %v1269_v51 = vmax.f32 %v1194_v46, 0.0  ;;  %v7621_v46 = vcombine.high %v2074_v28, %v2078_v31 }
 0x36f   : > { %v1298_v55 = vpack.c.bf16 %v1268_v48, %v1266_v47  ;;  %v7623_v47 = vcombine.high %v2075_v32, %v2079_v35  ;;  %v2082_v48 = vld [vmem:[#allocation7 + $0x140] sm:$0xff] }
 0x370   : > { %v1197_v56 = vpop.f32.mrb[36].mxu0  ;;  %v1299_v57 = vpack.c.bf16 %v1269_v51, %v1267_v50  ;;  %v2086_v51 = vld [vmem:[#allocation7 + $0x160] sm:$0xff] }
 0x371   : > { %v1198_v59 = vadd.f32 %v1197_v56, %v9960_v37  ;;  %v1199_v60 = vpop.f32.mrb[37].mxu0 }
 0x372   : > { %v1200_v0 = vadd.f32 %v1199_v60, %v9963_v38  ;;  %v1201_v3 = vpop.f32.mrb[38].mxu0  ;;  %1752 = vmatprep.mubr.bf16.mxu1 %v1299_v57  ;;  %1865 = vmatprep.mubr.bf16.mxu0 %v1299_v57  ;;  %v7620_v57 = vcombine.low %v2074_v28, %v2078_v31 }
 0x373   : > { %v1202_v4 = vadd.f32 %v1201_v3, %v9960_v37  ;;  %v1203_v58 = vpop.f32.mrb[39].mxu0  ;;  %1753 = vmatmul.mubr.bf16.vlgmr.msra.gmra.mrb[0].mxu1 %v1298_v55  ;;  %1866 = vmatmul.mubr.bf16.vlgmr.msra.gmra.mrb[64].mxu0 %v1298_v55  ;;  %v1270_v9 = vmax.f32 %v1198_v59, 0.0  ;;  %v7622_v59 = vcombine.low %v2075_v32, %v2079_v35  ;;  %v2110_v32 = vld [vmem:[#allocation7 + $0x220] sm:$0xff]  ;;  %v2107_v35 = vld [vmem:[#allocation7 + $0x208] sm:$0xff] }
 0x374   : > { %v1204_v5 = vadd.f32 %v1203_v58, %v9963_v38  ;;  %3621 = vmatpush1.bf16.msra.mxu1 %v7588_v27  ;;  %3847 = vmatpush1.bf16.msra.mxu0 %v7590_v30  ;;  %v1271_v14 = vmax.f32 %v1200_v0, 0.0  ;;  %v7615_v27 = vcombine.high %v2067_v17, %v2071_v18  ;;  %v2090_v0 = vld [vmem:[#allocation7 + $0x180] sm:$0xff]  ;;  %v2099_v18 = vld [vmem:[#allocation7 + $0x1c8] sm:$0xff] }
 0x375   : > { %v1272_v10 = vmax.f32 %v1202_v4, 0.0  ;;  %3622 = vmatprep.subr.bf16.mxu1 %v7597_v61  ;;  %3848 = vmatprep.subr.bf16.mxu0 %v7599_v62  ;;  %v7629_v62 = vcombine.high %v2082_v48, %v2086_v51  ;;  %v2095_v4 = vld [vmem:[#allocation7 + $0x1a8] sm:$0xff]  ;;  %v2102_v17 = vld [vmem:[#allocation7 + $0x1e0] sm:$0xff] }
 0x376   : > { %v1273_v16 = vmax.f32 %v1204_v5, 0.0  ;;  %v7639_v13 = vcombine.high %v2091_v2, %v2095_v4 }
 0x377   : > { %v1300_v19 = vpack.c.bf16 %v1272_v10, %v1270_v9  ;;  %v7630_v9 = vcombine.low %v2083_v52, %v2087_v53  ;;  %v2118_v52 = vld [vmem:[#allocation7 + $0x260] sm:$0xff]  ;;  %v2115_v53 = vld [vmem:[#allocation7 + $0x248] sm:$0xff] }
 0x378   : > { %v1301_v20 = vpack.c.bf16 %v1273_v16, %v1271_v14  ;;  %v1207_v22 = vpop.f32.mrb[40].mxu0  ;;  %3623 = vmatpush1.bf16.msra.mxu1 %v7596_v7  ;;  %3849 = vmatpush1.bf16.msra.mxu0 %v7598_v8  ;;  %v7628_v8 = vcombine.low %v2082_v48, %v2086_v51  ;;  %v2098_v14 = vld [vmem:[#allocation7 + $0x1c0] sm:$0xff] }
 0x379   : > { %v1208_v21 = vadd.f32 %v1207_v22, %v9960_v37  ;;  %v1209_v25 = vpop.f32.mrb[41].mxu0  ;;  %3624 = vmatprep.subr.bf16.mxu1 %v7605_v11  ;;  %3850 = vmatprep.subr.bf16.mxu0 %v7607_v12  ;;  %v7637_v12 = vcombine.high %v2090_v0, %v2094_v1 }
 0x37a   : > { %v1210_v29 = vadd.f32 %v1209_v25, %v9963_v38  ;;  %v1211_v30 = vpop.f32.mrb[42].mxu0  ;;  %1762 = vmatprep.mubr.bf16.mxu1 %v1301_v20  ;;  %1875 = vmatprep.mubr.bf16.mxu0 %v1301_v20 }
 0x37b   : > { %v1212_v39 = vadd.f32 %v1211_v30, %v9960_v37  ;;  %v1213_v40 = vpop.f32.mrb[43].mxu0  ;;  %1763 = vmatmul.mubr.bf16.gmra.mrb[4].mxu1 %v1300_v19  ;;  %1876 = vmatmul.mubr.bf16.gmra.mrb[68].mxu0 %v1300_v19  ;;  %v1274_v44 = vmax.f32 %v1208_v21, 0.0  ;;  %v2103_v19 = vld [vmem:[#allocation7 + $0x1e8] sm:$0xff]  ;;  %v7638_v21 = vcombine.low %v2091_v2, %v2095_v4  ;;  %v2126_v2 = vld [vmem:[#allocation7 + $0x2a0] sm:$0xff] }
 0x37c   : > { %v1214_v41 = vadd.f32 %v1213_v40, %v9963_v38  ;;  %3625 = vmatpush1.bf16.msra.mxu1 %v7604_v23  ;;  %3851 = vmatpush1.bf16.msra.mxu0 %v7606_v24  ;;  %v1275_v49 = vmax.f32 %v1210_v29, 0.0  ;;  %v7636_v24 = vcombine.low %v2090_v0, %v2094_v1  ;;  %v7647_v28 = vcombine.high %v2099_v18, %v2103_v19  ;;  %v2106_v29 = vld [vmem:[#allocation7 + $0x200] sm:$0xff]  ;;  %v2123_v4 = vld [vmem:[#allocation7 + $0x288] sm:$0xff] }
 0x37d   : > { %v1276_v45 = vmax.f32 %v1212_v39, 0.0  ;;  %3626 = vmatprep.subr.bf16.mxu1 %v7613_v26  ;;  %3852 = vmatprep.subr.bf16.mxu0 %v7615_v27  ;;  %v7645_v27 = vcombine.high %v2098_v14, %v2102_v17  ;;  %v2111_v39 = vld [vmem:[#allocation7 + $0x228] sm:$0xff] }
 0x37e   : > { %v1277_v50 = vmax.f32 %v1214_v41, 0.0  ;;  %v7655_v48 = vcombine.high %v2107_v35, %v2111_v39 }
 0x37f   : > { %v1302_v54 = vpack.c.bf16 %v1276_v45, %v1274_v44  ;;  %v7646_v44 = vcombine.low %v2099_v18, %v2103_v19  ;;  %v2134_v18 = vld [vmem:[#allocation7 + $0x2e0] sm:$0xff]  ;;  %v2131_v19 = vld [vmem:[#allocation7 + $0x2c8] sm:$0xff] }
 0x380   : > { %v1303_v55 = vpack.c.bf16 %v1277_v50, %v1275_v49  ;;  %v1217_v56 = vpop.f32.mrb[44].mxu0  ;;  %3627 = vmatpush1.bf16.msra.mxu1 %v7612_v42  ;;  %3853 = vmatpush1.bf16.msra.mxu0 %v7614_v43  ;;  %v7644_v43 = vcombine.low %v2098_v14, %v2102_v17  ;;  %v2114_v49 = vld [vmem:[#allocation7 + $0x240] sm:$0xff] }
 0x381   : > { %v1218_v60 = vadd.f32 %v1217_v56, %v9960_v37  ;;  %v1219_v61 = vpop.f32.mrb[45].mxu0  ;;  %3628 = vmatprep.subr.bf16.mxu1 %v7621_v46  ;;  %3854 = vmatprep.subr.bf16.mxu0 %v7623_v47  ;;  %v7653_v47 = vcombine.high %v2106_v29, %v2110_v32 }
 0x382   : > { %v1220_v3 = vadd.f32 %v1219_v61, %v9963_v38  ;;  %v1221_v6 = vpop.f32.mrb[46].mxu0  ;;  %1772 = vmatprep.mubr.bf16.mxu1 %v1303_v55  ;;  %1885 = vmatprep.mubr.bf16.mxu0 %v1303_v55 }
 0x383   : > { %v1222_v58 = vadd.f32 %v1221_v6, %v9960_v37  ;;  %v1223_v5 = vpop.f32.mrb[47].mxu0  ;;  %1773 = vmatmul.mubr.bf16.gmra.mrb[8].mxu1 %v1302_v54  ;;  %1886 = vmatmul.mubr.bf16.gmra.mrb[72].mxu0 %v1302_v54  ;;  %v1278_v10 = vmax.f32 %v1218_v60, 0.0  ;;  %v2119_v54 = vld [vmem:[#allocation7 + $0x268] sm:$0xff]  ;;  %v7654_v60 = vcombine.low %v2107_v35, %v2111_v39  ;;  %v2142_v35 = vld [vmem:[#allocation7 + $0x320] sm:$0xff] }
 0x384   : > { %v1224_v7 = vadd.f32 %v1223_v5, %v9963_v38  ;;  %3629 = vmatpush1.bf16.msra.mxu1 %v7620_v57  ;;  %3855 = vmatpush1.bf16.msra.mxu0 %v7622_v59  ;;  %v1279_v16 = vmax.f32 %v1220_v3, 0.0  ;;  %v7652_v59 = vcombine.low %v2106_v29, %v2110_v32  ;;  %v7663_v0 = vcombine.high %v2115_v53, %v2119_v54  ;;  %v2122_v3 = vld [vmem:[#allocation7 + $0x280] sm:$0xff]  ;;  %v2139_v39 = vld [vmem:[#allocation7 + $0x308] sm:$0xff] }
 0x385   : > { %v1280_v11 = vmax.f32 %v1222_v58, 0.0  ;;  %3630 = vmatprep.subr.bf16.mxu1 %v7629_v62  ;;  %3856 = vmatprep.subr.bf16.mxu0 %v7631_v63  ;;  %v7661_v63 = vcombine.high %v2114_v49, %v2118_v52  ;;  %v2127_v58 = vld [vmem:[#allocation7 + $0x2a8] sm:$0xff] }
 0x386   : > { %v1281_v15 = vmax.f32 %v1224_v7, 0.0  ;;  %v7671_v14 = vcombine.high %v2123_v4, %v2127_v58 }
 0x387   : > { %v1304_v20 = vpack.c.bf16 %v1280_v11, %v1278_v10  ;;  %v7662_v10 = vcombine.low %v2115_v53, %v2119_v54  ;;  %v2150_v53 = vld [vmem:[#allocation7 + $0x360] sm:$0xff]  ;;  %v2147_v54 = vld [vmem:[#allocation7 + $0x348] sm:$0xff] }
 0x388   : > { %v1305_v22 = vpack.c.bf16 %v1281_v15, %v1279_v16  ;;  %v1227_v23 = vpop.f32.mrb[48].mxu0  ;;  %3631 = vmatpush1.bf16.msra.mxu1 %v7628_v8  ;;  %3857 = vmatpush1.bf16.msra.mxu0 %v7630_v9  ;;  %v7660_v9 = vcombine.low %v2114_v49, %v2118_v52  ;;  %v2130_v16 = vld [vmem:[#allocation7 + $0x2c0] sm:$0xff] }
 0x389   : > { %v1228_v25 = vadd.f32 %v1227_v23, %v9960_v37  ;;  %v1229_v26 = vpop.f32.mrb[49].mxu0  ;;  %3632 = vmatprep.subr.bf16.mxu1 %v7637_v12  ;;  %3858 = vmatprep.subr.bf16.mxu0 %v7639_v13  ;;  %v7669_v13 = vcombine.high %v2122_v3, %v2126_v2 }
 0x38a   : > { %v1230_v30 = vadd.f32 %v1229_v26, %v9963_v38  ;;  %v1231_v31 = vpop.f32.mrb[50].mxu0  ;;  %1782 = vmatprep.mubr.bf16.mxu1 %v1305_v22  ;;  %1895 = vmatprep.mubr.bf16.mxu0 %v1305_v22 }
 0x38b   : > { %v1232_v40 = vadd.f32 %v1231_v31, %v9960_v37  ;;  %v1233_v41 = vpop.f32.mrb[51].mxu0  ;;  %1783 = vmatmul.mubr.bf16.gmra.mrb[12].mxu1 %v1304_v20  ;;  %1896 = vmatmul.mubr.bf16.gmra.mrb[76].mxu0 %v1304_v20  ;;  %v1282_v45 = vmax.f32 %v1228_v25, 0.0  ;;  %v2135_v20 = vld [vmem:[#allocation7 + $0x2e8] sm:$0xff]  ;;  %v7670_v25 = vcombine.low %v2123_v4, %v2127_v58 }
 0x38c   : > { %v1234_v42 = vadd.f32 %v1233_v41, %v9963_v38  ;;  %3633 = vmatpush1.bf16.msra.mxu1 %v7636_v24  ;;  %3859 = vmatpush1.bf16.msra.mxu0 %v7638_v21  ;;  %v1283_v50 = vmax.f32 %v1230_v30, 0.0  ;;  %v7668_v21 = vcombine.low %v2122_v3, %v2126_v2  ;;  %v7679_v29 = vcombine.high %v2131_v19, %v2135_v20  ;;  %v2138_v30 = vld [vmem:[#allocation7 + $0x300] sm:$0xff] }
 0x38d   : > { %v1284_v46 = vmax.f32 %v1232_v40, 0.0  ;;  %3634 = vmatprep.subr.bf16.mxu1 %v7645_v27  ;;  %3860 = vmatprep.subr.bf16.mxu0 %v7647_v28  ;;  %v7677_v28 = vcombine.high %v2130_v16, %v2134_v18  ;;  %v2143_v40 = vld [vmem:[#allocation7 + $0x328] sm:$0xff] }
 0x38e   : > { %v1285_v51 = vmax.f32 %v1234_v42, 0.0  ;;  %v7687_v49 = vcombine.high %v2139_v39, %v2143_v40 }
 0x38f   : > { %v1306_v55 = vpack.c.bf16 %v1284_v46, %v1282_v45  ;;  %v7678_v45 = vcombine.low %v2131_v19, %v2135_v20  ;;  %v2162_v20 = vld [vmem:[#allocation7 + $0x3c0] sm:$0xff] }
 0x390   : > { %v1307_v56 = vpack.c.bf16 %v1285_v51, %v1283_v50  ;;  %v1237_v57 = vpop.f32.mrb[52].mxu0  ;;  %3635 = vmatpush1.bf16.msra.mxu1 %v7644_v43  ;;  %3861 = vmatpush1.bf16.msra.mxu0 %v7646_v44  ;;  %v7676_v44 = vcombine.low %v2130_v16, %v2134_v18  ;;  %v2146_v50 = vld [vmem:[#allocation7 + $0x340] sm:$0xff] }
 0x391   : > { %v1238_v61 = vadd.f32 %v1237_v57, %v9960_v37  ;;  %v1239_v62 = vpop.f32.mrb[53].mxu0  ;;  %3636 = vmatprep.subr.bf16.mxu1 %v7653_v47  ;;  %3862 = vmatprep.subr.bf16.mxu0 %v7655_v48  ;;  %v7685_v48 = vcombine.high %v2138_v30, %v2142_v35 }
 0x392   : > { %v1240_v6 = vadd.f32 %v1239_v62, %v9963_v38  ;;  %v1241_v1 = vpop.f32.mrb[54].mxu0  ;;  %1792 = vmatprep.mubr.bf16.mxu1 %v1307_v56  ;;  %1905 = vmatprep.mubr.bf16.mxu0 %v1307_v56 }
 0x393   : > { %v1242_v5 = vadd.f32 %v1241_v1, %v9960_v37  ;;  %v1243_v7 = vpop.f32.mrb[55].mxu0  ;;  %1793 = vmatmul.mubr.bf16.gmra.mrb[16].mxu1 %v1306_v55  ;;  %1906 = vmatmul.mubr.bf16.gmra.mrb[80].mxu0 %v1306_v55  ;;  %v1286_v11 = vmax.f32 %v1238_v61, 0.0  ;;  %v2151_v55 = vld [vmem:[#allocation7 + $0x368] sm:$0xff]  ;;  %v7686_v61 = vcombine.low %v2139_v39, %v2143_v40 }
 0x394   : > { %v1244_v8 = vadd.f32 %v1243_v7, %v9963_v38  ;;  %3637 = vmatpush1.bf16.msra.mxu1 %v7652_v59  ;;  %3863 = vmatpush1.bf16.msra.mxu0 %v7654_v60  ;;  %v1287_v15 = vmax.f32 %v1240_v6, 0.0  ;;  %v7684_v60 = vcombine.low %v2138_v30, %v2142_v35  ;;  %v7695_v3 = vcombine.high %v2147_v54, %v2151_v55  ;;  %v10001_v30 = vld [vmem:[#allocation7 + $0x408] sm:$0xff] }
 0x395   : > { %v1288_v12 = vmax.f32 %v1242_v5, 0.0  ;;  %3638 = vmatprep.subr.bf16.mxu1 %v7661_v63  ;;  %3864 = vmatprep.subr.bf16.mxu0 %v7663_v0  ;;  %v7693_v0 = vcombine.high %v2146_v50, %v2150_v53  ;;  %v7692_v5 = vcombine.low %v2146_v50, %v2150_v53  ;;  %v7694_v7 = vcombine.low %v2147_v54, %v2151_v55  ;;  %v10034_v50 = vld [vmem:[#allocation7 + $0x440] sm:$0xff] }
 0x396   : > { %v1289_v17 = vmax.f32 %v1244_v8, 0.0 }
 0x397   : > { %v1308_v22 = vpack.c.bf16 %v1288_v12, %v1286_v11 }
 0x398   : > { %v1309_v23 = vpack.c.bf16 %v1289_v17, %v1287_v15  ;;  %v1247_v24 = vpop.f32.mrb[56].mxu0  ;;  %3639 = vmatpush1.bf16.msra.mxu1 %v7660_v9  ;;  %3865 = vmatpush1.bf16.msra.mxu0 %v7662_v10  ;;  %v2159_v15 = vld [vmem:[#allocation7 + $0x3a8] sm:$0xff] }
 0x399   : > { %v1248_v26 = vadd.f32 %v1247_v24, %v9960_v37  ;;  %v1249_v27 = vpop.f32.mrb[57].mxu0  ;;  %3640 = vmatprep.subr.bf16.mxu1 %v7669_v13  ;;  %3866 = vmatprep.subr.bf16.mxu0 %v7671_v14  ;;  %v2155_v14 = vld [vmem:[#allocation7 + $0x388] sm:$0xff] }
 0x39a   : > { %v1250_v31 = vadd.f32 %v1249_v27, %v9963_v38  ;;  %v1251_v32 = vpop.f32.mrb[58].mxu0  ;;  %1802 = vmatprep.mubr.bf16.mxu1 %v1309_v23  ;;  %1915 = vmatprep.mubr.bf16.mxu0 %v1309_v23  ;;  %v7702_v18 = vcombine.low %v2155_v14, %v2159_v15  ;;  %v7703_v19 = vcombine.high %v2155_v14, %v2159_v15  ;;  %v2163_v23 = vld [vmem:[#allocation7 + $0x3c8] sm:$0xff] }
 0x39b   : > { %v1252_v41 = vadd.f32 %v1251_v32, %v9960_v37  ;;  %v1253_v42 = vpop.f32.mrb[59].mxu0  ;;  %1803 = vmatmul.mubr.bf16.gmra.mrb[20].mxu1 %v1308_v22  ;;  %1916 = vmatmul.mubr.bf16.gmra.mrb[84].mxu0 %v1308_v22  ;;  %v1290_v46 = vmax.f32 %v1248_v26, 0.0  ;;  %v2166_v22 = vld [vmem:[#allocation7 + $0x3e0] sm:$0xff]  ;;  %v10005_v32 = vld [vmem:[#allocation7 + $0x428] sm:$0xff] }
 0x39c   : > { %v1254_v43 = vadd.f32 %v1253_v42, %v9963_v38  ;;  %3641 = vmatpush1.bf16.msra.mxu1 %v7668_v21  ;;  %3867 = vmatpush1.bf16.msra.mxu0 %v7670_v25  ;;  %v1291_v51 = vmax.f32 %v1250_v31, 0.0  ;;  %v7709_v24 = vcombine.high %v2162_v20, %v2166_v22  ;;  %v2167_v21 = vld [vmem:[#allocation7 + $0x3e8] sm:$0xff]  ;;  %v7708_v25 = vcombine.low %v2162_v20, %v2166_v22  ;;  %v1378_v42 = vld [vmem:[%s11006_s8] sm:$0xf] }
 0x39d   : > { %v1292_v47 = vmax.f32 %v1252_v41, 0.0  ;;  %3642 = vmatprep.subr.bf16.mxu1 %v7677_v28  ;;  %3868 = vmatprep.subr.bf16.mxu0 %v7679_v29  ;;  %v7710_v26 = vcombine.low %v2163_v23, %v2167_v21  ;;  %v7711_v27 = vcombine.high %v2163_v23, %v2167_v21  ;;  %v9997_v28 = vld [vmem:[#allocation7 + $0x400] sm:$0xff]  ;;  %v7718_v39 = vcombine.low %v10001_v30, %v10005_v32 }
 0x39e   : > { %v1293_v52 = vmax.f32 %v1254_v43, 0.0  ;;  %v9999_v29 = vld [vmem:[#allocation7 + $0x420] sm:$0xff]  ;;  %v7719_v40 = vcombine.high %v10001_v30, %v10005_v32  ;;  %v10014_v41 = vsub.s32 2, %v9948_v33  ;;  %v10020_v43 = vsub.s32 3, %v9948_v33 }
 0x39f   : > { %v1310_v56 = vpack.c.bf16 %v1292_v47, %v1290_v46  ;;  %v7717_v31 = vcombine.high %v9997_v28, %v9999_v29  ;;  %v7716_v35 = vcombine.low %v9997_v28, %v9999_v29  ;;  %v10029_v46 = vrot.slane %v1378_v42, %v9957_v36  ;;  %v10122_v28 = vld [vmem:[#allocation7 + $0x528] sm:$0xff] }
 0x3a0   : > { %v1311_v57 = vpack.c.bf16 %v1293_v52, %v1291_v51  ;;  %v1257_v59 = vpop.f32.mrb[60].mxu0  ;;  %3643 = vmatpush1.bf16.msra.mxu1 %v7676_v44  ;;  %3869 = vmatpush1.bf16.msra.mxu0 %v7678_v45  ;;  %11070 = vst [vmem:[#allocation26_spill] sm:$0xff] %v10014_v41  ;;  %11071 = vst [vmem:[#allocation27_spill] sm:$0xff] %v10020_v43  ;;  %v10023_v44 = vrot.slane %v1378_v42, %v9951_v34  ;;  %v10036_v51 = vld [vmem:[#allocation7 + $0x460] sm:$0xff] }
 0x3a1   : > { %v1258_v62 = vadd.f32 %v1257_v59, %v9960_v37  ;;  %v1259_v63 = vpop.f32.mrb[61].mxu0  ;;  %3644 = vmatprep.subr.bf16.mxu1 %v7685_v48  ;;  %3870 = vmatprep.subr.bf16.mxu0 %v7687_v49  ;;  %v10026_v45 = vrot.slane %v1378_v42, %v10014_v41  ;;  %v10032_v47 = vrot.slane %v1378_v42, %v10020_v43  ;;  %v10086_v42 = vld [vmem:[#allocation7 + $0x4e8] sm:$0xff]  ;;  %v2290_v43 = vld [vmem:[#allocation7 + $0x7c0] sm:$0xff] }
 0x3a2   : > { %v1260_v6 = vadd.f32 %v1259_v63, %v9963_v38  ;;  %v1261_v1 = vpop.f32.mrb[62].mxu0  ;;  %1812 = vmatprep.mubr.bf16.mxu1 %v1311_v57  ;;  %1925 = vmatprep.mubr.bf16.mxu0 %v1311_v57  ;;  %v10042_v57 = vld [vmem:[#allocation7 + $0x468] sm:$0xff] }
 0x3a3   : > { %v1262_v2 = vadd.f32 %v1261_v1, %v9960_v37  ;;  %v1263_v4 = vpop.f32.mrb[63].mxu0  ;;  %1813 = vmatmul.mubr.bf16.gmra.mrb[24].mxu1 %v1310_v56  ;;  %1926 = vmatmul.mubr.bf16.gmra.mrb[88].mxu0 %v1310_v56  ;;  %v1294_v8 = vmax.f32 %v1258_v62, 0.0  ;;  %v2154_v37 = vld [vmem:[#allocation7 + $0x380] sm:$0xff]  ;;  %v10040_v56 = vld [vmem:[#allocation7 + $0x448] sm:$0xff]  ;;  %v7725_v1 = vcombine.high %v10034_v50, %v10036_v51 }
 0x3a4   : > { %v1264_v58 = vadd.f32 %v1263_v4, %v9963_v38  ;;  %3645 = vmatpush1.bf16.msra.mxu1 %v7684_v60  ;;  %3871 = vmatpush1.bf16.msra.mxu0 %v7686_v61  ;;  %v1295_v10 = vmax.f32 %v1260_v6, 0.0  ;;  %v2158_v38 = vld [vmem:[#allocation7 + $0x3a0] sm:$0xff]  ;;  %v7727_v22 = vcombine.high %v10040_v56, %v10042_v57 }
 0x3a5   : > { %v1296_v9 = vmax.f32 %v1262_v2, 0.0  ;;  %3646 = vmatprep.subr.bf16.mxu1 %v7693_v0  ;;  %3872 = vmatprep.subr.bf16.mxu0 %v7695_v3  ;;  %v7701_v16 = vcombine.high %v2154_v37, %v2158_v38  ;;  %v7700_v17 = vcombine.low %v2154_v37, %v2158_v38  ;;  %v10062_v37 = vld [vmem:[#allocation7 + $0x4a8] sm:$0xff] }
 0x3a6   : > { %v1297_v11 = vmax.f32 %v1264_v58, 0.0  ;;  %v7724_v58 = vcombine.low %v10034_v50, %v10036_v51  ;;  %v10155_v51 = vld [vmem:[#allocation7 + $0x548] sm:$0xff] }
 0x3a7   : > { %v1312_v12 = vpack.c.bf16 %v1296_v9, %v1294_v8  ;;  %v10058_v8 = vld [vmem:[#allocation7 + $0x4a0] sm:$0xff] }
 0x3a8   : > { %v1313_v13 = vpack.c.bf16 %v1297_v11, %v1295_v10  ;;  %3647 = vmatpush1.bf16.msra.mxu1 %v7692_v5  ;;  %3873 = vmatpush1.bf16.msra.mxu0 %v7694_v7  ;;  %v7726_v5 = vcombine.low %v10040_v56, %v10042_v57  ;;  %v10056_v7 = vld [vmem:[#allocation7 + $0x480] sm:$0xff]  ;;  %v10157_v56 = vld [vmem:[#allocation7 + $0x568] sm:$0xff] }
 0x3a9   : > { %3648 = vmatprep.subr.bf16.mxu1 %v7701_v16  ;;  %3874 = vmatprep.subr.bf16.mxu0 %v7703_v19  ;;  %v7733_v23 = vcombine.high %v10056_v7, %v10058_v8 }
 0x3aa   : > { %1822 = vmatprep.mubr.bf16.mxu1 %v1313_v13  ;;  %1935 = vmatprep.mubr.bf16.mxu0 %v1313_v13  ;;  %v10060_v13 = vld [vmem:[#allocation7 + $0x488] sm:$0xff] }
 0x3ab   : > { %1823 = vmatmul.mubr.bf16.gmra.mrb[28].mxu1 %v1312_v12  ;;  %1936 = vmatmul.mubr.bf16.gmra.mrb[92].mxu0 %v1312_v12 }
 0x3ac   : > { %3649 = vmatpush1.bf16.msra.mxu1 %v7700_v17  ;;  %3875 = vmatpush1.bf16.msra.mxu0 %v7702_v18  ;;  %v10064_v17 = vld [vmem:[#allocation7 + $0x4c0] sm:$0xff] }
 0x3ad   : > { %3650 = vmatprep.subr.bf16.mxu1 %v7709_v24  ;;  %3876 = vmatprep.subr.bf16.mxu0 %v7711_v27  ;;  %v10066_v18 = vld [vmem:[#allocation7 + $0x4e0] sm:$0xff]  ;;  %v7732_v27 = vcombine.low %v10056_v7, %v10058_v8 }
 0x3b0   : > { %3651 = vmatpush1.bf16.msra.mxu1 %v7708_v25  ;;  %3877 = vmatpush1.bf16.msra.mxu0 %v7710_v26 }
 0x3b1   : > { %3733 = vmatprep.subr.bf16.mxu1 %v7717_v31  ;;  %3959 = vmatprep.subr.bf16.mxu0 %v7719_v40  ;;  %v7734_v31 = vcombine.low %v10060_v13, %v10062_v37  ;;  %v10084_v40 = vld [vmem:[#allocation7 + $0x4c8] sm:$0xff] }
 0x446   : > { %v1754_v48 = vpop.f32.mrb[0].mxu1  ;;  %v1867_v49 = vpop.f32.mrb[64].mxu0 }
 0x447   : > { %v1755_v52 = vadd.f32 %v1754_v48, %v10023_v44  ;;  %v1868_v53 = vadd.f32 %v1867_v49, %v10026_v45  ;;  %v1756_v54 = vpop.f32.mrb[1].mxu1  ;;  %v1869_v55 = vpop.f32.mrb[65].mxu0 }
 0x448   : > { %v1757_v59 = vadd.f32 %v1756_v54, %v10029_v46  ;;  %v1870_v60 = vadd.f32 %v1869_v55, %v10032_v47  ;;  %v1758_v61 = vpop.f32.mrb[2].mxu1  ;;  %v1871_v62 = vpop.f32.mrb[66].mxu0  ;;  %v7735_v54 = vcombine.high %v10060_v13, %v10062_v37  ;;  %v7741_v55 = vcombine.high %v10064_v17, %v10066_v18 }
 0x449   : > { %v1759_v63 = vadd.f32 %v1758_v61, %v10023_v44  ;;  %v1872_v0 = vadd.f32 %v1871_v62, %v10026_v45  ;;  %v1760_v3 = vpop.f32.mrb[3].mxu1  ;;  %v1873_v6 = vpop.f32.mrb[67].mxu0  ;;  %v1946_v9 = vmax.f32 %v1755_v52, 0.0  ;;  %v1948_v10 = vmax.f32 %v1868_v53, 0.0 }
 0x44a   : > { %v1761_v2 = vadd.f32 %v1760_v3, %v10029_v46  ;;  %v1874_v4 = vadd.f32 %v1873_v6, %v10032_v47  ;;  %v1947_v38 = vmax.f32 %v1757_v59, 0.0  ;;  %v1949_v14 = vmax.f32 %v1870_v60, 0.0 }
 0x44b   : > { %v1950_v11 = vmax.f32 %v1759_v63, 0.0  ;;  %v1952_v12 = vmax.f32 %v1872_v0, 0.0  ;;  %v7740_v63 = vcombine.low %v10064_v17, %v10066_v18 }
 0x44c   : > { %v1951_v16 = vmax.f32 %v1761_v2, 0.0  ;;  %v1953_v15 = vmax.f32 %v1874_v4, 0.0  ;;  %v7742_v4 = vcombine.low %v10084_v40, %v10086_v42 }
 0x44d   : > { %v10068_v19 = vpack.c.bf16 %v1950_v11, %v1946_v9  ;;  %v10070_v20 = vpack.c.bf16 %v1952_v12, %v1948_v10  ;;  %v7743_v11 = vcombine.high %v10084_v40, %v10086_v42  ;;  %v10116_v12 = vld [vmem:[#allocation7 + $0x500] sm:$0xff] }
 0x44e   : > { %v10076_v24 = vpack.c.bf16 %v1951_v16, %v1947_v38  ;;  %v10078_v21 = vpack.c.bf16 %v1953_v15, %v1949_v14  ;;  %v1764_v25 = vpop.f32.mrb[4].mxu1  ;;  %v1877_v26 = vpop.f32.mrb[68].mxu0  ;;  %v10118_v38 = vld [vmem:[#allocation7 + $0x520] sm:$0xff] }
 0x44f   : > { %v1765_v48 = vadd.f32 %v1764_v25, %v10023_v44  ;;  %v1878_v49 = vadd.f32 %v1877_v26, %v10026_v45  ;;  %v1766_v52 = vpop.f32.mrb[5].mxu1  ;;  %v1879_v53 = vpop.f32.mrb[69].mxu0  ;;  %v10120_v26 = vld [vmem:[#allocation7 + $0x508] sm:$0xff] }
 0x450   : > { %v1767_v59 = vadd.f32 %v1766_v52, %v10029_v46  ;;  %v1880_v60 = vadd.f32 %v1879_v53, %v10032_v47  ;;  %v1768_v61 = vpop.f32.mrb[6].mxu1  ;;  %v1881_v62 = vpop.f32.mrb[70].mxu0  ;;  %3652 = vmatprep.mubr.bf16.mxu1 %v10076_v24  ;;  %3878 = vmatprep.mubr.bf16.mxu0 %v10076_v24  ;;  %v7751_v50 = vcombine.high %v10120_v26, %v10122_v28 }
 0x451   : > { %v1769_v0 = vadd.f32 %v1768_v61, %v10023_v44  ;;  %v1882_v3 = vadd.f32 %v1881_v62, %v10026_v45  ;;  %v1770_v6 = vpop.f32.mrb[7].mxu1  ;;  %v1883_v2 = vpop.f32.mrb[71].mxu0  ;;  %3653 = vmatmul.mubr.bf16.vlgmr.msra.gmra.mrb[32].mxu1 %v10068_v19  ;;  %3879 = vmatmul.mubr.bf16.vlgmr.msra.gmra.mrb[96].mxu0 %v10068_v19  ;;  %v1954_v14 = vmax.f32 %v1765_v48, 0.0  ;;  %v1956_v16 = vmax.f32 %v1878_v49, 0.0 }
 0x452   : > { %v1771_v9 = vadd.f32 %v1770_v6, %v10029_v46  ;;  %v1884_v10 = vadd.f32 %v1883_v2, %v10032_v47  ;;  %3734 = vmatpush1.bf16.msra.mxu1 %v7716_v35  ;;  %3960 = vmatpush1.bf16.msra.mxu0 %v7718_v39  ;;  %v1955_v29 = vmax.f32 %v1767_v59, 0.0  ;;  %v1957_v30 = vmax.f32 %v1880_v60, 0.0 }
 0x453   : > { %v1958_v15 = vmax.f32 %v1769_v0, 0.0  ;;  %v1960_v25 = vmax.f32 %v1882_v3, 0.0  ;;  %3735 = vmatprep.subr.bf16.mxu1 %v7725_v1  ;;  %3961 = vmatprep.subr.bf16.mxu0 %v7727_v22  ;;  %v7748_v48 = vcombine.low %v10116_v12, %v10118_v38  ;;  %v7749_v49 = vcombine.high %v10116_v12, %v10118_v38  ;;  %v10132_v1 = vld [vmem:[#allocation7 + $0x540] sm:$0xff] }
 0x454   : > { %v1959_v32 = vmax.f32 %v1771_v9, 0.0  ;;  %v1961_v35 = vmax.f32 %v1884_v10, 0.0  ;;  %v10134_v22 = vld [vmem:[#allocation7 + $0x560] sm:$0xff]  ;;  %v7750_v62 = vcombine.low %v10120_v26, %v10122_v28 }
 0x455   : > { %v10124_v39 = vpack.c.bf16 %v1958_v15, %v1954_v14  ;;  %v10126_v52 = vpack.c.bf16 %v1960_v25, %v1956_v16  ;;  %v7756_v15 = vcombine.low %v10132_v1, %v10134_v22  ;;  %v10252_v12 = vld [vmem:[#allocation7 + $0x600] sm:$0xff] }
 0x456   : > { %v10136_v53 = vpack.c.bf16 %v1959_v32, %v1955_v29  ;;  %v10138_v59 = vpack.c.bf16 %v1961_v35, %v1957_v30  ;;  %3736 = vmatpush1.bf16.msra.mxu1 %v7724_v58  ;;  %v1774_v60 = vpop.f32.mrb[8].mxu1  ;;  %v1887_v61 = vpop.f32.mrb[72].mxu0  ;;  %3962 = vmatpush1.bf16.msra.mxu0 %v7726_v5  ;;  %v7758_v30 = vcombine.low %v10155_v51, %v10157_v56  ;;  %v10181_v32 = vld [vmem:[#allocation7 + $0x580] sm:$0xff] }
 0x457   : > { %v1775_v0 = vadd.f32 %v1774_v60, %v10023_v44  ;;  %v1888_v3 = vadd.f32 %v1887_v61, %v10026_v45  ;;  %v1776_v6 = vpop.f32.mrb[9].mxu1  ;;  %v1889_v2 = vpop.f32.mrb[73].mxu0  ;;  %3737 = vmatprep.subr.bf16.mxu1 %v7733_v23  ;;  %3963 = vmatprep.subr.bf16.mxu0 %v7735_v54  ;;  %v7757_v23 = vcombine.high %v10132_v1, %v10134_v22  ;;  %v10183_v35 = vld [vmem:[#allocation7 + $0x5a0] sm:$0xff] }
 0x458   : > { %v1777_v57 = vadd.f32 %v1776_v6, %v10029_v46  ;;  %v1890_v58 = vadd.f32 %v1889_v2, %v10032_v47  ;;  %v1778_v5 = vpop.f32.mrb[10].mxu1  ;;  %v1891_v9 = vpop.f32.mrb[74].mxu0  ;;  %3662 = vmatprep.mubr.bf16.mxu1 %v10136_v53  ;;  %3888 = vmatprep.mubr.bf16.mxu0 %v10136_v53  ;;  %v10254_v38 = vld [vmem:[#allocation7 + $0x620] sm:$0xff] }
 0x459   : > { %v1779_v54 = vadd.f32 %v1778_v5, %v10023_v44  ;;  %v1892_v10 = vadd.f32 %v1891_v9, %v10026_v45  ;;  %v1780_v14 = vpop.f32.mrb[11].mxu1  ;;  %v1893_v16 = vpop.f32.mrb[75].mxu0  ;;  %3663 = vmatmul.mubr.bf16.gmra.mrb[36].mxu1 %v10124_v39  ;;  %3889 = vmatmul.mubr.bf16.gmra.mrb[100].mxu0 %v10124_v39  ;;  %v1962_v60 = vmax.f32 %v1775_v0, 0.0  ;;  %v1964_v61 = vmax.f32 %v1888_v3, 0.0  ;;  %v10287_v22 = vld [vmem:[#allocation7 + $0x640] sm:$0xff] }
 0x45a   : > { %v1781_v25 = vadd.f32 %v1780_v14, %v10029_v46  ;;  %v1894_v29 = vadd.f32 %v1893_v16, %v10032_v47  ;;  %3738 = vmatpush1.bf16.msra.mxu1 %v7732_v27  ;;  %3964 = vmatpush1.bf16.msra.mxu0 %v7734_v31  ;;  %v1963_v7 = vmax.f32 %v1777_v57, 0.0  ;;  %v1965_v8 = vmax.f32 %v1890_v58, 0.0  ;;  %v10188_v27 = vld [vmem:[#allocation7 + $0x588] sm:$0xff]  ;;  %v10214_v14 = vld [vmem:[#allocation7 + $0x5e0] sm:$0xff] }
 0x45b   : > { %v1966_v6 = vmax.f32 %v1779_v54, 0.0  ;;  %v1968_v2 = vmax.f32 %v1892_v10, 0.0  ;;  %3739 = vmatprep.subr.bf16.mxu1 %v7741_v55  ;;  %3965 = vmatprep.subr.bf16.mxu0 %v7743_v11  ;;  %v10190_v31 = vld [vmem:[#allocation7 + $0x5a8] sm:$0xff]  ;;  %v7759_v0 = vcombine.high %v10155_v51, %v10157_v56  ;;  %v7765_v3 = vcombine.high %v10181_v32, %v10183_v35  ;;  %v10212_v10 = vld [vmem:[#allocation7 + $0x5c0] sm:$0xff] }
 0x45c   : > { %v1967_v13 = vmax.f32 %v1781_v25, 0.0  ;;  %v1969_v37 = vmax.f32 %v1894_v29, 0.0  ;;  %v7764_v54 = vcombine.low %v10181_v32, %v10183_v35  ;;  %v7766_v18 = vcombine.low %v10188_v27, %v10190_v31  ;;  %v10289_v51 = vld [vmem:[#allocation7 + $0x660] sm:$0xff] }
 0x45d   : > { %v10192_v5 = vpack.c.bf16 %v1966_v6, %v1962_v60  ;;  %v10194_v9 = vpack.c.bf16 %v1968_v2, %v1964_v61  ;;  %v7767_v60 = vcombine.high %v10188_v27, %v10190_v31  ;;  %v7773_v2 = vcombine.high %v10212_v10, %v10214_v14 }
 0x45e   : > { %v10200_v55 = vpack.c.bf16 %v1967_v13, %v1963_v7  ;;  %v10202_v11 = vpack.c.bf16 %v1969_v37, %v1965_v8  ;;  %3740 = vmatpush1.bf16.msra.mxu1 %v7740_v63  ;;  %v1784_v57 = vpop.f32.mrb[12].mxu1  ;;  %v1897_v58 = vpop.f32.mrb[76].mxu0  ;;  %3966 = vmatpush1.bf16.msra.mxu0 %v7742_v4  ;;  %v7772_v13 = vcombine.low %v10212_v10, %v10214_v14  ;;  %v10245_v37 = vld [vmem:[#allocation7 + $0x5c8] sm:$0xff] }
 0x45f   : > { %v1785_v16 = vadd.f32 %v1784_v57, %v10023_v44  ;;  %v1898_v25 = vadd.f32 %v1897_v58, %v10026_v45  ;;  %v1786_v29 = vpop.f32.mrb[13].mxu1  ;;  %v1899_v17 = vpop.f32.mrb[77].mxu0  ;;  %3741 = vmatprep.subr.bf16.mxu1 %v7749_v49  ;;  %3967 = vmatprep.subr.bf16.mxu0 %v7751_v50  ;;  %v10247_v57 = vld [vmem:[#allocation7 + $0x5e8] sm:$0xff]  ;;  %v7780_v1 = vcombine.low %v10252_v12, %v10254_v38 }
 0x460   : > { %v1787_v40 = vadd.f32 %v1786_v29, %v10029_v46  ;;  %v1900_v42 = vadd.f32 %v1899_v17, %v10032_v47  ;;  %v1788_v63 = vpop.f32.mrb[14].mxu1  ;;  %v1901_v4 = vpop.f32.mrb[78].mxu0  ;;  %3672 = vmatprep.mubr.bf16.mxu1 %v10200_v55  ;;  %3898 = vmatprep.mubr.bf16.mxu0 %v10200_v55 }
 0x461   : > { %v1789_v61 = vadd.f32 %v1788_v63, %v10023_v44  ;;  %v1902_v49 = vadd.f32 %v1901_v4, %v10026_v45  ;;  %v1790_v50 = vpop.f32.mrb[15].mxu1  ;;  %v1903_v6 = vpop.f32.mrb[79].mxu0  ;;  %3673 = vmatmul.mubr.bf16.gmra.mrb[40].mxu1 %v10192_v5  ;;  %3899 = vmatmul.mubr.bf16.gmra.mrb[104].mxu0 %v10192_v5  ;;  %v1970_v58 = vmax.f32 %v1785_v16, 0.0  ;;  %v1972_v29 = vmax.f32 %v1898_v25, 0.0 }
 0x462   : > { %v1791_v7 = vadd.f32 %v1790_v50, %v10029_v46  ;;  %v1904_v8 = vadd.f32 %v1903_v6, %v10032_v47  ;;  %3742 = vmatpush1.bf16.msra.mxu1 %v7748_v48  ;;  %3968 = vmatpush1.bf16.msra.mxu0 %v7750_v62  ;;  %v1971_v26 = vmax.f32 %v1787_v40, 0.0  ;;  %v1973_v28 = vmax.f32 %v1900_v42, 0.0 }
 0x463   : > { %v1974_v17 = vmax.f32 %v1789_v61, 0.0  ;;  %v1976_v63 = vmax.f32 %v1902_v49, 0.0  ;;  %3743 = vmatprep.subr.bf16.mxu1 %v7757_v23  ;;  %3969 = vmatprep.subr.bf16.mxu0 %v7759_v0  ;;  %v7774_v16 = vcombine.low %v10245_v37, %v10247_v57  ;;  %v7775_v25 = vcombine.high %v10245_v37, %v10247_v57  ;;  %v10264_v23 = vld [vmem:[#allocation7 + $0x608] sm:$0xff] }
 0x464   : > { %v1975_v48 = vmax.f32 %v1791_v7, 0.0  ;;  %v1977_v62 = vmax.f32 %v1904_v8, 0.0  ;;  %v10266_v0 = vld [vmem:[#allocation7 + $0x628] sm:$0xff]  ;;  %v7781_v6 = vcombine.high %v10252_v12, %v10254_v38 }
 0x465   : > { %v10256_v4 = vpack.c.bf16 %v1974_v17, %v1970_v58  ;;  %v10258_v50 = vpack.c.bf16 %v1976_v63, %v1972_v29  ;;  %v10377_v12 = vld [vmem:[#allocation7 + $0x6e8] sm:$0xff] }
 0x466   : > { %v10268_v61 = vpack.c.bf16 %v1975_v48, %v1971_v26  ;;  %v10270_v40 = vpack.c.bf16 %v1977_v62, %v1973_v28  ;;  %3744 = vmatpush1.bf16.msra.mxu1 %v7756_v15  ;;  %v1794_v42 = vpop.f32.mrb[16].mxu1  ;;  %v1907_v49 = vpop.f32.mrb[80].mxu0  ;;  %3970 = vmatpush1.bf16.msra.mxu0 %v7758_v30  ;;  %v7783_v26 = vcombine.high %v10264_v23, %v10266_v0 }
 0x467   : > { %v1795_v7 = vadd.f32 %v1794_v42, %v10023_v44  ;;  %v1908_v8 = vadd.f32 %v1907_v49, %v10026_v45  ;;  %v1796_v37 = vpop.f32.mrb[17].mxu1  ;;  %v1909_v57 = vpop.f32.mrb[81].mxu0  ;;  %3745 = vmatprep.subr.bf16.mxu1 %v7765_v3  ;;  %3971 = vmatprep.subr.bf16.mxu0 %v7767_v60  ;;  %v7782_v3 = vcombine.low %v10264_v23, %v10266_v0  ;;  %v10313_v42 = vld [vmem:[#allocation7 + $0x648] sm:$0xff] }
 0x468   : > { %v1797_v56 = vadd.f32 %v1796_v37, %v10029_v46  ;;  %v1910_v15 = vadd.f32 %v1909_v57, %v10032_v47  ;;  %v1798_v30 = vpop.f32.mrb[18].mxu1  ;;  %v1911_v58 = vpop.f32.mrb[82].mxu0  ;;  %3682 = vmatprep.mubr.bf16.mxu1 %v10268_v61  ;;  %3908 = vmatprep.mubr.bf16.mxu0 %v10268_v61  ;;  %v7789_v62 = vcombine.high %v10287_v22, %v10289_v51  ;;  %v10315_v49 = vld [vmem:[#allocation7 + $0x668] sm:$0xff] }
 0x469   : > { %v1799_v60 = vadd.f32 %v1798_v30, %v10023_v44  ;;  %v1912_v29 = vadd.f32 %v1911_v58, %v10026_v45  ;;  %v1800_v17 = vpop.f32.mrb[19].mxu1  ;;  %v1913_v63 = vpop.f32.mrb[83].mxu0  ;;  %3683 = vmatmul.mubr.bf16.gmra.mrb[44].mxu1 %v10256_v4  ;;  %3909 = vmatmul.mubr.bf16.gmra.mrb[108].mxu0 %v10256_v4  ;;  %v1978_v37 = vmax.f32 %v1795_v7, 0.0  ;;  %v1980_v57 = vmax.f32 %v1908_v8, 0.0 }
 0x46a   : > { %v1801_v28 = vadd.f32 %v1800_v17, %v10029_v46  ;;  %v1914_v48 = vadd.f32 %v1913_v63, %v10032_v47  ;;  %3746 = vmatpush1.bf16.msra.mxu1 %v7764_v54  ;;  %3972 = vmatpush1.bf16.msra.mxu0 %v7766_v18  ;;  %v1979_v32 = vmax.f32 %v1797_v56, 0.0  ;;  %v1981_v35 = vmax.f32 %v1910_v15, 0.0  ;;  %v10320_v54 = vld [vmem:[#allocation7 + $0x680] sm:$0xff] }
 0x46b   : > { %v1982_v30 = vmax.f32 %v1799_v60, 0.0  ;;  %v1984_v58 = vmax.f32 %v1912_v29, 0.0  ;;  %3747 = vmatprep.subr.bf16.mxu1 %v7773_v2  ;;  %3973 = vmatprep.subr.bf16.mxu0 %v7775_v25  ;;  %v10322_v18 = vld [vmem:[#allocation7 + $0x6a0] sm:$0xff]  ;;  %v7788_v7 = vcombine.low %v10287_v22, %v10289_v51  ;;  %v7790_v8 = vcombine.low %v10313_v42, %v10315_v49  ;;  %v10341_v29 = vld [vmem:[#allocation7 + $0x688] sm:$0xff] }
 0x46c   : > { %v1983_v27 = vmax.f32 %v1801_v28, 0.0  ;;  %v1985_v31 = vmax.f32 %v1914_v48, 0.0  ;;  %v7791_v60 = vcombine.high %v10313_v42, %v10315_v49  ;;  %v10343_v22 = vld [vmem:[#allocation7 + $0x6a8] sm:$0xff]  ;;  %v7797_v10 = vcombine.high %v10320_v54, %v10322_v18 }
 0x46d   : > { %v10324_v17 = vpack.c.bf16 %v1982_v30, %v1978_v37  ;;  %v10326_v63 = vpack.c.bf16 %v1984_v58, %v1980_v57  ;;  %v7796_v49 = vcombine.low %v10320_v54, %v10322_v18  ;;  %v7798_v58 = vcombine.low %v10341_v29, %v10343_v22  ;;  %v2275_v54 = vld [vmem:[#allocation7 + $0x748] sm:$0xff] }
 0x46e   : > { %v10332_v2 = vpack.c.bf16 %v1983_v27, %v1979_v32  ;;  %v10334_v25 = vpack.c.bf16 %v1985_v31, %v1981_v35  ;;  %3748 = vmatpush1.bf16.msra.mxu1 %v7772_v13  ;;  %v1804_v56 = vpop.f32.mrb[20].mxu1  ;;  %v1917_v15 = vpop.f32.mrb[84].mxu0  ;;  %3974 = vmatpush1.bf16.msra.mxu0 %v7774_v16  ;;  %v7799_v27 = vcombine.high %v10341_v29, %v10343_v22  ;;  %v10371_v31 = vld [vmem:[#allocation7 + $0x6c0] sm:$0xff]  ;;  %v2279_v18 = vld [vmem:[#allocation7 + $0x768] sm:$0xff] }
 0x46f   : > { %v1805_v51 = vadd.f32 %v1804_v56, %v10023_v44  ;;  %v1918_v28 = vadd.f32 %v1917_v15, %v10026_v45  ;;  %v1806_v48 = vpop.f32.mrb[21].mxu1  ;;  %v1919_v37 = vpop.f32.mrb[85].mxu0  ;;  %3749 = vmatprep.subr.bf16.mxu1 %v7781_v6  ;;  %3975 = vmatprep.subr.bf16.mxu0 %v7783_v26  ;;  %v10373_v56 = vld [vmem:[#allocation7 + $0x6e0] sm:$0xff] }
 0x470   : > { %v1807_v14 = vadd.f32 %v1806_v48, %v10029_v46  ;;  %v1920_v13 = vadd.f32 %v1919_v37, %v10032_v47  ;;  %v1808_v16 = vpop.f32.mrb[22].mxu1  ;;  %v1921_v42 = vpop.f32.mrb[86].mxu0  ;;  %3692 = vmatprep.mubr.bf16.mxu1 %v10332_v2  ;;  %3918 = vmatprep.mubr.bf16.mxu0 %v10332_v2  ;;  %v7804_v22 = vcombine.low %v10371_v31, %v10373_v56 }
 0x471   : > { %v1809_v57 = vadd.f32 %v1808_v16, %v10023_v44  ;;  %v1922_v6 = vadd.f32 %v1921_v42, %v10026_v45  ;;  %v1810_v26 = vpop.f32.mrb[23].mxu1  ;;  %v1923_v30 = vpop.f32.mrb[87].mxu0  ;;  %3693 = vmatmul.mubr.bf16.gmra.mrb[48].mxu1 %v10324_v17  ;;  %3919 = vmatmul.mubr.bf16.gmra.mrb[112].mxu0 %v10324_v17  ;;  %v1986_v15 = vmax.f32 %v1805_v51, 0.0  ;;  %v1988_v48 = vmax.f32 %v1918_v28, 0.0  ;;  %v10375_v42 = vld [vmem:[#allocation7 + $0x6c8] sm:$0xff] }
 0x472   : > { %v1811_v32 = vadd.f32 %v1810_v26, %v10029_v46  ;;  %v1924_v35 = vadd.f32 %v1923_v30, %v10032_v47  ;;  %3750 = vmatpush1.bf16.msra.mxu1 %v7780_v1  ;;  %3976 = vmatpush1.bf16.msra.mxu0 %v7782_v3  ;;  %v1987_v38 = vmax.f32 %v1807_v14, 0.0  ;;  %v1989_v23 = vmax.f32 %v1920_v13, 0.0 }
 0x473   : > { %v1990_v37 = vmax.f32 %v1809_v57, 0.0  ;;  %v1992_v16 = vmax.f32 %v1922_v6, 0.0  ;;  %3751 = vmatprep.subr.bf16.mxu1 %v7789_v62  ;;  %3977 = vmatprep.subr.bf16.mxu0 %v7791_v60  ;;  %v7805_v51 = vcombine.high %v10371_v31, %v10373_v56  ;;  %v10387_v62 = vld [vmem:[#allocation7 + $0x700] sm:$0xff]  ;;  %v7806_v6 = vcombine.low %v10375_v42, %v10377_v12  ;;  %v10401_v56 = vld [vmem:[#allocation7 + $0x708] sm:$0xff] }
 0x474   : > { %v1991_v0 = vmax.f32 %v1811_v32, 0.0  ;;  %v1993_v1 = vmax.f32 %v1924_v35, 0.0  ;;  %v10389_v60 = vld [vmem:[#allocation7 + $0x720] sm:$0xff]  ;;  %v7807_v31 = vcombine.high %v10375_v42, %v10377_v12 }
 0x475   : > { %v10379_v3 = vpack.c.bf16 %v1990_v37, %v1986_v15  ;;  %v10381_v29 = vpack.c.bf16 %v1992_v16, %v1988_v48 }
 0x476   : > { %v10391_v28 = vpack.c.bf16 %v1991_v0, %v1987_v38  ;;  %v10393_v14 = vpack.c.bf16 %v1993_v1, %v1989_v23  ;;  %3752 = vmatpush1.bf16.msra.mxu1 %v7788_v7  ;;  %v1814_v13 = vpop.f32.mrb[24].mxu1  ;;  %v1927_v57 = vpop.f32.mrb[88].mxu0  ;;  %3978 = vmatpush1.bf16.msra.mxu0 %v7790_v8  ;;  %v10403_v7 = vld [vmem:[#allocation7 + $0x728] sm:$0xff]  ;;  %v7812_v38 = vcombine.low %v10387_v62, %v10389_v60 }
 0x477   : > { %v1815_v26 = vadd.f32 %v1814_v13, %v10023_v44  ;;  %v1928_v30 = vadd.f32 %v1927_v57, %v10026_v45  ;;  %v1816_v32 = vpop.f32.mrb[25].mxu1  ;;  %v1929_v35 = vpop.f32.mrb[89].mxu0  ;;  %3753 = vmatprep.subr.bf16.mxu1 %v7797_v10  ;;  %3979 = vmatprep.subr.bf16.mxu0 %v7799_v27  ;;  %v7813_v10 = vcombine.high %v10387_v62, %v10389_v60  ;;  %v10424_v13 = vld [vmem:[#allocation7 + $0x740] sm:$0xff] }
 0x478   : > { %v1817_v8 = vadd.f32 %v1816_v32, %v10029_v46  ;;  %v1930_v15 = vadd.f32 %v1929_v35, %v10032_v47  ;;  %v1818_v48 = vpop.f32.mrb[26].mxu1  ;;  %v1931_v37 = vpop.f32.mrb[90].mxu0  ;;  %3702 = vmatprep.mubr.bf16.mxu1 %v10391_v28  ;;  %3928 = vmatprep.mubr.bf16.mxu0 %v10391_v28  ;;  %v7815_v1 = vcombine.high %v10401_v56, %v10403_v7  ;;  %v10426_v57 = vld [vmem:[#allocation7 + $0x760] sm:$0xff] }
 0x479   : > { %v1819_v27 = vadd.f32 %v1818_v48, %v10023_v44  ;;  %v1932_v16 = vadd.f32 %v1931_v37, %v10026_v45  ;;  %v1820_v42 = vpop.f32.mrb[27].mxu1  ;;  %v1933_v12 = vpop.f32.mrb[91].mxu0  ;;  %3703 = vmatmul.mubr.bf16.gmra.mrb[52].mxu1 %v10379_v3  ;;  %3929 = vmatmul.mubr.bf16.gmra.mrb[116].mxu0 %v10379_v3  ;;  %v1994_v32 = vmax.f32 %v1815_v26, 0.0  ;;  %v1996_v35 = vmax.f32 %v1928_v30, 0.0 }
 0x47a   : > { %v1821_v23 = vadd.f32 %v1820_v42, %v10029_v46  ;;  %v1934_v0 = vadd.f32 %v1933_v12, %v10032_v47  ;;  %3754 = vmatpush1.bf16.msra.mxu1 %v7796_v49  ;;  %3980 = vmatpush1.bf16.msra.mxu0 %v7798_v58  ;;  %v1995_v60 = vmax.f32 %v1817_v8, 0.0  ;;  %v1997_v37 = vmax.f32 %v1930_v15, 0.0 }
 0x47b   : > { %v1998_v48 = vmax.f32 %v1819_v27, 0.0  ;;  %v2000_v62 = vmax.f32 %v1932_v16, 0.0  ;;  %3755 = vmatprep.subr.bf16.mxu1 %v7805_v51  ;;  %3981 = vmatprep.subr.bf16.mxu0 %v7807_v31  ;;  %v7814_v33 = vcombine.low %v10401_v56, %v10403_v7  ;;  %v7821_v26 = vcombine.high %v10424_v13, %v10426_v57  ;;  %v10442_v27 = vld [vmem:[#allocation7 + $0x780] sm:$0xff] }
 0x47c   : > { %v1999_v42 = vmax.f32 %v1821_v23, 0.0  ;;  %v2001_v12 = vmax.f32 %v1934_v0, 0.0  ;;  %v7820_v15 = vcombine.low %v10424_v13, %v10426_v57  ;;  %v10444_v16 = vld [vmem:[#allocation7 + $0x7a0] sm:$0xff] }
 0x47d   : > { %v10428_v49 = vpack.c.bf16 %v1998_v48, %v1994_v32  ;;  %v10430_v58 = vpack.c.bf16 %v2000_v62, %v1996_v35  ;;  %v7823_v32 = vcombine.high %v2275_v54, %v2279_v18  ;;  %v2287_v35 = vld [vmem:[#allocation7 + $0x7a8] sm:$0xff]  ;;  %v7822_v62 = vcombine.low %v2275_v54, %v2279_v18 }
 0x47e   : > { %v10436_v30 = vpack.c.bf16 %v1999_v42, %v1995_v60  ;;  %v10438_v51 = vpack.c.bf16 %v2001_v12, %v1997_v37  ;;  %3756 = vmatpush1.bf16.msra.mxu1 %v7804_v22  ;;  %v1824_v31 = vpop.f32.mrb[28].mxu1  ;;  %v1937_v8 = vpop.f32.mrb[92].mxu0  ;;  %3982 = vmatpush1.bf16.msra.mxu0 %v7806_v6  ;;  %v2283_v22 = vld [vmem:[#allocation7 + $0x788] sm:$0xff]  ;;  %v7829_v42 = vcombine.high %v10442_v27, %v10444_v16 }
 0x47f   : > { %v1825_v56 = vadd.f32 %v1824_v31, %v10023_v44  ;;  %v1938_v7 = vadd.f32 %v1937_v8, %v10026_v45  ;;  %v1826_v23 = vpop.f32.mrb[29].mxu1  ;;  %v1939_v0 = vpop.f32.mrb[93].mxu0  ;;  %3757 = vmatprep.subr.bf16.mxu1 %v7813_v10  ;;  %3983 = vmatprep.subr.bf16.mxu0 %v7815_v1  ;;  %v7831_v54 = vcombine.high %v2283_v22, %v2287_v35 }
 0x480   : > { %v1827_v6 = vadd.f32 %v1826_v23, %v10029_v46  ;;  %v1940_v48 = vadd.f32 %v1939_v0, %v10032_v47  ;;  %v1828_v13 = vpop.f32.mrb[30].mxu1  ;;  %v1941_v57 = vpop.f32.mrb[94].mxu0  ;;  %3712 = vmatprep.mubr.bf16.mxu1 %v10436_v30  ;;  %3938 = vmatprep.mubr.bf16.mxu0 %v10436_v30 }
 0x481   : > { %v1829_v60 = vadd.f32 %v1828_v13, %v10023_v44  ;;  %v1942_v37 = vadd.f32 %v1941_v57, %v10026_v45  ;;  %v1830_v10 = vpop.f32.mrb[31].mxu1  ;;  %v1943_v1 = vpop.f32.mrb[95].mxu0  ;;  %3713 = vmatmul.mubr.bf16.gmra.mrb[56].mxu1 %v10428_v49  ;;  %3939 = vmatmul.mubr.bf16.gmra.mrb[120].mxu0 %v10428_v49  ;;  %v2002_v18 = vmax.f32 %v1825_v56, 0.0  ;;  %v2004_v44 = vmax.f32 %v1938_v7, 0.0 }
 0x482   : > { %v1831_v12 = vadd.f32 %v1830_v10, %v10029_v46  ;;  %v1944_v31 = vadd.f32 %v1943_v1, %v10032_v47  ;;  %3758 = vmatpush1.bf16.msra.mxu1 %v7812_v38  ;;  %3984 = vmatpush1.bf16.msra.mxu0 %v7814_v33  ;;  %v2003_v23 = vmax.f32 %v1827_v6, 0.0  ;;  %v2005_v0 = vmax.f32 %v1940_v48, 0.0  ;;  %v2294_v46 = vld [vmem:[#allocation7 + $0x7e0] sm:$0xff]  ;;  %v2291_v47 = vld [vmem:[#allocation7 + $0x7c8] sm:$0xff]  ;;  %v2044_v48 = vld [vmem:[#allocation7 + $0x10] sm:$0xff] }
 0x483   : > { %v2006_v8 = vmax.f32 %v1829_v60, 0.0  ;;  %v2008_v45 = vmax.f32 %v1942_v37, 0.0  ;;  %3759 = vmatprep.subr.bf16.mxu1 %v7821_v26  ;;  %3985 = vmatprep.subr.bf16.mxu0 %v7823_v32  ;;  %v2295_v38 = vld [vmem:[#allocation7 + $0x7e8] sm:$0xff]  ;;  %v7828_v26 = vcombine.low %v10442_v27, %v10444_v16  ;;  %v7830_v7 = vcombine.low %v2283_v22, %v2287_v35  ;;  %v2048_v60 = vld [vmem:[#allocation7 + $0x30] sm:$0xff] }
 0x484   : > { %v2007_v13 = vmax.f32 %v1831_v12, 0.0  ;;  %v2009_v57 = vmax.f32 %v1944_v31, 0.0  ;;  %v7837_v32 = vcombine.high %v2290_v43, %v2294_v46  ;;  %v7839_v6 = vcombine.high %v2291_v47, %v2295_v38  ;;  %v2052_v37 = vld [vmem:[#allocation7 + $0x50] sm:$0xff]  ;;  %v2057_v12 = vld [vmem:[#allocation7 + $0x78] sm:$0xff] }
 0x485   : > { %v10460_v36 = vpack.c.bf16 %v2006_v8, %v2002_v18  ;;  %v10462_v41 = vpack.c.bf16 %v2008_v45, %v2004_v44  ;;  %v7836_v27 = vcombine.low %v2290_v43, %v2294_v46  ;;  %v7838_v16 = vcombine.low %v2291_v47, %v2295_v38  ;;  %v2056_v10 = vld [vmem:[#allocation7 + $0x70] sm:$0xff]  ;;  %v2061_v45 = vld [vmem:[#allocation7 + $0x98] sm:$0xff] }
 0x486   : > { %v10464_v33 = vpack.c.bf16 %v2007_v13, %v2003_v23  ;;  %v10466_v56 = vpack.c.bf16 %v2009_v57, %v2005_v0  ;;  %3760 = vmatpush1.bf16.msra.mxu1 %v7820_v15  ;;  %3986 = vmatpush1.bf16.msra.mxu0 %v7822_v62  ;;  %v2045_v15 = vld [vmem:[#allocation7 + $0x18] sm:$0xff]  ;;  %v7593_v22 = vcombine.high %v2044_v48, %v2048_v60  ;;  %v2060_v43 = vld [vmem:[#allocation7 + $0x90] sm:$0xff] }
 0x487   : > { %3761 = vmatprep.subr.bf16.mxu1 %v7829_v42  ;;  %3987 = vmatprep.subr.bf16.mxu0 %v7831_v54  ;;  %v2049_v62 = vld [vmem:[#allocation7 + $0x38] sm:$0xff]  ;;  %v7592_v1 = vcombine.low %v2044_v48, %v2048_v60  ;;  %v7601_v54 = vcombine.high %v2052_v37, %v2056_v10  ;;  %v2064_v18 = vld [vmem:[#allocation7 + $0xb0] sm:$0xff]  ;;  %v7600_v8 = vcombine.low %v2052_v37, %v2056_v10 }
 0x488   : > { %3722 = vmatprep.mubr.bf16.mxu1 %v10464_v33  ;;  %3948 = vmatprep.mubr.bf16.mxu0 %v10464_v33  ;;  %v7595_v35 = vcombine.high %v2045_v15, %v2049_v62  ;;  %v2053_v42 = vld [vmem:[#allocation7 + $0x58] sm:$0xff]  ;;  %v7594_v31 = vcombine.low %v2045_v15, %v2049_v62  ;;  %v7609_v0 = vcombine.high %v2060_v43, %v2064_v18  ;;  %v2068_v46 = vld [vmem:[#allocation7 + $0xd0] sm:$0xff] }
 0x489   : > { %3723 = vmatmul.mubr.bf16.gmra.mrb[60].mxu1 %v10460_v36  ;;  %3949 = vmatmul.mubr.bf16.gmra.mrb[124].mxu0 %v10460_v36  ;;  %v7603_v44 = vcombine.high %v2053_v42, %v2057_v12  ;;  %v2065_v23 = vld [vmem:[#allocation7 + $0xb8] sm:$0xff]  ;;  %v7602_v13 = vcombine.low %v2053_v42, %v2057_v12  ;;  %v2072_v47 = vld [vmem:[#allocation7 + $0xf0] sm:$0xff]  ;;  %v7608_v38 = vcombine.low %v2060_v43, %v2064_v18 }
 0x48a   : > { %3762 = vmatpush1.bf16.msra.mxu1 %v7828_v26  ;;  %3765 = vmatprep.mubr.bf16.mxu1 %v10078_v21  ;;  %v7611_v57 = vcombine.high %v2061_v45, %v2065_v23  ;;  %v2069_v26 = vld [vmem:[#allocation7 + $0xd8] sm:$0xff]  ;;  %v2076_v48 = vld [vmem:[#allocation7 + $0x110] sm:$0xff]  ;;  %v7616_v62 = vcombine.low %v2068_v46, %v2072_v47 }
 0x48b   : > { %3988 = vmatpush1.bf16.msra.mxu0 %v7830_v7  ;;  %3991 = vmatprep.mubr.bf16.mxu0 %v10078_v21  ;;  %v2073_v7 = vld [vmem:[#allocation7 + $0xf8] sm:$0xff]  ;;  %v2080_v60 = vld [vmem:[#allocation7 + $0x130] sm:$0xff] }
 0x48c   : > { %3763 = vmatprep.subr.bf16.mxu1 %v7837_v32  ;;  %3989 = vmatprep.subr.bf16.mxu0 %v7839_v6  ;;  %v7610_v32 = vcombine.low %v2061_v45, %v2065_v23  ;;  %v7617_v6 = vcombine.high %v2068_v46, %v2072_v47  ;;  %v7619_v15 = vcombine.high %v2069_v26, %v2073_v7  ;;  %v2084_v10 = vld [vmem:[#allocation7 + $0x150] sm:$0xff]  ;;  %v2085_v12 = vld [vmem:[#allocation7 + $0x158] sm:$0xff] }
 0x48d   : > { %v7624_v42 = vcombine.low %v2076_v48, %v2080_v60  ;;  %v2092_v18 = vld [vmem:[#allocation7 + $0x190] sm:$0xff]  ;;  %v2093_v23 = vld [vmem:[#allocation7 + $0x198] sm:$0xff] }
 0x48e   : > { %3764 = vmatpush1.bf16.msra.mxu1 %v7836_v27  ;;  %v2077_v27 = vld [vmem:[#allocation7 + $0x118] sm:$0xff]  ;;  %v2100_v47 = vld [vmem:[#allocation7 + $0x1d0] sm:$0xff] }
 0x48f   : > { %3990 = vmatpush1.bf16.msra.mxu0 %v7838_v16  ;;  %4072 = vmatprep.subr.bf16.mxu1 %v7593_v22  ;;  %v2081_v16 = vld [vmem:[#allocation7 + $0x138] sm:$0xff]  ;;  %v7625_v22 = vcombine.high %v2076_v48, %v2080_v60  ;;  %v2108_v60 = vld [vmem:[#allocation7 + $0x210] sm:$0xff] }
 0x490   : > { %4298 = vmatprep.subr.bf16.mxu0 %v7595_v35  ;;  %v7618_v35 = vcombine.low %v2069_v26, %v2073_v7  ;;  %v7627_v37 = vcombine.high %v2077_v27, %v2081_v16  ;;  %v2101_v7 = vld [vmem:[#allocation7 + $0x1d8] sm:$0xff] }
 0x491   : > { %3766 = vmatmul.mubr.bf16.vlgmr.msra.gmra.mrb[32].mxu1 %v10070_v20 }
 0x492   : > { %3992 = vmatmul.mubr.bf16.vlgmr.msra.gmra.mrb[96].mxu0 %v10070_v20  ;;  %4073 = vmatpush1.bf16.msra.mxu1 %v7592_v1  ;;  %v2088_v1 = vld [vmem:[#allocation7 + $0x170] sm:$0xff] }
 0x493   : > { %3775 = vmatprep.mubr.bf16.mxu1 %v10138_v59  ;;  %4001 = vmatprep.mubr.bf16.mxu0 %v10138_v59  ;;  %v7633_v43 = vcombine.high %v2084_v10, %v2088_v1  ;;  %v7632_v45 = vcombine.low %v2084_v10, %v2088_v1  ;;  %v2116_v1 = vld [vmem:[#allocation7 + $0x250] sm:$0xff] }
 0x494   : > { %4299 = vmatpush1.bf16.msra.mxu0 %v7594_v31  ;;  %4074 = vmatprep.subr.bf16.mxu1 %v7601_v54  ;;  %v2089_v31 = vld [vmem:[#allocation7 + $0x178] sm:$0xff]  ;;  %v7626_v54 = vcombine.low %v2077_v27, %v2081_v16 }
 0x495   : > { %4300 = vmatprep.subr.bf16.mxu0 %v7603_v44  ;;  %v2096_v44 = vld [vmem:[#allocation7 + $0x1b0] sm:$0xff]  ;;  %v2109_v16 = vld [vmem:[#allocation7 + $0x218] sm:$0xff] }
 0x496   : > { %4075 = vmatpush1.bf16.msra.mxu1 %v7600_v8  ;;  %v7635_v8 = vcombine.high %v2085_v12, %v2089_v31  ;;  %v7640_v26 = vcombine.low %v2092_v18, %v2096_v44 }
 0x497   : > { %4076 = vmatprep.subr.bf16.mxu1 %v7609_v0  ;;  %v2097_v0 = vld [vmem:[#allocation7 + $0x1b8] sm:$0xff] }
 0x498   : > { %4301 = vmatpush1.bf16.msra.mxu0 %v7602_v13  ;;  %v7641_v13 = vcombine.high %v2092_v18, %v2096_v44  ;;  %v7643_v46 = vcombine.high %v2093_v23, %v2097_v0  ;;  %v2124_v44 = vld [vmem:[#allocation7 + $0x290] sm:$0xff] }
 0x499   : > { %3776 = vmatmul.mubr.bf16.gmra.mrb[36].mxu1 %v10126_v52  ;;  %4302 = vmatprep.subr.bf16.mxu0 %v7611_v57  ;;  %v7634_v57 = vcombine.low %v2085_v12, %v2089_v31  ;;  %v2117_v31 = vld [vmem:[#allocation7 + $0x258] sm:$0xff] }
 0x49a   : > { %4002 = vmatmul.mubr.bf16.gmra.mrb[100].mxu0 %v10126_v52  ;;  %4077 = vmatpush1.bf16.msra.mxu1 %v7608_v38  ;;  %v2104_v38 = vld [vmem:[#allocation7 + $0x1f0] sm:$0xff] }
 0x49b   : > { %3785 = vmatprep.mubr.bf16.mxu1 %v10202_v11  ;;  %4011 = vmatprep.mubr.bf16.mxu0 %v10202_v11  ;;  %v7649_v48 = vcombine.high %v2100_v47, %v2104_v38  ;;  %v7648_v27 = vcombine.low %v2100_v47, %v2104_v38  ;;  %v2132_v38 = vld [vmem:[#allocation7 + $0x2d0] sm:$0xff] }
 0x49c   : > { %4303 = vmatpush1.bf16.msra.mxu0 %v7610_v32  ;;  %4078 = vmatprep.subr.bf16.mxu1 %v7617_v6  ;;  %v2105_v32 = vld [vmem:[#allocation7 + $0x1f8] sm:$0xff]  ;;  %v7642_v6 = vcombine.low %v2093_v23, %v2097_v0 }
 0x49d   : > { %4304 = vmatprep.subr.bf16.mxu0 %v7619_v15  ;;  %v2112_v15 = vld [vmem:[#allocation7 + $0x230] sm:$0xff]  ;;  %v2125_v0 = vld [vmem:[#allocation7 + $0x298] sm:$0xff] }
 0x49e   : > { %4079 = vmatpush1.bf16.msra.mxu1 %v7616_v62  ;;  %v7651_v62 = vcombine.high %v2101_v7, %v2105_v32  ;;  %v7656_v12 = vcombine.low %v2108_v60, %v2112_v15 }
 0x49f   : > { %4080 = vmatprep.subr.bf16.mxu1 %v7625_v22  ;;  %v2113_v22 = vld [vmem:[#allocation7 + $0x238] sm:$0xff] }
 0x4a0   : > { %4305 = vmatpush1.bf16.msra.mxu0 %v7618_v35  ;;  %v7657_v35 = vcombine.high %v2108_v60, %v2112_v15  ;;  %v7659_v10 = vcombine.high %v2109_v16, %v2113_v22  ;;  %v2140_v15 = vld [vmem:[#allocation7 + $0x310] sm:$0xff] }
 0x4a1   : > { %3786 = vmatmul.mubr.bf16.gmra.mrb[40].mxu1 %v10194_v9  ;;  %4306 = vmatprep.subr.bf16.mxu0 %v7627_v37  ;;  %v7650_v37 = vcombine.low %v2101_v7, %v2105_v32  ;;  %v2133_v32 = vld [vmem:[#allocation7 + $0x2d8] sm:$0xff] }
 0x4a2   : > { %4012 = vmatmul.mubr.bf16.gmra.mrb[104].mxu0 %v10194_v9  ;;  %4081 = vmatpush1.bf16.msra.mxu1 %v7624_v42  ;;  %v2120_v42 = vld [vmem:[#allocation7 + $0x270] sm:$0xff] }
 0x4a3   : > { %3795 = vmatprep.mubr.bf16.mxu1 %v10270_v40  ;;  %4021 = vmatprep.mubr.bf16.mxu0 %v10270_v40  ;;  %v7665_v18 = vcombine.high %v2116_v1, %v2120_v42  ;;  %v7664_v23 = vcombine.low %v2116_v1, %v2120_v42  ;;  %v2148_v42 = vld [vmem:[#allocation7 + $0x350] sm:$0xff] }
 0x4a4   : > { %4307 = vmatpush1.bf16.msra.mxu0 %v7626_v54  ;;  %4082 = vmatprep.subr.bf16.mxu1 %v7633_v43  ;;  %v2121_v54 = vld [vmem:[#allocation7 + $0x278] sm:$0xff]  ;;  %v7658_v43 = vcombine.low %v2109_v16, %v2113_v22 }
 0x4a5   : > { %4308 = vmatprep.subr.bf16.mxu0 %v7635_v8  ;;  %v2128_v8 = vld [vmem:[#allocation7 + $0x2b0] sm:$0xff]  ;;  %v2141_v22 = vld [vmem:[#allocation7 + $0x318] sm:$0xff] }
 0x4a6   : > { %4083 = vmatpush1.bf16.msra.mxu1 %v7632_v45  ;;  %v7667_v45 = vcombine.high %v2117_v31, %v2121_v54  ;;  %v7672_v7 = vcombine.low %v2124_v44, %v2128_v8 }
 0x4a7   : > { %4084 = vmatprep.subr.bf16.mxu1 %v7641_v13  ;;  %v2129_v13 = vld [vmem:[#allocation7 + $0x2b8] sm:$0xff] }
 0x4a8   : > { %4309 = vmatpush1.bf16.msra.mxu0 %v7634_v57  ;;  %v7673_v57 = vcombine.high %v2124_v44, %v2128_v8  ;;  %v7675_v47 = vcombine.high %v2125_v0, %v2129_v13  ;;  %v2156_v8 = vld [vmem:[#allocation7 + $0x390] sm:$0xff] }
 0x4a9   : > { %3796 = vmatmul.mubr.bf16.gmra.mrb[44].mxu1 %v10258_v50  ;;  %4310 = vmatprep.subr.bf16.mxu0 %v7643_v46  ;;  %v7666_v46 = vcombine.low %v2117_v31, %v2121_v54  ;;  %v2149_v54 = vld [vmem:[#allocation7 + $0x358] sm:$0xff] }
 0x4aa   : > { %4022 = vmatmul.mubr.bf16.gmra.mrb[108].mxu0 %v10258_v50  ;;  %4085 = vmatpush1.bf16.msra.mxu1 %v7640_v26  ;;  %v2136_v26 = vld [vmem:[#allocation7 + $0x2f0] sm:$0xff] }
 0x4ab   : > { %3805 = vmatprep.mubr.bf16.mxu1 %v10334_v25  ;;  %4031 = vmatprep.mubr.bf16.mxu0 %v10334_v25  ;;  %v7681_v60 = vcombine.high %v2132_v38, %v2136_v26  ;;  %v7680_v16 = vcombine.low %v2132_v38, %v2136_v26  ;;  %v2164_v26 = vld [vmem:[#allocation7 + $0x3d0] sm:$0xff] }
 0x4ac   : > { %4311 = vmatpush1.bf16.msra.mxu0 %v7642_v6  ;;  %4086 = vmatprep.subr.bf16.mxu1 %v7649_v48  ;;  %v2137_v6 = vld [vmem:[#allocation7 + $0x2f8] sm:$0xff]  ;;  %v7674_v48 = vcombine.low %v2125_v0, %v2129_v13 }
 0x4ad   : > { %4312 = vmatprep.subr.bf16.mxu0 %v7651_v62  ;;  %v2144_v62 = vld [vmem:[#allocation7 + $0x330] sm:$0xff]  ;;  %v2157_v13 = vld [vmem:[#allocation7 + $0x398] sm:$0xff] }
 0x4ae   : > { %4087 = vmatpush1.bf16.msra.mxu1 %v7648_v27  ;;  %v7683_v27 = vcombine.high %v2133_v32, %v2137_v6  ;;  %v7688_v31 = vcombine.low %v2140_v15, %v2144_v62 }
 0x4af   : > { %4088 = vmatprep.subr.bf16.mxu1 %v7657_v35  ;;  %v2145_v35 = vld [vmem:[#allocation7 + $0x338] sm:$0xff] }
 0x4b0   : > { %4313 = vmatpush1.bf16.msra.mxu0 %v7650_v37  ;;  %v7689_v37 = vcombine.high %v2140_v15, %v2144_v62  ;;  %v7691_v1 = vcombine.high %v2141_v22, %v2145_v35  ;;  %v2172_v62 = vld [vmem:[#allocation7 + $0x410] sm:$0xff] }
 0x4b1   : > { %3806 = vmatmul.mubr.bf16.gmra.mrb[48].mxu1 %v10326_v63  ;;  %4314 = vmatprep.subr.bf16.mxu0 %v7659_v10  ;;  %v7682_v10 = vcombine.low %v2133_v32, %v2137_v6  ;;  %v2165_v6 = vld [vmem:[#allocation7 + $0x3d8] sm:$0xff] }
 0x4b2   : > { %4032 = vmatmul.mubr.bf16.gmra.mrb[112].mxu0 %v10326_v63  ;;  %4089 = vmatpush1.bf16.msra.mxu1 %v7656_v12  ;;  %v2152_v12 = vld [vmem:[#allocation7 + $0x370] sm:$0xff] }
 0x4b3   : > { %3815 = vmatprep.mubr.bf16.mxu1 %v10393_v14  ;;  %4041 = vmatprep.mubr.bf16.mxu0 %v10393_v14  ;;  %v7697_v44 = vcombine.high %v2148_v42, %v2152_v12  ;;  %v7696_v0 = vcombine.low %v2148_v42, %v2152_v12  ;;  %v2180_v42 = vld [vmem:[#allocation7 + $0x450] sm:$0xff] }
 0x4b4   : > { %4315 = vmatpush1.bf16.msra.mxu0 %v7658_v43  ;;  %4090 = vmatprep.subr.bf16.mxu1 %v7665_v18  ;;  %v2153_v43 = vld [vmem:[#allocation7 + $0x378] sm:$0xff]  ;;  %v7690_v18 = vcombine.low %v2141_v22, %v2145_v35  ;;  %v2184_v12 = vld [vmem:[#allocation7 + $0x470] sm:$0xff] }
 0x4b5   : > { %4316 = vmatprep.subr.bf16.mxu0 %v7667_v45  ;;  %v2160_v45 = vld [vmem:[#allocation7 + $0x3b0] sm:$0xff]  ;;  %v2173_v35 = vld [vmem:[#allocation7 + $0x418] sm:$0xff] }
 0x4b6   : > { %4091 = vmatpush1.bf16.msra.mxu1 %v7664_v23  ;;  %v7699_v23 = vcombine.high %v2149_v54, %v2153_v43  ;;  %v7704_v32 = vcombine.low %v2156_v8, %v2160_v45 }
 0x4b7   : > { %4092 = vmatprep.subr.bf16.mxu1 %v7673_v57  ;;  %v2161_v57 = vld [vmem:[#allocation7 + $0x3b8] sm:$0xff] }
 0x4b8   : > { %4317 = vmatpush1.bf16.msra.mxu0 %v7666_v46  ;;  %v7705_v46 = vcombine.high %v2156_v8, %v2160_v45  ;;  %v7707_v38 = vcombine.high %v2157_v13, %v2161_v57  ;;  %v2188_v45 = vld [vmem:[#allocation7 + $0x490] sm:$0xff] }
 0x4b9   : > { %3816 = vmatmul.mubr.bf16.gmra.mrb[52].mxu1 %v10381_v29  ;;  %4318 = vmatprep.subr.bf16.mxu0 %v7675_v47  ;;  %v7698_v47 = vcombine.low %v2149_v54, %v2153_v43  ;;  %v2181_v43 = vld [vmem:[#allocation7 + $0x458] sm:$0xff] }
 0x4ba   : > { %4042 = vmatmul.mubr.bf16.gmra.mrb[116].mxu0 %v10381_v29  ;;  %4093 = vmatpush1.bf16.msra.mxu1 %v7672_v7  ;;  %v2168_v7 = vld [vmem:[#allocation7 + $0x3f0] sm:$0xff] }
 0x4bb   : > { %3825 = vmatprep.mubr.bf16.mxu1 %v10438_v51  ;;  %4051 = vmatprep.mubr.bf16.mxu0 %v10438_v51  ;;  %v7713_v15 = vcombine.high %v2164_v26, %v2168_v7  ;;  %v7712_v22 = vcombine.low %v2164_v26, %v2168_v7  ;;  %v2200_v26 = vld [vmem:[#allocation7 + $0x4f0] sm:$0xff] }
 0x4bc   : > { %4319 = vmatpush1.bf16.msra.mxu0 %v7674_v48  ;;  %4094 = vmatprep.subr.bf16.mxu1 %v7681_v60  ;;  %v2169_v48 = vld [vmem:[#allocation7 + $0x3f8] sm:$0xff]  ;;  %v7706_v60 = vcombine.low %v2157_v13, %v2161_v57 }
 0x4bd   : > { %4320 = vmatprep.subr.bf16.mxu0 %v7683_v27  ;;  %v2176_v27 = vld [vmem:[#allocation7 + $0x430] sm:$0xff]  ;;  %v2189_v13 = vld [vmem:[#allocation7 + $0x498] sm:$0xff] }
 0x4be   : > { %4095 = vmatpush1.bf16.msra.mxu1 %v7680_v16  ;;  %v7715_v16 = vcombine.high %v2165_v6, %v2169_v48  ;;  %v7720_v54 = vcombine.low %v2172_v62, %v2176_v27  ;;  %v2193_v57 = vld [vmem:[#allocation7 + $0x4b8] sm:$0xff] }
 0x4bf   : > { %4096 = vmatprep.subr.bf16.mxu1 %v7689_v37  ;;  %v2177_v37 = vld [vmem:[#allocation7 + $0x438] sm:$0xff]  ;;  %v7739_v7 = vcombine.high %v2189_v13, %v2193_v57 }
 0x4c0   : > { %4321 = vmatpush1.bf16.msra.mxu0 %v7682_v10  ;;  %v7721_v10 = vcombine.high %v2172_v62, %v2176_v27  ;;  %v7722_v8 = vcombine.low %v2173_v35, %v2177_v37  ;;  %v2204_v62 = vld [vmem:[#allocation7 + $0x510] sm:$0xff] }
 0x4c1   : > { %3826 = vmatmul.mubr.bf16.gmra.mrb[56].mxu1 %v10430_v58  ;;  %4322 = vmatprep.subr.bf16.mxu0 %v7691_v1  ;;  %v7714_v1 = vcombine.low %v2165_v6, %v2169_v48  ;;  %v2197_v6 = vld [vmem:[#allocation7 + $0x4d8] sm:$0xff] }
 0x4c2   : > { %4052 = vmatmul.mubr.bf16.gmra.mrb[120].mxu0 %v10430_v58  ;;  %4097 = vmatpush1.bf16.msra.mxu1 %v7688_v31  ;;  %v7723_v31 = vcombine.high %v2173_v35, %v2177_v37  ;;  %v2201_v48 = vld [vmem:[#allocation7 + $0x4f8] sm:$0xff] }
 0x4c3   : > { %3835 = vmatprep.mubr.bf16.mxu1 %v10466_v56  ;;  %4061 = vmatprep.mubr.bf16.mxu0 %v10466_v56  ;;  %v7746_v37 = vcombine.low %v2197_v6, %v2201_v48 }
 0x4c4   : > { %4323 = vmatpush1.bf16.msra.mxu0 %v7690_v18  ;;  %4098 = vmatprep.subr.bf16.mxu1 %v7697_v44  ;;  %v2185_v18 = vld [vmem:[#allocation7 + $0x478] sm:$0xff]  ;;  %v7729_v44 = vcombine.high %v2180_v42, %v2184_v12 }
 0x4c5   : > { %4324 = vmatprep.subr.bf16.mxu0 %v7699_v23  ;;  %v2192_v23 = vld [vmem:[#allocation7 + $0x4b0] sm:$0xff] }
 0x4c6   : > { %4099 = vmatpush1.bf16.msra.mxu1 %v7696_v0  ;;  %v7728_v0 = vcombine.low %v2180_v42, %v2184_v12 }
 0x4c7   : > { %4100 = vmatprep.subr.bf16.mxu1 %v7705_v46  ;;  %v7737_v46 = vcombine.high %v2188_v45, %v2192_v23 }
 0x4c8   : > { %4325 = vmatpush1.bf16.msra.mxu0 %v7698_v47  ;;  %v7730_v47 = vcombine.low %v2181_v43, %v2185_v18 }
 0x4c9   : > { %3836 = vmatmul.mubr.bf16.gmra.mrb[60].mxu1 %v10462_v41  ;;  %4326 = vmatprep.subr.bf16.mxu0 %v7707_v38  ;;  %v2196_v38 = vld [vmem:[#allocation7 + $0x4d0] sm:$0xff] }
 0x4ca   : > { %4062 = vmatmul.mubr.bf16.gmra.mrb[124].mxu0 %v10462_v41  ;;  %4101 = vmatpush1.bf16.msra.mxu1 %v7704_v32  ;;  %v7736_v32 = vcombine.low %v2188_v45, %v2192_v23  ;;  %v7744_v27 = vcombine.low %v2196_v38, %v2200_v26  ;;  %v2221_v45 = vld [vmem:[#allocation7 + $0x598] sm:$0xff] }
 0x4cb   : > { %4104 = vmatprep.mubr.bf16.mxu1 %v10076_v24  ;;  %4330 = vmatprep.mubr.bf16.mxu0 %v10076_v24  ;;  %v7731_v24 = vcombine.high %v2181_v43, %v2185_v18  ;;  %v2225_v23 = vld [vmem:[#allocation7 + $0x5b8] sm:$0xff] }
 0x4cc   : > { %4327 = vmatpush1.bf16.msra.mxu0 %v7706_v60  ;;  %4102 = vmatprep.subr.bf16.mxu1 %v7713_v15  ;;  %v7745_v60 = vcombine.high %v2196_v38, %v2200_v26  ;;  %v7738_v15 = vcombine.low %v2189_v13, %v2193_v57  ;;  %v2228_v13 = vld [vmem:[#allocation7 + $0x5d0] sm:$0xff]  ;;  %v2229_v38 = vld [vmem:[#allocation7 + $0x5d8] sm:$0xff] }
 0x4cd   : > { %4328 = vmatprep.subr.bf16.mxu0 %v7715_v16  ;;  %v2205_v16 = vld [vmem:[#allocation7 + $0x518] sm:$0xff]  ;;  %v2232_v57 = vld [vmem:[#allocation7 + $0x5f0] sm:$0xff] }
 0x4ce   : > { %4103 = vmatpush1.bf16.msra.mxu1 %v7712_v22  ;;  %v2209_v22 = vld [vmem:[#allocation7 + $0x538] sm:$0xff] }
 0x4cf   : > { %4185 = vmatprep.subr.bf16.mxu1 %v7721_v10  ;;  %v2212_v10 = vld [vmem:[#allocation7 + $0x550] sm:$0xff]  ;;  %v7755_v42 = vcombine.high %v2205_v16, %v2209_v22  ;;  %v7754_v18 = vcombine.low %v2205_v16, %v2209_v22  ;;  %v2233_v26 = vld [vmem:[#allocation7 + $0x5f8] sm:$0xff] }
 0x4d0   : > { %4329 = vmatpush1.bf16.msra.mxu0 %v7714_v1  ;;  %v2216_v1 = vld [vmem:[#allocation7 + $0x570] sm:$0xff] }
 0x4d1   : > { %4105 = vmatmul.mubr.bf16.vlgmr.msra.gmra.mrb[64].mxu1 %v10068_v19  ;;  %4411 = vmatprep.subr.bf16.mxu0 %v7723_v31  ;;  %v2213_v31 = vld [vmem:[#allocation7 + $0x558] sm:$0xff]  ;;  %v7761_v43 = vcombine.high %v2212_v10, %v2216_v1 }
 0x4d2   : > { %4186 = vmatpush1.bf16.msra.mxu1 %v7720_v54  ;;  %4114 = vmatprep.mubr.bf16.mxu1 %v10136_v53  ;;  %v2217_v54 = vld [vmem:[#allocation7 + $0x578] sm:$0xff] }
 0x4d3   : > { %4331 = vmatmul.mubr.bf16.vlgmr.msra.gmra.mrb[128].mxu0 %v10068_v19  ;;  %4187 = vmatprep.subr.bf16.mxu1 %v7729_v44  ;;  %v2208_v19 = vld [vmem:[#allocation7 + $0x530] sm:$0xff] }
 0x4d4   : > { %4340 = vmatprep.mubr.bf16.mxu0 %v10136_v53  ;;  %4412 = vmatpush1.bf16.msra.mxu0 %v7722_v8  ;;  %v7747_v53 = vcombine.high %v2197_v6, %v2201_v48  ;;  %v7753_v35 = vcombine.high %v2204_v62, %v2208_v19  ;;  %v7752_v12 = vcombine.low %v2204_v62, %v2208_v19  ;;  %v2220_v44 = vld [vmem:[#allocation7 + $0x590] sm:$0xff] }
 0x4d5   : > { %4413 = vmatprep.subr.bf16.mxu0 %v7731_v24  ;;  %v7760_v8 = vcombine.low %v2212_v10, %v2216_v1  ;;  %v2236_v6 = vld [vmem:[#allocation7 + $0x610] sm:$0xff]  ;;  %v7776_v48 = vcombine.low %v2228_v13, %v2232_v57  ;;  %v7778_v19 = vcombine.low %v2229_v38, %v2233_v26 }
 0x4d6   : > { %4188 = vmatpush1.bf16.msra.mxu1 %v7728_v0  ;;  %v7762_v0 = vcombine.low %v2213_v31, %v2217_v54 }
 0x4d7   : > { %4189 = vmatprep.subr.bf16.mxu1 %v7737_v46  ;;  %v7771_v46 = vcombine.high %v2221_v45, %v2225_v23 }
 0x4d8   : > { %4414 = vmatpush1.bf16.msra.mxu0 %v7730_v47 }
 0x4d9   : > { %4115 = vmatmul.mubr.bf16.gmra.mrb[68].mxu1 %v10124_v39  ;;  %4415 = vmatprep.subr.bf16.mxu0 %v7739_v7  ;;  %v7777_v7 = vcombine.high %v2228_v13, %v2232_v57  ;;  %v2268_v13 = vld [vmem:[#allocation7 + $0x710] sm:$0xff] }
 0x4da   : > { %4190 = vmatpush1.bf16.msra.mxu1 %v7736_v32  ;;  %4124 = vmatprep.mubr.bf16.mxu1 %v10200_v55  ;;  %v7770_v32 = vcombine.low %v2221_v45, %v2225_v23  ;;  %v2261_v45 = vld [vmem:[#allocation7 + $0x6d8] sm:$0xff] }
 0x4db   : > { %4341 = vmatmul.mubr.bf16.gmra.mrb[132].mxu0 %v10124_v39  ;;  %4191 = vmatprep.subr.bf16.mxu1 %v7745_v60  ;;  %v2224_v39 = vld [vmem:[#allocation7 + $0x5b0] sm:$0xff]  ;;  %v2237_v60 = vld [vmem:[#allocation7 + $0x618] sm:$0xff] }
 0x4dc   : > { %4350 = vmatprep.mubr.bf16.mxu0 %v10200_v55  ;;  %4416 = vmatpush1.bf16.msra.mxu0 %v7738_v15  ;;  %v7763_v55 = vcombine.high %v2213_v31, %v2217_v54  ;;  %v7769_v24 = vcombine.high %v2220_v44, %v2224_v39  ;;  %v7768_v47 = vcombine.low %v2220_v44, %v2224_v39  ;;  %v2241_v15 = vld [vmem:[#allocation7 + $0x638] sm:$0xff]  ;;  %v2260_v44 = vld [vmem:[#allocation7 + $0x6d0] sm:$0xff] }
 0x4dd   : > { %4417 = vmatprep.subr.bf16.mxu0 %v7747_v53  ;;  %v2244_v53 = vld [vmem:[#allocation7 + $0x650] sm:$0xff]  ;;  %v7787_v16 = vcombine.high %v2237_v60, %v2241_v15  ;;  %v7786_v1 = vcombine.low %v2237_v60, %v2241_v15  ;;  %v2253_v31 = vld [vmem:[#allocation7 + $0x698] sm:$0xff] }
 0x4de   : > { %4192 = vmatpush1.bf16.msra.mxu1 %v7744_v27  ;;  %v2248_v27 = vld [vmem:[#allocation7 + $0x670] sm:$0xff]  ;;  %v2257_v54 = vld [vmem:[#allocation7 + $0x6b8] sm:$0xff] }
 0x4df   : > { %4193 = vmatprep.subr.bf16.mxu1 %v7753_v35  ;;  %v2245_v35 = vld [vmem:[#allocation7 + $0x658] sm:$0xff]  ;;  %v7793_v10 = vcombine.high %v2244_v53, %v2248_v27  ;;  %v2264_v39 = vld [vmem:[#allocation7 + $0x6f0] sm:$0xff] }
 0x4e0   : > { %4418 = vmatpush1.bf16.msra.mxu0 %v7746_v37  ;;  %v2249_v37 = vld [vmem:[#allocation7 + $0x678] sm:$0xff]  ;;  %v7808_v57 = vcombine.low %v2260_v44, %v2264_v39 }
 0x4e1   : > { %4125 = vmatmul.mubr.bf16.gmra.mrb[72].mxu1 %v10192_v5  ;;  %4419 = vmatprep.subr.bf16.mxu0 %v7755_v42  ;;  %v2252_v42 = vld [vmem:[#allocation7 + $0x690] sm:$0xff]  ;;  %v2265_v23 = vld [vmem:[#allocation7 + $0x6f8] sm:$0xff] }
 0x4e2   : > { %4194 = vmatpush1.bf16.msra.mxu1 %v7752_v12  ;;  %4134 = vmatprep.mubr.bf16.mxu1 %v10268_v61  ;;  %v7792_v12 = vcombine.low %v2244_v53, %v2248_v27  ;;  %v2285_v53 = vld [vmem:[#allocation7 + $0x798] sm:$0xff] }
 0x4e3   : > { %4351 = vmatmul.mubr.bf16.gmra.mrb[136].mxu0 %v10192_v5  ;;  %4195 = vmatprep.subr.bf16.mxu1 %v7761_v43  ;;  %v2240_v5 = vld [vmem:[#allocation7 + $0x630] sm:$0xff]  ;;  %v2289_v27 = vld [vmem:[#allocation7 + $0x7b8] sm:$0xff] }
 0x4e4   : > { %4360 = vmatprep.mubr.bf16.mxu0 %v10268_v61  ;;  %4420 = vmatpush1.bf16.msra.mxu0 %v7754_v18  ;;  %v7779_v61 = vcombine.high %v2229_v38, %v2233_v26  ;;  %v7785_v62 = vcombine.high %v2236_v6, %v2240_v5  ;;  %v7784_v22 = vcombine.low %v2236_v6, %v2240_v5 }
 0x4e5   : > { %4421 = vmatprep.subr.bf16.mxu0 %v7763_v55  ;;  %v7794_v18 = vcombine.low %v2245_v35, %v2249_v37  ;;  %v7803_v55 = vcombine.high %v2253_v31, %v2257_v54  ;;  %v7810_v26 = vcombine.low %v2261_v45, %v2265_v23 }
 0x4e6   : > { %4196 = vmatpush1.bf16.msra.mxu1 %v7760_v8 }
 0x4e7   : > { %4197 = vmatprep.subr.bf16.mxu1 %v7769_v24  ;;  %v7809_v24 = vcombine.high %v2260_v44, %v2264_v39  ;;  %v8818_v44 = vld [vmem:[#allocation8 + $0x24] ss:$16 sps:$4 sm:$0xff]   ;;  %v8813_v39 = vld [vmem:[#allocation8 + $0x8] ss:$16 sps:$4 sm:$0xff]  }
 0x4e8   : > { %4422 = vmatpush1.bf16.msra.mxu0 %v7762_v0  ;;  %v7802_v0 = vcombine.low %v2253_v31, %v2257_v54  ;;  %v8812_v31 = vld [vmem:[#allocation8 + $0x4] ss:$16 sps:$4 sm:$0xff]  }
 0x4e9   : > { %4135 = vmatmul.mubr.bf16.gmra.mrb[76].mxu1 %v10256_v4  ;;  %4423 = vmatprep.subr.bf16.mxu0 %v7771_v46  ;;  %v2269_v46 = vld [vmem:[#allocation7 + $0x718] sm:$0xff] }
 0x4ea   : > { %4198 = vmatpush1.bf16.msra.mxu1 %v7768_v47  ;;  %4144 = vmatprep.mubr.bf16.mxu1 %v10332_v2  ;;  %v2273_v47 = vld [vmem:[#allocation7 + $0x738] sm:$0xff] }
 0x4eb   : > { %4361 = vmatmul.mubr.bf16.gmra.mrb[140].mxu0 %v10256_v4  ;;  %4199 = vmatprep.subr.bf16.mxu1 %v7777_v7  ;;  %v2256_v4 = vld [vmem:[#allocation7 + $0x6b0] sm:$0xff]  ;;  %v7819_v6 = vcombine.high %v2269_v46, %v2273_v47  ;;  %v7818_v15 = vcombine.low %v2269_v46, %v2273_v47  ;;  %v8837_v47 = vld [vmem:[#allocation8 + $0x88] ss:$16 sps:$4 sm:$0xff]  }
 0x4ec   : > { %4370 = vmatprep.mubr.bf16.mxu0 %v10332_v2  ;;  %4424 = vmatpush1.bf16.msra.mxu0 %v7770_v32  ;;  %v7795_v2 = vcombine.high %v2245_v35, %v2249_v37  ;;  %v7801_v43 = vcombine.high %v2252_v42, %v2256_v4  ;;  %v7800_v8 = vcombine.low %v2252_v42, %v2256_v4  ;;  %v2276_v7 = vld [vmem:[#allocation7 + $0x750] sm:$0xff]  ;;  %v2293_v42 = vld [vmem:[#allocation7 + $0x7d8] sm:$0xff] }
 0x4ed   : > { %4425 = vmatprep.subr.bf16.mxu0 %v7779_v61  ;;  %v2280_v32 = vld [vmem:[#allocation7 + $0x770] sm:$0xff]  ;;  %v2277_v61 = vld [vmem:[#allocation7 + $0x758] sm:$0xff] }
 0x4ee   : > { %4200 = vmatpush1.bf16.msra.mxu1 %v7776_v48  ;;  %v2281_v48 = vld [vmem:[#allocation7 + $0x778] sm:$0xff]  ;;  %v7825_v60 = vcombine.high %v2276_v7, %v2280_v32  ;;  %v2292_v35 = vld [vmem:[#allocation7 + $0x7d0] sm:$0xff] }
 0x4ef   : > { %4201 = vmatprep.subr.bf16.mxu1 %v7785_v62  ;;  %v2284_v62 = vld [vmem:[#allocation7 + $0x790] sm:$0xff]  ;;  %v2297_v4 = vld [vmem:[#allocation7 + $0x7f8] sm:$0xff] }
 0x4f0   : > { %4426 = vmatpush1.bf16.msra.mxu0 %v7778_v19  ;;  %v7824_v19 = vcombine.low %v2276_v7, %v2280_v32  ;;  %v2296_v37 = vld [vmem:[#allocation7 + $0x7f0] sm:$0xff]  ;;  %v7842_v54 = vcombine.low %v2293_v42, %v2297_v4  ;;  %v8851_v7 = vld [vmem:[#allocation8 + $0xcc] ss:$16 sps:$4 sm:$0xff]  }
 0x4f1   : > { %4145 = vmatmul.mubr.bf16.gmra.mrb[80].mxu1 %v10324_v17  ;;  %4427 = vmatprep.subr.bf16.mxu0 %v7787_v16  ;;  %v8842_v46 = vld [vmem:[#allocation8 + $0xa4] ss:$16 sps:$4 sm:$0xff]   ;;  %v8846_v32 = vld [vmem:[#allocation8 + $0xc0] ss:$16 sps:$4 sm:$0xff]  }
 0x4f2   : > { %4202 = vmatpush1.bf16.msra.mxu1 %v7784_v22  ;;  %4154 = vmatprep.mubr.bf16.mxu1 %v10391_v28  ;;  %v7826_v22 = vcombine.low %v2277_v61, %v2281_v48 }
 0x4f3   : > { %4371 = vmatmul.mubr.bf16.gmra.mrb[144].mxu0 %v10324_v17  ;;  %4203 = vmatprep.subr.bf16.mxu1 %v7793_v10  ;;  %v2272_v17 = vld [vmem:[#allocation7 + $0x730] sm:$0xff]  ;;  %v7835_v10 = vcombine.high %v2285_v53, %v2289_v27 }
 0x4f4   : > { %4380 = vmatprep.mubr.bf16.mxu0 %v10391_v28  ;;  %4428 = vmatpush1.bf16.msra.mxu0 %v7786_v1  ;;  %v7811_v28 = vcombine.high %v2261_v45, %v2265_v23  ;;  %v7817_v38 = vcombine.high %v2268_v13, %v2272_v17  ;;  %v7816_v5 = vcombine.low %v2268_v13, %v2272_v17  ;;  %v8827_v45 = vld [vmem:[#allocation8 + $0x4c] ss:$16 sps:$4 sm:$0xff]   ;;  %v8822_v23 = vld [vmem:[#allocation8 + $0x40] ss:$16 sps:$4 sm:$0xff]   ;;  %v8831_v17 = vld [vmem:[#allocation8 + $0x68] ss:$16 sps:$4 sm:$0xff]  }
 0x4f5   : > { %4429 = vmatprep.subr.bf16.mxu0 %v7795_v2  ;;  %v7841_v2 = vcombine.high %v2292_v35, %v2296_v37  ;;  %v8833_v13 = vld [vmem:[#allocation8 + $0x6c] ss:$16 sps:$4 sm:$0xff]  }
 0x4f6   : > { %4204 = vmatpush1.bf16.msra.mxu1 %v7792_v12  ;;  %v7834_v12 = vcombine.low %v2285_v53, %v2289_v27  ;;  %v8875_v53 = vld [vmem:[#allocation8 + $0x14c] ss:$16 sps:$4 sm:$0xff]   ;;  %v8870_v27 = vld [vmem:[#allocation8 + $0x140] ss:$16 sps:$4 sm:$0xff]  }
 0x4f7   : > { %4205 = vmatprep.subr.bf16.mxu1 %v7801_v43  ;;  %v8815_v43 = vld [vmem:[#allocation8 + $0xc] ss:$16 sps:$4 sm:$0xff]  }
 0x4f8   : > { %4430 = vmatpush1.bf16.msra.mxu0 %v7794_v18  ;;  %v8810_v18 = vld [vmem:[#allocation8] ss:$16 sps:$4 sm:$0xff]  }
 0x4f9   : > { %4155 = vmatmul.mubr.bf16.gmra.mrb[84].mxu1 %v10379_v3  ;;  %4431 = vmatprep.subr.bf16.mxu0 %v7803_v55  ;;  %v8821_v55 = vld [vmem:[#allocation8 + $0x2c] ss:$16 sps:$4 sm:$0xff]  }
 0x4fa   : > { %4206 = vmatpush1.bf16.msra.mxu1 %v7800_v8  ;;  %4164 = vmatprep.mubr.bf16.mxu1 %v10436_v30  ;;  %v8819_v8 = vld [vmem:[#allocation8 + $0x28] ss:$16 sps:$4 sm:$0xff]  }
 0x4fb   : > { %4381 = vmatmul.mubr.bf16.gmra.mrb[148].mxu0 %v10379_v3  ;;  %4207 = vmatprep.subr.bf16.mxu1 %v7809_v24  ;;  %v2288_v3 = vld [vmem:[#allocation7 + $0x7b0] sm:$0xff] }
 0x4fc   : > { %4390 = vmatprep.mubr.bf16.mxu0 %v10436_v30  ;;  %4432 = vmatpush1.bf16.msra.mxu0 %v7802_v0  ;;  %v7827_v30 = vcombine.high %v2277_v61, %v2281_v48  ;;  %v7833_v16 = vcombine.high %v2284_v62, %v2288_v3  ;;  %v7832_v1 = vcombine.low %v2284_v62, %v2288_v3  ;;  %v8830_v24 = vld [vmem:[#allocation8 + $0x64] ss:$16 sps:$4 sm:$0xff]   ;;  %v8825_v0 = vld [vmem:[#allocation8 + $0x48] ss:$16 sps:$4 sm:$0xff]   ;;  %v8857_v61 = vld [vmem:[#allocation8 + $0xec] ss:$16 sps:$4 sm:$0xff]  }
 0x4fd   : > { %4433 = vmatprep.subr.bf16.mxu0 %v7811_v28  ;;  %v8839_v28 = vld [vmem:[#allocation8 + $0x8c] ss:$16 sps:$4 sm:$0xff]   ;;  %v8855_v48 = vld [vmem:[#allocation8 + $0xe8] ss:$16 sps:$4 sm:$0xff]   ;;  %v8866_v62 = vld [vmem:[#allocation8 + $0x124] ss:$16 sps:$4 sm:$0xff]  }
 0x4fe   : > { %4208 = vmatpush1.bf16.msra.mxu1 %v7808_v57  ;;  %v8834_v57 = vld [vmem:[#allocation8 + $0x80] ss:$16 sps:$4 sm:$0xff]   ;;  %v8861_v3 = vld [vmem:[#allocation8 + $0x108] ss:$16 sps:$4 sm:$0xff]  }
 0x4ff   : > { %4209 = vmatprep.subr.bf16.mxu1 %v7817_v38  ;;  %v8845_v38 = vld [vmem:[#allocation8 + $0xac] ss:$16 sps:$4 sm:$0xff]  }
 0x500   : > { %4434 = vmatpush1.bf16.msra.mxu0 %v7810_v26  ;;  %v8843_v26 = vld [vmem:[#allocation8 + $0xa8] ss:$16 sps:$4 sm:$0xff]  }
 0x501   : > { %4165 = vmatmul.mubr.bf16.gmra.mrb[88].mxu1 %v10428_v49  ;;  %4435 = vmatprep.subr.bf16.mxu0 %v7819_v6  ;;  %v8854_v6 = vld [vmem:[#allocation8 + $0xe4] ss:$16 sps:$4 sm:$0xff]  }
 0x502   : > { %4210 = vmatpush1.bf16.msra.mxu1 %v7816_v5  ;;  %4174 = vmatprep.mubr.bf16.mxu1 %v10464_v33  ;;  %v8849_v5 = vld [vmem:[#allocation8 + $0xc8] ss:$16 sps:$4 sm:$0xff]  }
 0x503   : > { %4391 = vmatmul.mubr.bf16.gmra.mrb[152].mxu0 %v10428_v49  ;;  %4211 = vmatprep.subr.bf16.mxu1 %v7825_v60  ;;  %v7843_v49 = vcombine.high %v2293_v42, %v2297_v4  ;;  %v8863_v60 = vld [vmem:[#allocation8 + $0x10c] ss:$16 sps:$4 sm:$0xff]   ;;  %v8890_v42 = vld [vmem:[#allocation8 + $0x1a4] ss:$16 sps:$4 sm:$0xff]   ;;  %v8885_v4 = vld [vmem:[#allocation8 + $0x188] ss:$16 sps:$4 sm:$0xff]  }
 0x504   : > { %4400 = vmatprep.mubr.bf16.mxu0 %v10464_v33  ;;  %4436 = vmatpush1.bf16.msra.mxu0 %v7818_v15  ;;  %v7840_v33 = vcombine.low %v2292_v35, %v2296_v37  ;;  %v8858_v15 = vld [vmem:[#allocation8 + $0x100] ss:$16 sps:$4 sm:$0xff]   ;;  %v8881_v35 = vld [vmem:[#allocation8 + $0x16c] ss:$16 sps:$4 sm:$0xff]   ;;  %v8879_v37 = vld [vmem:[#allocation8 + $0x168] ss:$16 sps:$4 sm:$0xff]  }
 0x505   : > { %4437 = vmatprep.subr.bf16.mxu0 %v7827_v30  ;;  %v8869_v30 = vld [vmem:[#allocation8 + $0x12c] ss:$16 sps:$4 sm:$0xff]  }
 0x506   : > { %4212 = vmatpush1.bf16.msra.mxu1 %v7824_v19  ;;  %v8867_v19 = vld [vmem:[#allocation8 + $0x128] ss:$16 sps:$4 sm:$0xff]  }
 0x507   : > { %4213 = vmatprep.subr.bf16.mxu1 %v7833_v16  ;;  %v8878_v16 = vld [vmem:[#allocation8 + $0x164] ss:$16 sps:$4 sm:$0xff]  }
 0x508   : > { %4438 = vmatpush1.bf16.msra.mxu0 %v7826_v22  ;;  %v8873_v22 = vld [vmem:[#allocation8 + $0x148] ss:$16 sps:$4 sm:$0xff]  }
 0x509   : > { %4175 = vmatmul.mubr.bf16.gmra.mrb[92].mxu1 %v10460_v36  ;;  %4439 = vmatprep.subr.bf16.mxu0 %v7835_v10  ;;  %v8887_v10 = vld [vmem:[#allocation8 + $0x18c] ss:$16 sps:$4 sm:$0xff]  }
 0x50a   : > { %4214 = vmatpush1.bf16.msra.mxu1 %v7832_v1  ;;  %4217 = vmatprep.mubr.bf16.mxu1 %v10078_v21  ;;  %v8882_v1 = vld [vmem:[#allocation8 + $0x180] ss:$16 sps:$4 sm:$0xff]  }
 0x50b   : > { %4401 = vmatmul.mubr.bf16.gmra.mrb[156].mxu0 %v10460_v36  ;;  %4215 = vmatprep.subr.bf16.mxu1 %v7841_v2  ;;  %v8816_v36 = vld [vmem:[#allocation8 + $0x20] ss:$16 sps:$4 sm:$0xff]   ;;  %v8893_v2 = vld [vmem:[#allocation8 + $0x1ac] ss:$16 sps:$4 sm:$0xff]  }
 0x50c   : > { %4440 = vmatpush1.bf16.msra.mxu0 %v7834_v12  ;;  %4443 = vmatprep.mubr.bf16.mxu0 %v10078_v21  ;;  %v8824_v21 = vld [vmem:[#allocation8 + $0x44] ss:$16 sps:$4 sm:$0xff]   ;;  %v8891_v12 = vld [vmem:[#allocation8 + $0x1a8] ss:$16 sps:$4 sm:$0xff]  }
 0x50d   : > { %4441 = vmatprep.subr.bf16.mxu0 %v7843_v49  ;;  %v8899_v49 = vld [vmem:[#allocation8 + $0x1cc] ss:$16 sps:$4 sm:$0xff]  }
 0x50e   : > { %4216 = vmatpush1.bf16.msra.mxu1 %v7840_v33  ;;  %v8894_v33 = vld [vmem:[#allocation8 + $0x1c0] ss:$16 sps:$4 sm:$0xff]  }
 0x50f   : > { %6410 = vmatprep.subr.bf16.mxu1 %v8812_v31  ;;  %v8902_v31 = vld [vmem:[#allocation8 + $0x1e4] ss:$16 sps:$4 sm:$0xff]  }
 0x510   : > { %4442 = vmatpush1.bf16.msra.mxu0 %v7842_v54  ;;  %v8897_v54 = vld [vmem:[#allocation8 + $0x1c8] ss:$16 sps:$4 sm:$0xff]  }
 0x511   : > { %4218 = vmatmul.mubr.bf16.vlgmr.msra.gmra.mrb[64].mxu1 %v10070_v20  ;;  %6574 = vmatprep.subr.bf16.mxu0 %v8815_v43  ;;  %v8905_v43 = vld [vmem:[#allocation8 + $0x1ec] ss:$16 sps:$4 sm:$0xff]  }
 0x512   : > { %4227 = vmatprep.mubr.bf16.mxu1 %v10138_v59  ;;  %6411 = vmatpush1.bf16.msra.mxu1 %v8810_v18  ;;  %v8903_v18 = vld [vmem:[#allocation8 + $0x1e8] ss:$16 sps:$4 sm:$0xff]  }
 0x513   : > { %4444 = vmatmul.mubr.bf16.vlgmr.msra.gmra.mrb[128].mxu0 %v10070_v20  ;;  %6412 = vmatprep.subr.bf16.mxu1 %v8818_v44  ;;  %v8828_v20 = vld [vmem:[#allocation8 + $0x60] ss:$16 sps:$4 sm:$0xff]   ;;  %v8911_v44 = vld [vmem:[#allocation8 + $0x20c] ss:$16 sps:$4 sm:$0xff]  }
 0x514   : > { %4453 = vmatprep.mubr.bf16.mxu0 %v10138_v59  ;;  %6575 = vmatpush1.bf16.msra.mxu0 %v8813_v39  ;;  %v8836_v59 = vld [vmem:[#allocation8 + $0x84] ss:$16 sps:$4 sm:$0xff]  }
 0x515   : > { %6576 = vmatprep.subr.bf16.mxu0 %v8821_v55  ;;  %v10573_v39 = vld [vmem:[%s11008_s10] sm:$0xff] }
 0x516   : > { %6413 = vmatpush1.bf16.msra.mxu1 %v8816_v36  ;;  %v10577_v55 = vrot.slane %v10573_v39, %v9951_v34 }
 0x517   : > { %6414 = vmatprep.subr.bf16.mxu1 %v8824_v21  ;;  %v11073_v21 = vld [vmem:[#allocation25_spill] sm:$0xff] }
 0x518   : > { %6577 = vmatpush1.bf16.msra.mxu0 %v8819_v8  ;;  %v10585_v8 = vrot.slane %v10573_v39, %v11073_v21 }
 0x519   : > { %4228 = vmatmul.mubr.bf16.gmra.mrb[68].mxu1 %v10126_v52  ;;  %6578 = vmatprep.subr.bf16.mxu0 %v8827_v45  ;;  %v11074_v45 = vld [vmem:[#allocation27_spill] sm:$0xff] }
 0x51a   : > { %4237 = vmatprep.mubr.bf16.mxu1 %v10202_v11  ;;  %6415 = vmatpush1.bf16.msra.mxu1 %v8822_v23  ;;  %v10589_v23 = vrot.slane %v10573_v39, %v11074_v45 }
 0x51b   : > { %4454 = vmatmul.mubr.bf16.gmra.mrb[132].mxu0 %v10126_v52  ;;  %6416 = vmatprep.subr.bf16.mxu1 %v8830_v24  ;;  %v8840_v52 = vld [vmem:[#allocation8 + $0xa0] ss:$16 sps:$4 sm:$0xff]  }
 0x51c   : > { %4463 = vmatprep.mubr.bf16.mxu0 %v10202_v11  ;;  %6579 = vmatpush1.bf16.msra.mxu0 %v8825_v0  ;;  %v8848_v11 = vld [vmem:[#allocation8 + $0xc4] ss:$16 sps:$4 sm:$0xff]  }
 0x51d   : > { %6580 = vmatprep.subr.bf16.mxu0 %v8833_v13 }
 0x51e   : > { %6417 = vmatpush1.bf16.msra.mxu1 %v8828_v20 }
 0x51f   : > { %6418 = vmatprep.subr.bf16.mxu1 %v8836_v59 }
 0x520   : > { %6581 = vmatpush1.bf16.msra.mxu0 %v8831_v17 }
 0x521   : > { %4238 = vmatmul.mubr.bf16.gmra.mrb[72].mxu1 %v10194_v9  ;;  %6582 = vmatprep.subr.bf16.mxu0 %v8839_v28 }
 0x522   : > { %4247 = vmatprep.mubr.bf16.mxu1 %v10270_v40  ;;  %6419 = vmatpush1.bf16.msra.mxu1 %v8834_v57 }
 0x523   : > { %4464 = vmatmul.mubr.bf16.gmra.mrb[136].mxu0 %v10194_v9  ;;  %6420 = vmatprep.subr.bf16.mxu1 %v8842_v46  ;;  %v8852_v9 = vld [vmem:[#allocation8 + $0xe0] ss:$16 sps:$4 sm:$0xff]  }
 0x524   : > { %4473 = vmatprep.mubr.bf16.mxu0 %v10270_v40  ;;  %6583 = vmatpush1.bf16.msra.mxu0 %v8837_v47  ;;  %v8860_v40 = vld [vmem:[#allocation8 + $0x104] ss:$16 sps:$4 sm:$0xff]  }
 0x525   : > { %6584 = vmatprep.subr.bf16.mxu0 %v8845_v38 }
 0x526   : > { %6421 = vmatpush1.bf16.msra.mxu1 %v8840_v52 }
 0x527   : > { %6422 = vmatprep.subr.bf16.mxu1 %v8848_v11 }
 0x528   : > { %6585 = vmatpush1.bf16.msra.mxu0 %v8843_v26 }
 0x529   : > { %4248 = vmatmul.mubr.bf16.gmra.mrb[76].mxu1 %v10258_v50  ;;  %6586 = vmatprep.subr.bf16.mxu0 %v8851_v7 }
 0x52a   : > { %4257 = vmatprep.mubr.bf16.mxu1 %v10334_v25  ;;  %6423 = vmatpush1.bf16.msra.mxu1 %v8846_v32 }
 0x52b   : > { %4474 = vmatmul.mubr.bf16.gmra.mrb[140].mxu0 %v10258_v50  ;;  %6424 = vmatprep.subr.bf16.mxu1 %v8854_v6  ;;  %v8864_v50 = vld [vmem:[#allocation8 + $0x120] ss:$16 sps:$4 sm:$0xff]  }
 0x52c   : > { %4483 = vmatprep.mubr.bf16.mxu0 %v10334_v25  ;;  %6587 = vmatpush1.bf16.msra.mxu0 %v8849_v5  ;;  %v8872_v25 = vld [vmem:[#allocation8 + $0x144] ss:$16 sps:$4 sm:$0xff]  }
 0x52d   : > { %6588 = vmatprep.subr.bf16.mxu0 %v8857_v61 }
 0x52e   : > { %6425 = vmatpush1.bf16.msra.mxu1 %v8852_v9 }
 0x52f   : > { %6426 = vmatprep.subr.bf16.mxu1 %v8860_v40 }
 0x530   : > { %6589 = vmatpush1.bf16.msra.mxu0 %v8855_v48 }
 0x531   : > { %4258 = vmatmul.mubr.bf16.gmra.mrb[80].mxu1 %v10326_v63  ;;  %6590 = vmatprep.subr.bf16.mxu0 %v8863_v60 }
 0x532   : > { %4267 = vmatprep.mubr.bf16.mxu1 %v10393_v14  ;;  %6427 = vmatpush1.bf16.msra.mxu1 %v8858_v15 }
 0x533   : > { %4484 = vmatmul.mubr.bf16.gmra.mrb[144].mxu0 %v10326_v63  ;;  %6428 = vmatprep.subr.bf16.mxu1 %v8866_v62  ;;  %v8876_v63 = vld [vmem:[#allocation8 + $0x160] ss:$16 sps:$4 sm:$0xff]  }
 0x534   : > { %4493 = vmatprep.mubr.bf16.mxu0 %v10393_v14  ;;  %6591 = vmatpush1.bf16.msra.mxu0 %v8861_v3  ;;  %v8884_v14 = vld [vmem:[#allocation8 + $0x184] ss:$16 sps:$4 sm:$0xff]  }
 0x535   : > { %6592 = vmatprep.subr.bf16.mxu0 %v8869_v30 }
 0x536   : > { %6429 = vmatpush1.bf16.msra.mxu1 %v8864_v50 }
 0x537   : > { %6430 = vmatprep.subr.bf16.mxu1 %v8872_v25 }
 0x538   : > { %6593 = vmatpush1.bf16.msra.mxu0 %v8867_v19 }
 0x539   : > { %4268 = vmatmul.mubr.bf16.gmra.mrb[84].mxu1 %v10381_v29  ;;  %6594 = vmatprep.subr.bf16.mxu0 %v8875_v53 }
 0x53a   : > { %4277 = vmatprep.mubr.bf16.mxu1 %v10438_v51  ;;  %6431 = vmatpush1.bf16.msra.mxu1 %v8870_v27 }
 0x53b   : > { %4494 = vmatmul.mubr.bf16.gmra.mrb[148].mxu0 %v10381_v29  ;;  %6432 = vmatprep.subr.bf16.mxu1 %v8878_v16  ;;  %v8888_v29 = vld [vmem:[#allocation8 + $0x1a0] ss:$16 sps:$4 sm:$0xff]  }
 0x53c   : > { %4503 = vmatprep.mubr.bf16.mxu0 %v10438_v51  ;;  %6595 = vmatpush1.bf16.msra.mxu0 %v8873_v22  ;;  %v8896_v51 = vld [vmem:[#allocation8 + $0x1c4] ss:$16 sps:$4 sm:$0xff]  }
 0x53d   : > { %6596 = vmatprep.subr.bf16.mxu0 %v8881_v35 }
 0x53e   : > { %6433 = vmatpush1.bf16.msra.mxu1 %v8876_v63 }
 0x53f   : > { %6434 = vmatprep.subr.bf16.mxu1 %v8884_v14 }
 0x540   : > { %6597 = vmatpush1.bf16.msra.mxu0 %v8879_v37 }
 0x541   : > { %4278 = vmatmul.mubr.bf16.gmra.mrb[88].mxu1 %v10430_v58  ;;  %6598 = vmatprep.subr.bf16.mxu0 %v8887_v10 }
 0x542   : > { %4287 = vmatprep.mubr.bf16.mxu1 %v10466_v56  ;;  %6435 = vmatpush1.bf16.msra.mxu1 %v8882_v1 }
 0x543   : > { %4504 = vmatmul.mubr.bf16.gmra.mrb[152].mxu0 %v10430_v58  ;;  %6436 = vmatprep.subr.bf16.mxu1 %v8890_v42  ;;  %v8900_v58 = vld [vmem:[#allocation8 + $0x1e0] ss:$16 sps:$4 sm:$0xff]  }
 0x544   : > { %4513 = vmatprep.mubr.bf16.mxu0 %v10466_v56  ;;  %6599 = vmatpush1.bf16.msra.mxu0 %v8885_v4  ;;  %v8908_v56 = vld [vmem:[#allocation8 + $0x204] ss:$16 sps:$4 sm:$0xff]  }
 0x545   : > { %6600 = vmatprep.subr.bf16.mxu0 %v8893_v2 }
 0x546   : > { %6437 = vmatpush1.bf16.msra.mxu1 %v8888_v29 }
 0x547   : > { %6438 = vmatprep.subr.bf16.mxu1 %v8896_v51 }
 0x548   : > { %6601 = vmatpush1.bf16.msra.mxu0 %v8891_v12 }
 0x549   : > { %4288 = vmatmul.mubr.bf16.gmra.mrb[92].mxu1 %v10462_v41  ;;  %6602 = vmatprep.subr.bf16.mxu0 %v8899_v49 }
 0x54a   : > { %6439 = vmatpush1.bf16.msra.mxu1 %v8894_v33 }
 0x54b   : > { %4514 = vmatmul.mubr.bf16.gmra.mrb[156].mxu0 %v10462_v41  ;;  %6440 = vmatprep.subr.bf16.mxu1 %v8902_v31  ;;  %v11072_v41 = vld [vmem:[#allocation26_spill] sm:$0xff] }
 0x54c   : > { %6603 = vmatpush1.bf16.msra.mxu0 %v8897_v54  ;;  %v10581_v36 = vrot.slane %v10573_v39, %v11072_v41 }
 0x54d   : > { %6604 = vmatprep.subr.bf16.mxu0 %v8905_v43 }
 0x54e   : > { %6441 = vmatpush1.bf16.msra.mxu1 %v8900_v58 }
 0x54f   : > { %6451 = vmatprep.subr.bf16.mxu1 %v8908_v56 }
 0x550   : > { %6605 = vmatpush1.bf16.msra.mxu0 %v8903_v18 }
 0x551   : > { %6615 = vmatprep.subr.bf16.mxu0 %v8911_v44 }
 0x564   : > { %v3767_v24 = vpop.f32.mrb[32].mxu1 }
 0x565   : > { %v8298_v0 = vadd.f32 %v3767_v24, %v10577_v55  ;;  %v3993_v13 = vpop.f32.mrb[96].mxu0  ;;  %v3769_v20 = vpop.f32.mrb[33].mxu1 }
 0x566   : > { %v8330_v59 = vadd.f32 %v3993_v13, %v10581_v36  ;;  %v8299_v17 = vadd.f32 %v3769_v20, %v10585_v8  ;;  %v3995_v28 = vpop.f32.mrb[97].mxu0  ;;  %v3771_v57 = vpop.f32.mrb[34].mxu1 }
 0x567   : > { %v8331_v46 = vadd.f32 %v3995_v28, %v10589_v23  ;;  %v8300_v47 = vadd.f32 %v3771_v57, %v10577_v55  ;;  %v3997_v38 = vpop.f32.mrb[98].mxu0  ;;  %v3773_v52 = vpop.f32.mrb[35].mxu1  ;;  %v4524_v32 = vmax.f32 %v8298_v0, 0.0 }
 0x568   : > { %v8332_v11 = vadd.f32 %v3997_v38, %v10581_v36  ;;  %v8301_v26 = vadd.f32 %v3773_v52, %v10585_v8  ;;  %v3999_v7 = vpop.f32.mrb[99].mxu0  ;;  %v4526_v61 = vmax.f32 %v8330_v59, 0.0  ;;  %v4525_v9 = vmax.f32 %v8299_v17, 0.0 }
 0x569   : > { %v4532_v6 = vmax.f32 %v8300_v47, 0.0  ;;  %v8333_v5 = vadd.f32 %v3999_v7, %v10589_v23  ;;  %v4527_v60 = vmax.f32 %v8331_v46, 0.0 }
 0x56a   : > { %v4534_v40 = vmax.f32 %v8332_v11, 0.0  ;;  %v4533_v48 = vmax.f32 %v8301_v26, 0.0 }
 0x56b   : > { %v10599_v15 = vpack.c.bf16 %v4532_v6, %v4524_v32  ;;  %v4535_v62 = vmax.f32 %v8333_v5, 0.0 }
 0x56c   : > { %v10601_v3 = vpack.c.bf16 %v4534_v40, %v4526_v61  ;;  %v10603_v30 = vpack.c.bf16 %v4533_v48, %v4525_v9  ;;  %v3777_v50 = vpop.f32.mrb[36].mxu1 }
 0x56d   : > { %v10605_v25 = vpack.c.bf16 %v4535_v62, %v4527_v60  ;;  %v8302_v19 = vadd.f32 %v3777_v50, %v10577_v55  ;;  %v4003_v53 = vpop.f32.mrb[100].mxu0  ;;  %v3779_v27 = vpop.f32.mrb[37].mxu1 }
 0x56e   : > { %v8334_v16 = vadd.f32 %v4003_v53, %v10581_v36  ;;  %v8303_v22 = vadd.f32 %v3779_v27, %v10585_v8  ;;  %v4005_v35 = vpop.f32.mrb[101].mxu0  ;;  %v3781_v63 = vpop.f32.mrb[38].mxu1 }
 0x56f   : > { %v8335_v14 = vadd.f32 %v4005_v35, %v10589_v23  ;;  %v8304_v37 = vadd.f32 %v3781_v63, %v10577_v55  ;;  %v4007_v10 = vpop.f32.mrb[102].mxu0  ;;  %v3783_v1 = vpop.f32.mrb[39].mxu1  ;;  %v4540_v29 = vmax.f32 %v8302_v19, 0.0 }
 0x570   : > { %v8336_v42 = vadd.f32 %v4007_v10, %v10581_v36  ;;  %v8305_v4 = vadd.f32 %v3783_v1, %v10585_v8  ;;  %v4009_v2 = vpop.f32.mrb[103].mxu0  ;;  %v4542_v49 = vmax.f32 %v8334_v16, 0.0  ;;  %v4541_v33 = vmax.f32 %v8303_v22, 0.0 }
 0x571   : > { %v4548_v51 = vmax.f32 %v8304_v37, 0.0  ;;  %v8337_v12 = vadd.f32 %v4009_v2, %v10589_v23  ;;  %v4543_v43 = vmax.f32 %v8335_v14, 0.0 }
 0x572   : > { %v4550_v31 = vmax.f32 %v8336_v42, 0.0  ;;  %v4549_v54 = vmax.f32 %v8305_v4, 0.0 }
 0x573   : > { %v4660_v58 = vpack.c.bf16 %v4548_v51, %v4540_v29  ;;  %v4551_v56 = vmax.f32 %v8337_v12, 0.0 }
 0x574   : > { %v4662_v18 = vpack.c.bf16 %v4550_v31, %v4542_v49  ;;  %v4661_v44 = vpack.c.bf16 %v4549_v54, %v4541_v33  ;;  %v3787_v24 = vpop.f32.mrb[40].mxu1 }
 0x575   : > { %v4716_v0 = vmax.bf16 %v4660_v58, %v10599_v15  ;;  %v4663_v13 = vpack.c.bf16 %v4551_v56, %v4543_v43  ;;  %v8306_v20 = vadd.f32 %v3787_v24, %v10577_v55  ;;  %v4013_v59 = vpop.f32.mrb[104].mxu0  ;;  %v3789_v17 = vpop.f32.mrb[41].mxu1 }
 0x576   : > { %v4750_v28 = vmax.bf16 %v4662_v18, %v10601_v3  ;;  %v4733_v57 = vmax.bf16 %v4661_v44, %v10603_v30  ;;  %v8338_v46 = vadd.f32 %v4013_v59, %v10581_v36  ;;  %v8307_v47 = vadd.f32 %v3789_v17, %v10585_v8  ;;  %v4015_v38 = vpop.f32.mrb[105].mxu0  ;;  %v3791_v52 = vpop.f32.mrb[42].mxu1 }
 0x577   : > { %v4767_v11 = vmax.bf16 %v4663_v13, %v10605_v25  ;;  %v8339_v26 = vadd.f32 %v4015_v38, %v10589_v23  ;;  %v8308_v7 = vadd.f32 %v3791_v52, %v10577_v55  ;;  %v4017_v32 = vpop.f32.mrb[106].mxu0  ;;  %v3793_v6 = vpop.f32.mrb[43].mxu1  ;;  %v4556_v40 = vmax.f32 %v8306_v20, 0.0 }
 0x578   : > { %v8340_v5 = vadd.f32 %v4017_v32, %v10581_v36  ;;  %v8309_v61 = vadd.f32 %v3793_v6, %v10585_v8  ;;  %v4019_v9 = vpop.f32.mrb[107].mxu0  ;;  %v4558_v15 = vmax.f32 %v8338_v46, 0.0  ;;  %v4557_v62 = vmax.f32 %v8307_v47, 0.0 }
 0x579   : > { %v4564_v48 = vmax.f32 %v8308_v7, 0.0  ;;  %v8341_v60 = vadd.f32 %v4019_v9, %v10589_v23  ;;  %v4559_v50 = vmax.f32 %v8339_v26, 0.0 }
 0x57a   : > { %v4566_v3 = vmax.f32 %v8340_v5, 0.0  ;;  %v4565_v30 = vmax.f32 %v8309_v61, 0.0 }
 0x57b   : > { %v4668_v25 = vpack.c.bf16 %v4564_v48, %v4556_v40  ;;  %v4567_v19 = vmax.f32 %v8341_v60, 0.0 }
 0x57c   : > { %v4670_v53 = vpack.c.bf16 %v4566_v3, %v4558_v15  ;;  %v4669_v27 = vpack.c.bf16 %v4565_v30, %v4557_v62  ;;  %v3797_v16 = vpop.f32.mrb[44].mxu1 }
 0x57d   : > { %v10627_v22 = vmax.bf16 %v4716_v0, %v4668_v25  ;;  %v4671_v35 = vpack.c.bf16 %v4567_v19, %v4559_v50  ;;  %v8310_v63 = vadd.f32 %v3797_v16, %v10577_v55  ;;  %v4023_v14 = vpop.f32.mrb[108].mxu0  ;;  %v3799_v37 = vpop.f32.mrb[45].mxu1 }
 0x57e   : > { %v10630_v10 = vmax.bf16 %v4750_v28, %v4670_v53  ;;  %v10632_v1 = vmax.bf16 %v4733_v57, %v4669_v27  ;;  %v8342_v42 = vadd.f32 %v4023_v14, %v10581_v36  ;;  %v8311_v4 = vadd.f32 %v3799_v37, %v10585_v8  ;;  %v4025_v2 = vpop.f32.mrb[109].mxu0  ;;  %v3801_v29 = vpop.f32.mrb[46].mxu1 }
 0x57f   : > { %v10636_v51 = vmax.bf16 %v4767_v11, %v4671_v35  ;;  %v8343_v12 = vadd.f32 %v4025_v2, %v10589_v23  ;;  %v8312_v49 = vadd.f32 %v3801_v29, %v10577_v55  ;;  %v4027_v33 = vpop.f32.mrb[110].mxu0  ;;  %v3803_v31 = vpop.f32.mrb[47].mxu1  ;;  %v4572_v56 = vmax.f32 %v8310_v63, 0.0 }
 0x580   : > { %v8344_v54 = vadd.f32 %v4027_v33, %v10581_v36  ;;  %v8313_v43 = vadd.f32 %v3803_v31, %v10585_v8  ;;  %v4029_v58 = vpop.f32.mrb[111].mxu0  ;;  %v4574_v24 = vmax.f32 %v8342_v42, 0.0  ;;  %v4573_v0 = vmax.f32 %v8311_v4, 0.0 }
 0x581   : > { %v4580_v18 = vmax.f32 %v8312_v49, 0.0  ;;  %v8345_v44 = vadd.f32 %v4029_v58, %v10589_v23  ;;  %v4575_v59 = vmax.f32 %v8343_v12, 0.0 }
 0x582   : > { %v4582_v13 = vmax.f32 %v8344_v54, 0.0  ;;  %v4581_v20 = vmax.f32 %v8313_v43, 0.0 }
 0x583   : > { %v4676_v17 = vpack.c.bf16 %v4580_v18, %v4572_v56  ;;  %v4583_v28 = vmax.f32 %v8345_v44, 0.0 }
 0x584   : > { %v4678_v57 = vpack.c.bf16 %v4582_v13, %v4574_v24  ;;  %v4677_v46 = vpack.c.bf16 %v4581_v20, %v4573_v0  ;;  %v3807_v47 = vpop.f32.mrb[48].mxu1 }
 0x585   : > { %v4718_v38 = vmax.bf16 %v10627_v22, %v4676_v17  ;;  %v4679_v52 = vpack.c.bf16 %v4583_v28, %v4575_v59  ;;  %v8314_v11 = vadd.f32 %v3807_v47, %v10577_v55  ;;  %v4033_v26 = vpop.f32.mrb[112].mxu0  ;;  %v3809_v7 = vpop.f32.mrb[49].mxu1 }
 0x586   : > { %v4752_v32 = vmax.bf16 %v10630_v10, %v4678_v57  ;;  %v4735_v6 = vmax.bf16 %v10632_v1, %v4677_v46  ;;  %v8346_v5 = vadd.f32 %v4033_v26, %v10581_v36  ;;  %v8315_v61 = vadd.f32 %v3809_v7, %v10585_v8  ;;  %v4035_v9 = vpop.f32.mrb[113].mxu0  ;;  %v3811_v40 = vpop.f32.mrb[50].mxu1 }
 0x587   : > { %v4769_v48 = vmax.bf16 %v10636_v51, %v4679_v52  ;;  %v8347_v60 = vadd.f32 %v4035_v9, %v10589_v23  ;;  %v8316_v15 = vadd.f32 %v3811_v40, %v10577_v55  ;;  %v4037_v62 = vpop.f32.mrb[114].mxu0  ;;  %v3813_v3 = vpop.f32.mrb[51].mxu1  ;;  %v4588_v19 = vmax.f32 %v8314_v11, 0.0 }
 0x588   : > { %v8348_v30 = vadd.f32 %v4037_v62, %v10581_v36  ;;  %v8317_v50 = vadd.f32 %v3813_v3, %v10585_v8  ;;  %v4039_v25 = vpop.f32.mrb[115].mxu0  ;;  %v4590_v16 = vmax.f32 %v8346_v5, 0.0  ;;  %v4589_v22 = vmax.f32 %v8315_v61, 0.0 }
 0x589   : > { %v4596_v53 = vmax.f32 %v8316_v15, 0.0  ;;  %v8349_v27 = vadd.f32 %v4039_v25, %v10589_v23  ;;  %v4591_v14 = vmax.f32 %v8347_v60, 0.0 }
 0x58a   : > { %v4598_v35 = vmax.f32 %v8348_v30, 0.0  ;;  %v4597_v63 = vmax.f32 %v8317_v50, 0.0 }
 0x58b   : > { %v4684_v37 = vpack.c.bf16 %v4596_v53, %v4588_v19  ;;  %v4599_v10 = vmax.f32 %v8349_v27, 0.0 }
 0x58c   : > { %v4686_v1 = vpack.c.bf16 %v4598_v35, %v4590_v16  ;;  %v4685_v42 = vpack.c.bf16 %v4597_v63, %v4589_v22  ;;  %v3817_v4 = vpop.f32.mrb[52].mxu1 }
 0x58d   : > { %v10655_v2 = vmax.bf16 %v4718_v38, %v4684_v37  ;;  %v4687_v29 = vpack.c.bf16 %v4599_v10, %v4591_v14  ;;  %v8318_v51 = vadd.f32 %v3817_v4, %v10577_v55  ;;  %v4043_v12 = vpop.f32.mrb[116].mxu0  ;;  %v3819_v49 = vpop.f32.mrb[53].mxu1 }
 0x58e   : > { %v10658_v33 = vmax.bf16 %v4752_v32, %v4686_v1  ;;  %v10660_v31 = vmax.bf16 %v4735_v6, %v4685_v42  ;;  %v8350_v54 = vadd.f32 %v4043_v12, %v10581_v36  ;;  %v8319_v43 = vadd.f32 %v3819_v49, %v10585_v8  ;;  %v4045_v58 = vpop.f32.mrb[117].mxu0  ;;  %v3821_v56 = vpop.f32.mrb[54].mxu1 }
 0x58f   : > { %v10664_v18 = vmax.bf16 %v4769_v48, %v4687_v29  ;;  %v8351_v44 = vadd.f32 %v4045_v58, %v10589_v23  ;;  %v8320_v24 = vadd.f32 %v3821_v56, %v10577_v55  ;;  %v4047_v0 = vpop.f32.mrb[118].mxu0  ;;  %v3823_v13 = vpop.f32.mrb[55].mxu1  ;;  %v4604_v28 = vmax.f32 %v8318_v51, 0.0 }
 0x590   : > { %v8352_v20 = vadd.f32 %v4047_v0, %v10581_v36  ;;  %v8321_v59 = vadd.f32 %v3823_v13, %v10585_v8  ;;  %v4049_v17 = vpop.f32.mrb[119].mxu0  ;;  %v4606_v47 = vmax.f32 %v8350_v54, 0.0  ;;  %v4605_v38 = vmax.f32 %v8319_v43, 0.0 }
 0x591   : > { %v4612_v57 = vmax.f32 %v8320_v24, 0.0  ;;  %v8353_v46 = vadd.f32 %v4049_v17, %v10589_v23  ;;  %v4607_v26 = vmax.f32 %v8351_v44, 0.0 }
 0x592   : > { %v4614_v52 = vmax.f32 %v8352_v20, 0.0  ;;  %v4613_v11 = vmax.f32 %v8321_v59, 0.0 }
 0x593   : > { %v4692_v7 = vpack.c.bf16 %v4612_v57, %v4604_v28  ;;  %v4615_v32 = vmax.f32 %v8353_v46, 0.0 }
 0x594   : > { %v4694_v6 = vpack.c.bf16 %v4614_v52, %v4606_v47  ;;  %v4693_v5 = vpack.c.bf16 %v4613_v11, %v4605_v38  ;;  %v3827_v61 = vpop.f32.mrb[56].mxu1 }
 0x595   : > { %v4720_v9 = vmax.bf16 %v10655_v2, %v4692_v7  ;;  %v4695_v40 = vpack.c.bf16 %v4615_v32, %v4607_v26  ;;  %v8322_v48 = vadd.f32 %v3827_v61, %v10577_v55  ;;  %v4053_v60 = vpop.f32.mrb[120].mxu0  ;;  %v3829_v15 = vpop.f32.mrb[57].mxu1 }
 0x596   : > { %v4754_v62 = vmax.bf16 %v10658_v33, %v4694_v6  ;;  %v4737_v3 = vmax.bf16 %v10660_v31, %v4693_v5  ;;  %v8354_v30 = vadd.f32 %v4053_v60, %v10581_v36  ;;  %v8323_v50 = vadd.f32 %v3829_v15, %v10585_v8  ;;  %v4055_v25 = vpop.f32.mrb[121].mxu0  ;;  %v3831_v19 = vpop.f32.mrb[58].mxu1 }
 0x597   : > { %v4771_v53 = vmax.bf16 %v10664_v18, %v4695_v40  ;;  %v8355_v27 = vadd.f32 %v4055_v25, %v10589_v23  ;;  %v8324_v16 = vadd.f32 %v3831_v19, %v10577_v55  ;;  %v4057_v22 = vpop.f32.mrb[122].mxu0  ;;  %v3833_v35 = vpop.f32.mrb[59].mxu1  ;;  %v4620_v10 = vmax.f32 %v8322_v48, 0.0 }
 0x598   : > { %v8356_v63 = vadd.f32 %v4057_v22, %v10581_v36  ;;  %v8325_v14 = vadd.f32 %v3833_v35, %v10585_v8  ;;  %v4059_v37 = vpop.f32.mrb[123].mxu0  ;;  %v4622_v4 = vmax.f32 %v8354_v30, 0.0  ;;  %v4621_v2 = vmax.f32 %v8323_v50, 0.0 }
 0x599   : > { %v4628_v1 = vmax.f32 %v8324_v16, 0.0  ;;  %v8357_v42 = vadd.f32 %v4059_v37, %v10589_v23  ;;  %v4623_v12 = vmax.f32 %v8355_v27, 0.0 }
 0x59a   : > { %v4630_v29 = vmax.f32 %v8356_v63, 0.0  ;;  %v4629_v51 = vmax.f32 %v8325_v14, 0.0 }
 0x59b   : > { %v4700_v49 = vpack.c.bf16 %v4628_v1, %v4620_v10  ;;  %v4631_v33 = vmax.f32 %v8357_v42, 0.0 }
 0x59c   : > { %v4702_v31 = vpack.c.bf16 %v4630_v29, %v4622_v4  ;;  %v4701_v54 = vpack.c.bf16 %v4629_v51, %v4621_v2  ;;  %v3837_v43 = vpop.f32.mrb[60].mxu1 }
 0x59d   : > { %v4721_v58 = vmax.bf16 %v4720_v9, %v4700_v49  ;;  %v4703_v56 = vpack.c.bf16 %v4631_v33, %v4623_v12  ;;  %v8326_v18 = vadd.f32 %v3837_v43, %v10577_v55  ;;  %v4063_v44 = vpop.f32.mrb[124].mxu0  ;;  %v3839_v24 = vpop.f32.mrb[61].mxu1 }
 0x59e   : > { %v4755_v0 = vmax.bf16 %v4754_v62, %v4702_v31  ;;  %v4738_v13 = vmax.bf16 %v4737_v3, %v4701_v54  ;;  %v8358_v20 = vadd.f32 %v4063_v44, %v10581_v36  ;;  %v8327_v59 = vadd.f32 %v3839_v24, %v10585_v8  ;;  %v4065_v17 = vpop.f32.mrb[125].mxu0  ;;  %v3841_v28 = vpop.f32.mrb[62].mxu1 }
 0x59f   : > { %v4772_v57 = vmax.bf16 %v4771_v53, %v4703_v56  ;;  %v8359_v46 = vadd.f32 %v4065_v17, %v10589_v23  ;;  %v8328_v47 = vadd.f32 %v3841_v28, %v10577_v55  ;;  %v4067_v38 = vpop.f32.mrb[126].mxu0  ;;  %v3843_v52 = vpop.f32.mrb[63].mxu1  ;;  %v4636_v32 = vmax.f32 %v8326_v18, 0.0  ;;  %v8917_v17 = vld [vmem:[#allocation8 + $0x22c] ss:$16 sps:$4 sm:$0xff]  }
 0x5a0   : > { %v8360_v11 = vadd.f32 %v4067_v38, %v10581_v36  ;;  %v8329_v26 = vadd.f32 %v3843_v52, %v10585_v8  ;;  %v4069_v7 = vpop.f32.mrb[127].mxu0  ;;  %v4638_v61 = vmax.f32 %v8358_v20, 0.0  ;;  %v4637_v9 = vmax.f32 %v8327_v59, 0.0  ;;  %v8914_v59 = vld [vmem:[#allocation8 + $0x224] ss:$16 sps:$4 sm:$0xff]  }
 0x5a1   : > { %v4644_v6 = vmax.f32 %v8328_v47, 0.0  ;;  %v8361_v5 = vadd.f32 %v4069_v7, %v10589_v23  ;;  %v4639_v60 = vmax.f32 %v8359_v46, 0.0  ;;  %v8915_v46 = vld [vmem:[#allocation8 + $0x228] ss:$16 sps:$4 sm:$0xff]   ;;  %v8920_v47 = vld [vmem:[#allocation8 + $0x244] ss:$16 sps:$4 sm:$0xff]  }
 0x5a2   : > { %v4646_v40 = vmax.f32 %v8360_v11, 0.0  ;;  %v4645_v48 = vmax.f32 %v8329_v26, 0.0  ;;  %v8923_v38 = vld [vmem:[#allocation8 + $0x24c] ss:$16 sps:$4 sm:$0xff]   ;;  %v8918_v52 = vld [vmem:[#allocation8 + $0x240] ss:$16 sps:$4 sm:$0xff]  }
 0x5a3   : > { %v4708_v15 = vpack.c.bf16 %v4644_v6, %v4636_v32  ;;  %v4647_v62 = vmax.f32 %v8361_v5, 0.0  ;;  %v8921_v11 = vld [vmem:[#allocation8 + $0x248] ss:$16 sps:$4 sm:$0xff]   ;;  %v8926_v26 = vld [vmem:[#allocation8 + $0x264] ss:$16 sps:$4 sm:$0xff]  }
 0x5a4   : > { %v4710_v3 = vpack.c.bf16 %v4646_v40, %v4638_v61  ;;  %v4709_v55 = vpack.c.bf16 %v4645_v48, %v4637_v9  ;;  %v8929_v7 = vld [vmem:[#allocation8 + $0x26c] ss:$16 sps:$4 sm:$0xff]   ;;  %v8924_v32 = vld [vmem:[#allocation8 + $0x260] ss:$16 sps:$4 sm:$0xff]   ;;  %v8927_v6 = vld [vmem:[#allocation8 + $0x268] ss:$16 sps:$4 sm:$0xff]  }
 0x5a5   : > { %v4722_v30 = vmax.bf16 %v4721_v58, %v4708_v15  ;;  %v4711_v50 = vpack.c.bf16 %v4647_v62, %v4639_v60  ;;  %v8932_v5 = vld [vmem:[#allocation8 + $0x284] ss:$16 sps:$4 sm:$0xff]   ;;  %v8935_v61 = vld [vmem:[#allocation8 + $0x28c] ss:$16 sps:$4 sm:$0xff]   ;;  %v8930_v9 = vld [vmem:[#allocation8 + $0x280] ss:$16 sps:$4 sm:$0xff]  }
 0x5a6   : > { %v10691_v25 = vmax.bf16 %v4755_v0, %v4710_v3  ;;  %v4739_v36 = vmax.bf16 %v4738_v13, %v4709_v55  ;;  %v8906_v0 = vld [vmem:[#allocation8 + $0x200] ss:$16 sps:$4 sm:$0xff]   ;;  %v8909_v13 = vld [vmem:[#allocation8 + $0x208] ss:$16 sps:$4 sm:$0xff]   ;;  %v8938_v48 = vld [vmem:[#allocation8 + $0x2a4] ss:$16 sps:$4 sm:$0xff]  }
 0x5a7   : > { %v4723_v8 = vunpack.i.l.bf16 %v4722_v30  ;;  %v4724_v19 = vunpack.i.h.bf16 %v4722_v30  ;;  %v4773_v53 = vmax.bf16 %v4772_v57, %v4711_v50  ;;  %v8912_v57 = vld [vmem:[#allocation8 + $0x220] ss:$16 sps:$4 sm:$0xff]   ;;  %v8933_v40 = vld [vmem:[#allocation8 + $0x288] ss:$16 sps:$4 sm:$0xff]   ;;  %v8941_v60 = vld [vmem:[#allocation8 + $0x2ac] ss:$16 sps:$4 sm:$0xff]  }
 0x5a8   : > { %v4740_v27 = vunpack.i.l.bf16 %v4739_v36  ;;  %v4741_v16 = vunpack.i.h.bf16 %v4739_v36  ;;  %v8936_v15 = vld [vmem:[#allocation8 + $0x2a0] ss:$16 sps:$4 sm:$0xff]   ;;  %v8939_v62 = vld [vmem:[#allocation8 + $0x2a8] ss:$16 sps:$4 sm:$0xff]   ;;  %v8944_v3 = vld [vmem:[#allocation8 + $0x2c4] ss:$16 sps:$4 sm:$0xff]  }
 0x5a9   : > { %v4725_v23 = vmax.f32 %v4723_v8, %v4724_v19  ;;  %v4774_v22 = vunpack.i.l.bf16 %v4773_v53  ;;  %v4775_v35 = vunpack.i.h.bf16 %v4773_v53  ;;  %v8947_v55 = vld [vmem:[#allocation8 + $0x2cc] ss:$16 sps:$4 sm:$0xff]   ;;  %v8942_v30 = vld [vmem:[#allocation8 + $0x2c0] ss:$16 sps:$4 sm:$0xff]   ;;  %v8945_v50 = vld [vmem:[#allocation8 + $0x2c8] ss:$16 sps:$4 sm:$0xff]  }
 0x5aa   : > { %v4742_v63 = vmax.f32 %v4740_v27, %v4741_v16  ;;  %v8950_v36 = vld [vmem:[#allocation8 + $0x2e4] ss:$16 sps:$4 sm:$0xff]   ;;  %v8953_v8 = vld [vmem:[#allocation8 + $0x2ec] ss:$16 sps:$4 sm:$0xff]   ;;  %v8948_v19 = vld [vmem:[#allocation8 + $0x2e0] ss:$16 sps:$4 sm:$0xff]  }
 0x5ab   : > { %v4726_v14 = vrot.slane %v4725_v23, 4  ;;  %v4776_v37 = vmax.f32 %v4774_v22, %v4775_v35  ;;  %v8951_v53 = vld [vmem:[#allocation8 + $0x2e8] ss:$16 sps:$4 sm:$0xff]   ;;  %v8956_v27 = vld [vmem:[#allocation8 + $0x304] ss:$16 sps:$4 sm:$0xff]   ;;  %v4758_v22 = vunpack.i.h.bf16 %v10691_v25 }
 0x5ac   : > { %v4743_v10 = vrot.slane %v4742_v63, 4  ;;  %v8959_v16 = vld [vmem:[#allocation8 + $0x30c] ss:$16 sps:$4 sm:$0xff]   ;;  %v8954_v35 = vld [vmem:[#allocation8 + $0x300] ss:$16 sps:$4 sm:$0xff]  }
 0x5ad   : > { %v4727_v1 = vmax.f32 %v4725_v23, %v4726_v14  ;;  %v4777_v42 = vrot.slane %v4776_v37, 4  ;;  %v4757_v23 = vunpack.i.l.bf16 %v10691_v25  ;;  %v8962_v14 = vld [vmem:[#allocation8 + $0x324] ss:$16 sps:$4 sm:$0xff]  }
 0x5ae   : > { %v4744_v4 = vmax.f32 %v4742_v63, %v4743_v10  ;;  %v8957_v63 = vld [vmem:[#allocation8 + $0x308] ss:$16 sps:$4 sm:$0xff]  }
 0x5af   : > { %v4728_v2 = vrot.slane %v4727_v1, 2  ;;  %v4778_v29 = vmax.f32 %v4776_v37, %v4777_v42  ;;  %v8965_v37 = vld [vmem:[#allocation8 + $0x32c] ss:$16 sps:$4 sm:$0xff]   ;;  %v4759_v10 = vmax.f32 %v4757_v23, %v4758_v22  ;;  %v8963_v42 = vld [vmem:[#allocation8 + $0x328] ss:$16 sps:$4 sm:$0xff]  }
 0x5b0   : > { %v4745_v51 = vrot.slane %v4744_v4, 2 }
 0x5b1   : > { %v4729_v12 = vmax.f32 %v4727_v1, %v4728_v2  ;;  %v4779_v49 = vrot.slane %v4778_v29, 2  ;;  %v8960_v1 = vld [vmem:[#allocation8 + $0x320] ss:$16 sps:$4 sm:$0xff]   ;;  %v8971_v2 = vld [vmem:[#allocation8 + $0x34c] ss:$16 sps:$4 sm:$0xff]  }
 0x5b2   : > { %v4746_v33 = vmax.f32 %v4744_v4, %v4745_v51  ;;  %v8968_v4 = vld [vmem:[#allocation8 + $0x344] ss:$16 sps:$4 sm:$0xff]  }
 0x5b3   : > { %v4730_v31 = vrot.slane %v4729_v12, 1  ;;  %v4780_v54 = vmax.f32 %v4778_v29, %v4779_v49  ;;  %v11075_v29 = vld [vmem:[#allocation24_spill] sm:$0xff]  ;;  %v4760_v49 = vrot.slane %v4759_v10, 4 }
 0x5b4   : > { %v4747_v43 = vrot.slane %v4746_v33, 1  ;;  %v2318_v51 = vsub.s32 4, %v11075_v29  ;;  %v2322_v25 = vsub.s32 5, %v11075_v29 }
 0x5b5   : > { %v4731_v58 = vmax.f32 %v4729_v12, %v4730_v31  ;;  %v4781_v56 = vrot.slane %v4780_v54, 1  ;;  %v2326_v12 = vsub.s32 6, %v11075_v29  ;;  %v8969_v31 = vld [vmem:[#allocation8 + $0x348] ss:$16 sps:$4 sm:$0xff]  }
 0x5b6   : > { %v4748_v18 = vmax.f32 %v4746_v33, %v4747_v43  ;;  %v8966_v33 = vld [vmem:[#allocation8 + $0x340] ss:$16 sps:$4 sm:$0xff]   ;;  %v10700_v43 = vrot.slane %v10573_v39, %v2318_v51 }
 0x5b7   : > { %v4782_v44 = vmax.f32 %v4780_v54, %v4781_v56  ;;  %v4732_v20 = vpack.i.bf16 %v4731_v58, %v4731_v58  ;;  %v2330_v54 = vsub.s32 7, %v11075_v29  ;;  %v8974_v58 = vld [vmem:[#allocation8 + $0x364] ss:$16 sps:$4 sm:$0xff]   ;;  %v8977_v56 = vld [vmem:[#allocation8 + $0x36c] ss:$16 sps:$4 sm:$0xff]  }
 0x5b8   : > { %v4749_v24 = vpack.i.bf16 %v4748_v18, %v4748_v18  ;;  %v10703_v18 = vrot.slane %v10573_v39, %v2322_v25 }
 0x5b9   : > { %v4783_v28 = vpack.i.bf16 %v4782_v44, %v4782_v44  ;;  %v10706_v44 = vrot.slane %v10573_v39, %v2326_v12 }
 0x5ba   : > { %6442 = vmatprep.mubr.bf16.mxu1 %v4749_v24  ;;  %6606 = vmatprep.mubr.bf16.mxu0 %v4749_v24  ;;  %v4761_v24 = vmax.f32 %v4759_v10, %v4760_v49 }
 0x5bb   : > { %6443 = vmatmul.mubr.bf16.vlgmr.msra.gmra.mrb[96].mxu1 %v4732_v20  ;;  %6607 = vmatmul.mubr.bf16.vlgmr.msra.gmra.mrb[160].mxu0 %v4732_v20  ;;  %v8972_v20 = vld [vmem:[#allocation8 + $0x360] ss:$16 sps:$4 sm:$0xff]  }
 0x5bc   : > { %6452 = vmatpush1.bf16.msra.mxu1 %v8906_v0  ;;  %6616 = vmatpush1.bf16.msra.mxu0 %v8909_v13  ;;  %v10709_v13 = vrot.slane %v10573_v39, %v2330_v54  ;;  %v8990_v54 = vld [vmem:[#allocation8 + $0x3c0] ss:$16 sps:$4 sm:$0xff]  }
 0x5bd   : > { %6483 = vmatprep.mubr.bf16.mxu1 %v4783_v28  ;;  %6647 = vmatprep.mubr.bf16.mxu0 %v4783_v28 }
 0x5be   : > { %6453 = vmatprep.subr.bf16.mxu1 %v8914_v59  ;;  %6617 = vmatprep.subr.bf16.mxu0 %v8917_v17  ;;  %v8975_v59 = vld [vmem:[#allocation8 + $0x368] ss:$16 sps:$4 sm:$0xff]  }
 0x5c0   : > { %6454 = vmatpush1.bf16.msra.mxu1 %v8912_v57  ;;  %6618 = vmatpush1.bf16.msra.mxu0 %v8915_v46  ;;  %v8980_v57 = vld [vmem:[#allocation8 + $0x384] ss:$16 sps:$4 sm:$0xff]   ;;  %v8983_v46 = vld [vmem:[#allocation8 + $0x38c] ss:$16 sps:$4 sm:$0xff]  }
 0x5c1   : > { %6455 = vmatprep.subr.bf16.mxu1 %v8920_v47  ;;  %6619 = vmatprep.subr.bf16.mxu0 %v8923_v38 }
 0x5c4   : > { %6456 = vmatpush1.bf16.msra.mxu1 %v8918_v52  ;;  %6620 = vmatpush1.bf16.msra.mxu0 %v8921_v11 }
 0x5c5   : > { %6457 = vmatprep.subr.bf16.mxu1 %v8926_v26  ;;  %6621 = vmatprep.subr.bf16.mxu0 %v8929_v7 }
 0x5c8   : > { %6458 = vmatpush1.bf16.msra.mxu1 %v8924_v32  ;;  %6622 = vmatpush1.bf16.msra.mxu0 %v8927_v6  ;;  %v8978_v32 = vld [vmem:[#allocation8 + $0x380] ss:$16 sps:$4 sm:$0xff]  }
 0x5c9   : > { %6459 = vmatprep.subr.bf16.mxu1 %v8932_v5  ;;  %6623 = vmatprep.subr.bf16.mxu0 %v8935_v61 }
 0x5cc   : > { %6460 = vmatpush1.bf16.msra.mxu1 %v8930_v9  ;;  %6624 = vmatpush1.bf16.msra.mxu0 %v8933_v40  ;;  %v8981_v9 = vld [vmem:[#allocation8 + $0x388] ss:$16 sps:$4 sm:$0xff]   ;;  %v8986_v40 = vld [vmem:[#allocation8 + $0x3a4] ss:$16 sps:$4 sm:$0xff]  }
 0x5cd   : > { %6461 = vmatprep.subr.bf16.mxu1 %v8938_v48  ;;  %6625 = vmatprep.subr.bf16.mxu0 %v8941_v60  ;;  %v4762_v48 = vrot.slane %v4761_v24, 2 }
 0x5d0   : > { %6462 = vmatpush1.bf16.msra.mxu1 %v8936_v15  ;;  %6626 = vmatpush1.bf16.msra.mxu0 %v8939_v62 }
 0x5d1   : > { %6463 = vmatprep.subr.bf16.mxu1 %v8944_v3  ;;  %6627 = vmatprep.subr.bf16.mxu0 %v8947_v55  ;;  %v8989_v55 = vld [vmem:[#allocation8 + $0x3ac] ss:$16 sps:$4 sm:$0xff]  }
 0x5d4   : > { %6464 = vmatpush1.bf16.msra.mxu1 %v8942_v30  ;;  %6628 = vmatpush1.bf16.msra.mxu0 %v8945_v50 }
 0x5d5   : > { %6465 = vmatprep.subr.bf16.mxu1 %v8950_v36  ;;  %6629 = vmatprep.subr.bf16.mxu0 %v8953_v8 }
 0x5d8   : > { %6466 = vmatpush1.bf16.msra.mxu1 %v8948_v19  ;;  %6630 = vmatpush1.bf16.msra.mxu0 %v8951_v53 }
 0x5d9   : > { %6467 = vmatprep.subr.bf16.mxu1 %v8956_v27  ;;  %6631 = vmatprep.subr.bf16.mxu0 %v8959_v16  ;;  %v8984_v27 = vld [vmem:[#allocation8 + $0x3a0] ss:$16 sps:$4 sm:$0xff]  }
 0x5dc   : > { %6468 = vmatpush1.bf16.msra.mxu1 %v8954_v35  ;;  %6632 = vmatpush1.bf16.msra.mxu0 %v8957_v63  ;;  %v8987_v63 = vld [vmem:[#allocation8 + $0x3a8] ss:$16 sps:$4 sm:$0xff]  }
 0x5dd   : > { %6469 = vmatprep.subr.bf16.mxu1 %v8962_v14  ;;  %6633 = vmatprep.subr.bf16.mxu0 %v8965_v37  ;;  %v4763_v14 = vmax.f32 %v4761_v24, %v4762_v48 }
 0x5e0   : > { %6470 = vmatpush1.bf16.msra.mxu1 %v8960_v1  ;;  %6634 = vmatpush1.bf16.msra.mxu0 %v8963_v42  ;;  %v8992_v42 = vld [vmem:[#allocation8 + $0x3c4] ss:$16 sps:$4 sm:$0xff]  }
 0x5e1   : > { %6471 = vmatprep.subr.bf16.mxu1 %v8968_v4  ;;  %6635 = vmatprep.subr.bf16.mxu0 %v8971_v2  ;;  %v8995_v4 = vld [vmem:[#allocation8 + $0x3cc] ss:$16 sps:$4 sm:$0xff]  }
 0x5e4   : > { %6472 = vmatpush1.bf16.msra.mxu1 %v8966_v33  ;;  %6636 = vmatpush1.bf16.msra.mxu0 %v8969_v31  ;;  %v4219_v0 = vpop.f32.mrb[64].mxu1 }
 0x5e5   : > { %v8362_v17 = vadd.f32 %v4219_v0, %v10700_v43  ;;  %v4221_v28 = vpop.f32.mrb[65].mxu1  ;;  %6473 = vmatprep.subr.bf16.mxu1 %v8974_v58  ;;  %6637 = vmatprep.subr.bf16.mxu0 %v8977_v56  ;;  %v8993_v0 = vld [vmem:[#allocation8 + $0x3c8] ss:$16 sps:$4 sm:$0xff]  }
 0x5e6   : > { %v4445_v47 = vpop.f32.mrb[128].mxu0  ;;  %v8363_v38 = vadd.f32 %v4221_v28, %v10703_v18  ;;  %v4223_v52 = vpop.f32.mrb[66].mxu1 }
 0x5e7   : > { %v8394_v11 = vadd.f32 %v4445_v47, %v10706_v44  ;;  %v4447_v26 = vpop.f32.mrb[129].mxu0  ;;  %v8364_v7 = vadd.f32 %v4223_v52, %v10700_v43  ;;  %v4225_v39 = vpop.f32.mrb[67].mxu1  ;;  %v4528_v60 = vmax.f32 %v8362_v17, 0.0  ;;  %v9001_v47 = vld [vmem:[#allocation8 + $0x3ec] ss:$16 sps:$4 sm:$0xff]  }
 0x5e8   : > { %v8395_v6 = vadd.f32 %v4447_v26, %v10709_v13  ;;  %v4449_v5 = vpop.f32.mrb[130].mxu0  ;;  %v8365_v61 = vadd.f32 %v4225_v39, %v10703_v18  ;;  %6474 = vmatpush1.bf16.msra.mxu1 %v8972_v20  ;;  %6638 = vmatpush1.bf16.msra.mxu0 %v8975_v59  ;;  %v4529_v30 = vmax.f32 %v8363_v38, 0.0  ;;  %v8998_v20 = vld [vmem:[#allocation8 + $0x3e4] ss:$16 sps:$4 sm:$0xff]   ;;  %v4764_v59 = vrot.slane %v4763_v14, 1 }
 0x5e9   : > { %v4536_v15 = vmax.f32 %v8364_v7, 0.0  ;;  %v8396_v62 = vadd.f32 %v4449_v5, %v10706_v44  ;;  %v4451_v3 = vpop.f32.mrb[131].mxu0  ;;  %6475 = vmatprep.subr.bf16.mxu1 %v8980_v57  ;;  %6639 = vmatprep.subr.bf16.mxu0 %v8983_v46  ;;  %v4530_v8 = vmax.f32 %v8394_v11, 0.0 }
 0x5ea   : > { %v4537_v50 = vmax.f32 %v8365_v61, 0.0  ;;  %v8397_v36 = vadd.f32 %v4451_v3, %v10709_v13  ;;  %v4531_v16 = vmax.f32 %v8395_v6, 0.0  ;;  %v4765_v48 = vmax.f32 %v4763_v14, %v4764_v59  ;;  %v9002_v14 = vld [vmem:[#allocation8 + $0x400] ss:$16 sps:$4 sm:$0xff]  }
 0x5eb   : > { %v10719_v19 = vpack.c.bf16 %v4536_v15, %v4528_v60  ;;  %v4538_v53 = vmax.f32 %v8396_v62, 0.0 }
 0x5ec   : > { %v10721_v23 = vpack.c.bf16 %v4537_v50, %v4529_v30  ;;  %v4539_v22 = vmax.f32 %v8397_v36, 0.0  ;;  %6476 = vmatpush1.bf16.msra.mxu1 %v8978_v32  ;;  %6640 = vmatpush1.bf16.msra.mxu0 %v8981_v9  ;;  %v4229_v35 = vpop.f32.mrb[68].mxu1  ;;  %v8996_v32 = vld [vmem:[#allocation8 + $0x3e0] ss:$16 sps:$4 sm:$0xff]   ;;  %v9007_v30 = vld [vmem:[#allocation8 + $0x40c] ss:$16 sps:$4 sm:$0xff]  }
 0x5ed   : > { %v10723_v37 = vpack.c.bf16 %v4538_v53, %v4530_v8  ;;  %v8366_v10 = vadd.f32 %v4229_v35, %v10700_v43  ;;  %v4231_v1 = vpop.f32.mrb[69].mxu1  ;;  %6477 = vmatprep.subr.bf16.mxu1 %v8986_v40  ;;  %6641 = vmatprep.subr.bf16.mxu0 %v8989_v55  ;;  %v8999_v40 = vld [vmem:[#allocation8 + $0x3e8] ss:$16 sps:$4 sm:$0xff]   ;;  %v9004_v55 = vld [vmem:[#allocation8 + $0x404] ss:$16 sps:$4 sm:$0xff]  }
 0x5ee   : > { %v10726_v2 = vpack.c.bf16 %v4539_v22, %v4531_v16  ;;  %v4455_v29 = vpop.f32.mrb[132].mxu0  ;;  %v8367_v51 = vadd.f32 %v4231_v1, %v10703_v18  ;;  %v4233_v25 = vpop.f32.mrb[70].mxu1 }
 0x5ef   : > { %v8398_v12 = vadd.f32 %v4455_v29, %v10706_v44  ;;  %v4457_v49 = vpop.f32.mrb[133].mxu0  ;;  %v8368_v33 = vadd.f32 %v4233_v25, %v10700_v43  ;;  %v4235_v31 = vpop.f32.mrb[71].mxu1  ;;  %v4544_v17 = vmax.f32 %v8366_v10, 0.0  ;;  %v9010_v29 = vld [vmem:[#allocation8 + $0x424] ss:$16 sps:$4 sm:$0xff]  }
 0x5f0   : > { %v8399_v58 = vadd.f32 %v4457_v49, %v10709_v13  ;;  %v4459_v56 = vpop.f32.mrb[134].mxu0  ;;  %v8369_v24 = vadd.f32 %v4235_v31, %v10703_v18  ;;  %6478 = vmatpush1.bf16.msra.mxu1 %v8984_v27  ;;  %6642 = vmatpush1.bf16.msra.mxu0 %v8987_v63  ;;  %v4545_v38 = vmax.f32 %v8367_v51, 0.0  ;;  %v4766_v49 = vpack.i.bf16 %v4765_v48, %v4765_v48 }
 0x5f1   : > { %v4552_v28 = vmax.f32 %v8368_v33, 0.0  ;;  %v8400_v57 = vadd.f32 %v4459_v56, %v10706_v44  ;;  %v4461_v46 = vpop.f32.mrb[135].mxu0  ;;  %6479 = vmatprep.subr.bf16.mxu1 %v8992_v42  ;;  %6643 = vmatprep.subr.bf16.mxu0 %v8995_v4  ;;  %v4546_v26 = vmax.f32 %v8398_v12, 0.0  ;;  %v9005_v4 = vld [vmem:[#allocation8 + $0x408] ss:$16 sps:$4 sm:$0xff]  }
 0x5f2   : > { %v4553_v52 = vmax.f32 %v8369_v24, 0.0  ;;  %v8401_v11 = vadd.f32 %v4461_v46, %v10709_v13  ;;  %v4547_v6 = vmax.f32 %v8399_v58, 0.0  ;;  %v9013_v33 = vld [vmem:[#allocation8 + $0x42c] ss:$16 sps:$4 sm:$0xff]  }
 0x5f3   : > { %v10735_v7 = vpack.c.bf16 %v4552_v28, %v4544_v17  ;;  %v4554_v39 = vmax.f32 %v8400_v57, 0.0  ;;  %v9011_v57 = vld [vmem:[#allocation8 + $0x428] ss:$16 sps:$4 sm:$0xff]  }
 0x5f4   : > { %v10737_v5 = vpack.c.bf16 %v4553_v52, %v4545_v38  ;;  %v4555_v61 = vmax.f32 %v8401_v11, 0.0  ;;  %6480 = vmatpush1.bf16.msra.mxu1 %v8990_v54  ;;  %6644 = vmatpush1.bf16.msra.mxu0 %v8993_v0  ;;  %v4239_v9 = vpop.f32.mrb[72].mxu1  ;;  %v9008_v0 = vld [vmem:[#allocation8 + $0x420] ss:$16 sps:$4 sm:$0xff]   ;;  %v9016_v11 = vld [vmem:[#allocation8 + $0x444] ss:$16 sps:$4 sm:$0xff]  }
 0x5f5   : > { %v4784_v60 = vmax.bf16 %v10735_v7, %v10719_v19  ;;  %v10741_v15 = vpack.c.bf16 %v4554_v39, %v4546_v26  ;;  %v8370_v62 = vadd.f32 %v4239_v9, %v10700_v43  ;;  %v4241_v3 = vpop.f32.mrb[73].mxu1  ;;  %6481 = vmatprep.subr.bf16.mxu1 %v8998_v20  ;;  %6645 = vmatprep.subr.bf16.mxu0 %v9001_v47  ;;  %v9019_v26 = vld [vmem:[#allocation8 + $0x44c] ss:$16 sps:$4 sm:$0xff]  }
 0x5f6   : > { %v4801_v50 = vmax.bf16 %v10737_v5, %v10721_v23  ;;  %v4667_v36 = vpack.c.bf16 %v4555_v61, %v4547_v6  ;;  %v4465_v8 = vpop.f32.mrb[136].mxu0  ;;  %v8371_v53 = vadd.f32 %v4241_v3, %v10703_v18  ;;  %v4243_v27 = vpop.f32.mrb[74].mxu1 }
 0x5f7   : > { %v4818_v19 = vmax.bf16 %v10741_v15, %v10723_v37  ;;  %v8402_v16 = vadd.f32 %v4465_v8, %v10706_v44  ;;  %v4467_v22 = vpop.f32.mrb[137].mxu0  ;;  %v8372_v35 = vadd.f32 %v4243_v27, %v10700_v43  ;;  %v4245_v63 = vpop.f32.mrb[75].mxu1  ;;  %v4560_v51 = vmax.f32 %v8370_v62, 0.0  ;;  %v9014_v15 = vld [vmem:[#allocation8 + $0x440] ss:$16 sps:$4 sm:$0xff]  }
 0x5f8   : > { %v4835_v10 = vmax.bf16 %v4667_v36, %v10726_v2  ;;  %v8403_v1 = vadd.f32 %v4467_v22, %v10709_v13  ;;  %v4469_v23 = vpop.f32.mrb[138].mxu0  ;;  %v8373_v42 = vadd.f32 %v4245_v63, %v10703_v18  ;;  %6482 = vmatpush1.bf16.msra.mxu1 %v8996_v32  ;;  %6646 = vmatpush1.bf16.msra.mxu0 %v8999_v40  ;;  %v4561_v31 = vmax.f32 %v8371_v53, 0.0  ;;  %v9022_v36 = vld [vmem:[#allocation8 + $0x464] ss:$16 sps:$4 sm:$0xff]  }
 0x5f9   : > { %v4568_v37 = vmax.f32 %v8372_v35, 0.0  ;;  %v8404_v25 = vadd.f32 %v4469_v23, %v10706_v44  ;;  %v4471_v12 = vpop.f32.mrb[139].mxu0  ;;  %6492 = vmatprep.subr.bf16.mxu1 %v9004_v55  ;;  %6656 = vmatprep.subr.bf16.mxu0 %v9007_v30  ;;  %v4562_v58 = vmax.f32 %v8402_v16, 0.0  ;;  %v9025_v16 = vld [vmem:[#allocation8 + $0x46c] ss:$16 sps:$4 sm:$0xff]  }
 0x5fa   : > { %v4569_v2 = vmax.f32 %v8373_v42, 0.0  ;;  %v8405_v54 = vadd.f32 %v4471_v12, %v10709_v13  ;;  %v4563_v20 = vmax.f32 %v8403_v1, 0.0  ;;  %v9020_v23 = vld [vmem:[#allocation8 + $0x460] ss:$16 sps:$4 sm:$0xff]  }
 0x5fb   : > { %v4672_v56 = vpack.c.bf16 %v4568_v37, %v4560_v51  ;;  %v4570_v24 = vmax.f32 %v8404_v25, 0.0  ;;  %6484 = vmatmul.mubr.bf16.vlgmr.msra.gmra.mrb[96].mxu1 %v4766_v49  ;;  %6648 = vmatmul.mubr.bf16.vlgmr.msra.gmra.mrb[160].mxu0 %v4766_v49  ;;  %v9023_v37 = vld [vmem:[#allocation8 + $0x468] ss:$16 sps:$4 sm:$0xff]  }
 0x5fc   : > { %v4673_v59 = vpack.c.bf16 %v4569_v2, %v4561_v31  ;;  %v4571_v17 = vmax.f32 %v8405_v54, 0.0  ;;  %6493 = vmatpush1.bf16.msra.mxu1 %v9002_v14  ;;  %6657 = vmatpush1.bf16.msra.mxu0 %v9005_v4  ;;  %v4249_v28 = vpop.f32.mrb[76].mxu1  ;;  %v9028_v31 = vld [vmem:[#allocation8 + $0x484] ss:$16 sps:$4 sm:$0xff]   ;;  %v9031_v2 = vld [vmem:[#allocation8 + $0x48c] ss:$16 sps:$4 sm:$0xff]  }
 0x5fd   : > { %v10756_v46 = vmax.bf16 %v4784_v60, %v4672_v56  ;;  %v4674_v47 = vpack.c.bf16 %v4570_v24, %v4562_v58  ;;  %v8374_v38 = vadd.f32 %v4249_v28, %v10700_v43  ;;  %v4251_v52 = vpop.f32.mrb[77].mxu1  ;;  %6494 = vmatprep.subr.bf16.mxu1 %v9010_v29  ;;  %6658 = vmatprep.subr.bf16.mxu0 %v9013_v33 }
 0x5fe   : > { %v10759_v7 = vmax.bf16 %v4801_v50, %v4673_v59  ;;  %v4675_v39 = vpack.c.bf16 %v4571_v17, %v4563_v20  ;;  %v4475_v32 = vpop.f32.mrb[140].mxu0  ;;  %v8375_v6 = vadd.f32 %v4251_v52, %v10703_v18  ;;  %v4253_v5 = vpop.f32.mrb[78].mxu1  ;;  %v9017_v50 = vld [vmem:[#allocation8 + $0x448] ss:$16 sps:$4 sm:$0xff]  }
 0x5ff   : > { %v10762_v61 = vmax.bf16 %v4818_v19, %v4674_v47  ;;  %v8406_v9 = vadd.f32 %v4475_v32, %v10706_v44  ;;  %v4477_v40 = vpop.f32.mrb[141].mxu0  ;;  %v8376_v48 = vadd.f32 %v4253_v5, %v10700_v43  ;;  %v4255_v60 = vpop.f32.mrb[79].mxu1  ;;  %v4576_v8 = vmax.f32 %v8374_v38, 0.0 }
 0x600   : > { %v10766_v62 = vmax.bf16 %v4835_v10, %v4675_v39  ;;  %v8407_v3 = vadd.f32 %v4477_v40, %v10709_v13  ;;  %v4479_v55 = vpop.f32.mrb[142].mxu0  ;;  %v8377_v30 = vadd.f32 %v4255_v60, %v10703_v18  ;;  %6495 = vmatpush1.bf16.msra.mxu1 %v9008_v0  ;;  %6659 = vmatpush1.bf16.msra.mxu0 %v9011_v57  ;;  %v4577_v22 = vmax.f32 %v8375_v6, 0.0 }
 0x601   : > { %v4584_v53 = vmax.f32 %v8376_v48, 0.0  ;;  %v8408_v27 = vadd.f32 %v4479_v55, %v10706_v44  ;;  %v4481_v19 = vpop.f32.mrb[143].mxu0  ;;  %6496 = vmatprep.subr.bf16.mxu1 %v9016_v11  ;;  %6660 = vmatprep.subr.bf16.mxu0 %v9019_v26  ;;  %v4578_v14 = vmax.f32 %v8406_v9, 0.0  ;;  %v9029_v26 = vld [vmem:[#allocation8 + $0x488] ss:$16 sps:$4 sm:$0xff]  }
 0x602   : > { %v4585_v35 = vmax.f32 %v8377_v30, 0.0  ;;  %v8409_v63 = vadd.f32 %v4481_v19, %v10709_v13  ;;  %v4579_v42 = vmax.f32 %v8407_v3, 0.0  ;;  %v9032_v3 = vld [vmem:[#allocation8 + $0x4a0] ss:$16 sps:$4 sm:$0xff]  }
 0x603   : > { %v4680_v10 = vpack.c.bf16 %v4584_v53, %v4576_v8  ;;  %v4586_v1 = vmax.f32 %v8408_v27, 0.0  ;;  %v9035_v8 = vld [vmem:[#allocation8 + $0x4a8] ss:$16 sps:$4 sm:$0xff]  }
 0x604   : > { %v10772_v4 = vpack.c.bf16 %v4585_v35, %v4577_v22  ;;  %v4587_v29 = vmax.f32 %v8409_v63, 0.0  ;;  %6497 = vmatpush1.bf16.msra.mxu1 %v9014_v15  ;;  %6661 = vmatpush1.bf16.msra.mxu0 %v9017_v50  ;;  %v4259_v51 = vpop.f32.mrb[80].mxu1  ;;  %v9040_v22 = vld [vmem:[#allocation8 + $0x4c4] ss:$16 sps:$4 sm:$0xff]   ;;  %v9043_v35 = vld [vmem:[#allocation8 + $0x4cc] ss:$16 sps:$4 sm:$0xff]  }
 0x605   : > { %v4786_v25 = vmax.bf16 %v10756_v46, %v4680_v10  ;;  %v4682_v12 = vpack.c.bf16 %v4586_v1, %v4578_v14  ;;  %v8378_v49 = vadd.f32 %v4259_v51, %v10700_v43  ;;  %v4261_v33 = vpop.f32.mrb[81].mxu1  ;;  %6498 = vmatprep.subr.bf16.mxu1 %v9022_v36  ;;  %6662 = vmatprep.subr.bf16.mxu0 %v9025_v16  ;;  %v9026_v46 = vld [vmem:[#allocation8 + $0x480] ss:$16 sps:$4 sm:$0xff]  }
 0x606   : > { %v4803_v54 = vmax.bf16 %v10759_v7, %v10772_v4  ;;  %v4683_v58 = vpack.c.bf16 %v4587_v29, %v4579_v42  ;;  %v4485_v56 = vpop.f32.mrb[144].mxu0  ;;  %v8379_v24 = vadd.f32 %v4261_v33, %v10703_v18  ;;  %v4263_v0 = vpop.f32.mrb[82].mxu1  ;;  %v9034_v7 = vld [vmem:[#allocation8 + $0x4a4] ss:$16 sps:$4 sm:$0xff]  }
 0x607   : > { %v4820_v20 = vmax.bf16 %v10762_v61, %v4682_v12  ;;  %v8410_v59 = vadd.f32 %v4485_v56, %v10706_v44  ;;  %v4487_v17 = vpop.f32.mrb[145].mxu0  ;;  %v8380_v28 = vadd.f32 %v4263_v0, %v10700_v43  ;;  %v4265_v57 = vpop.f32.mrb[83].mxu1  ;;  %v4592_v39 = vmax.f32 %v8378_v49, 0.0  ;;  %v9037_v61 = vld [vmem:[#allocation8 + $0x4ac] ss:$16 sps:$4 sm:$0xff]  }
 0x608   : > { %v4837_v47 = vmax.bf16 %v10766_v62, %v4683_v58  ;;  %v8411_v38 = vadd.f32 %v4487_v17, %v10709_v13  ;;  %v4489_v52 = vpop.f32.mrb[146].mxu0  ;;  %v8381_v11 = vadd.f32 %v4265_v57, %v10703_v18  ;;  %6499 = vmatpush1.bf16.msra.mxu1 %v9020_v23  ;;  %6663 = vmatpush1.bf16.msra.mxu0 %v9023_v37  ;;  %v4593_v9 = vmax.f32 %v8379_v24, 0.0 }
 0x609   : > { %v4600_v32 = vmax.f32 %v8380_v28, 0.0  ;;  %v8412_v6 = vadd.f32 %v4489_v52, %v10706_v44  ;;  %v4491_v5 = vpop.f32.mrb[147].mxu0  ;;  %6500 = vmatprep.subr.bf16.mxu1 %v9028_v31  ;;  %6664 = vmatprep.subr.bf16.mxu0 %v9031_v2  ;;  %v4594_v60 = vmax.f32 %v8410_v59, 0.0  ;;  %v9041_v2 = vld [vmem:[#allocation8 + $0x4c8] ss:$16 sps:$4 sm:$0xff]  }
 0x60a   : > { %v4601_v40 = vmax.f32 %v8381_v11, 0.0  ;;  %v8413_v48 = vadd.f32 %v4491_v5, %v10709_v13  ;;  %v4595_v55 = vmax.f32 %v8411_v38, 0.0  ;;  %v9044_v38 = vld [vmem:[#allocation8 + $0x4e0] ss:$16 sps:$4 sm:$0xff]  }
 0x60b   : > { %v4688_v15 = vpack.c.bf16 %v4600_v32, %v4592_v39  ;;  %v4602_v62 = vmax.f32 %v8412_v6, 0.0  ;;  %v9047_v39 = vld [vmem:[#allocation8 + $0x4e8] ss:$16 sps:$4 sm:$0xff]  }
 0x60c   : > { %v4689_v30 = vpack.c.bf16 %v4601_v40, %v4593_v9  ;;  %v4603_v50 = vmax.f32 %v8413_v48, 0.0  ;;  %6501 = vmatpush1.bf16.msra.mxu1 %v9026_v46  ;;  %6665 = vmatpush1.bf16.msra.mxu0 %v9029_v26  ;;  %v4269_v36 = vpop.f32.mrb[84].mxu1  ;;  %v9052_v9 = vld [vmem:[#allocation8 + $0x504] ss:$16 sps:$4 sm:$0xff]   ;;  %v9055_v40 = vld [vmem:[#allocation8 + $0x50c] ss:$16 sps:$4 sm:$0xff]  }
 0x60d   : > { %v10787_v53 = vmax.bf16 %v4786_v25, %v4688_v15  ;;  %v4690_v27 = vpack.c.bf16 %v4602_v62, %v4594_v60  ;;  %v8382_v19 = vadd.f32 %v4269_v36, %v10700_v43  ;;  %v4271_v16 = vpop.f32.mrb[85].mxu1  ;;  %6502 = vmatprep.subr.bf16.mxu1 %v9034_v7  ;;  %6666 = vmatprep.subr.bf16.mxu0 %v9037_v61  ;;  %v9038_v25 = vld [vmem:[#allocation8 + $0x4c0] ss:$16 sps:$4 sm:$0xff]  }
 0x60e   : > { %v10790_v63 = vmax.bf16 %v4803_v54, %v4689_v30  ;;  %v4691_v14 = vpack.c.bf16 %v4603_v50, %v4595_v55  ;;  %v4495_v10 = vpop.f32.mrb[148].mxu0  ;;  %v8383_v1 = vadd.f32 %v4271_v16, %v10703_v18  ;;  %v4273_v23 = vpop.f32.mrb[86].mxu1  ;;  %v9046_v54 = vld [vmem:[#allocation8 + $0x4e4] ss:$16 sps:$4 sm:$0xff]  }
 0x60f   : > { %v10793_v42 = vmax.bf16 %v4820_v20, %v4690_v27  ;;  %v8414_v4 = vadd.f32 %v4495_v10, %v10706_v44  ;;  %v4497_v29 = vpop.f32.mrb[149].mxu0  ;;  %v8384_v51 = vadd.f32 %v4273_v23, %v10700_v43  ;;  %v4275_v37 = vpop.f32.mrb[87].mxu1  ;;  %v4608_v58 = vmax.f32 %v8382_v19, 0.0  ;;  %v9049_v20 = vld [vmem:[#allocation8 + $0x4ec] ss:$16 sps:$4 sm:$0xff]  }
 0x610   : > { %v10797_v12 = vmax.bf16 %v4837_v47, %v4691_v14  ;;  %v8415_v49 = vadd.f32 %v4497_v29, %v10709_v13  ;;  %v4499_v33 = vpop.f32.mrb[150].mxu0  ;;  %v8385_v31 = vadd.f32 %v4275_v37, %v10703_v18  ;;  %6503 = vmatpush1.bf16.msra.mxu1 %v9032_v3  ;;  %6667 = vmatpush1.bf16.msra.mxu0 %v9035_v8  ;;  %v4609_v59 = vmax.f32 %v8383_v1, 0.0 }
 0x611   : > { %v4616_v56 = vmax.f32 %v8384_v51, 0.0  ;;  %v8416_v24 = vadd.f32 %v4499_v33, %v10706_v44  ;;  %v4501_v0 = vpop.f32.mrb[151].mxu0  ;;  %6504 = vmatprep.subr.bf16.mxu1 %v9040_v22  ;;  %6668 = vmatprep.subr.bf16.mxu0 %v9043_v35  ;;  %v4610_v57 = vmax.f32 %v8414_v4, 0.0  ;;  %v9053_v35 = vld [vmem:[#allocation8 + $0x508] ss:$16 sps:$4 sm:$0xff]  }
 0x612   : > { %v4617_v17 = vmax.f32 %v8385_v31, 0.0  ;;  %v8417_v28 = vadd.f32 %v4501_v0, %v10709_v13  ;;  %v4611_v52 = vmax.f32 %v8415_v49, 0.0  ;;  %v9056_v49 = vld [vmem:[#allocation8 + $0x520] ss:$16 sps:$4 sm:$0xff]  }
 0x613   : > { %v4696_v46 = vpack.c.bf16 %v4616_v56, %v4608_v58  ;;  %v4618_v47 = vmax.f32 %v8416_v24, 0.0  ;;  %v9059_v58 = vld [vmem:[#allocation8 + $0x528] ss:$16 sps:$4 sm:$0xff]  }
 0x614   : > { %v10803_v11 = vpack.c.bf16 %v4617_v17, %v4609_v59  ;;  %v4619_v26 = vmax.f32 %v8417_v28, 0.0  ;;  %6505 = vmatpush1.bf16.msra.mxu1 %v9038_v25  ;;  %6669 = vmatpush1.bf16.msra.mxu0 %v9041_v2  ;;  %v4279_v7 = vpop.f32.mrb[88].mxu1  ;;  %v9064_v59 = vld [vmem:[#allocation8 + $0x544] ss:$16 sps:$4 sm:$0xff]   ;;  %v9067_v17 = vld [vmem:[#allocation8 + $0x54c] ss:$16 sps:$4 sm:$0xff]  }
 0x615   : > { %v4788_v32 = vmax.bf16 %v10787_v53, %v4696_v46  ;;  %v4698_v6 = vpack.c.bf16 %v4618_v47, %v4610_v57  ;;  %v8386_v5 = vadd.f32 %v4279_v7, %v10700_v43  ;;  %v4281_v61 = vpop.f32.mrb[89].mxu1  ;;  %6506 = vmatprep.subr.bf16.mxu1 %v9046_v54  ;;  %6670 = vmatprep.subr.bf16.mxu0 %v9049_v20  ;;  %v9050_v53 = vld [vmem:[#allocation8 + $0x500] ss:$16 sps:$4 sm:$0xff]  }
 0x616   : > { %v4805_v48 = vmax.bf16 %v10790_v63, %v10803_v11  ;;  %v4699_v60 = vpack.c.bf16 %v4619_v26, %v4611_v52  ;;  %v4505_v15 = vpop.f32.mrb[152].mxu0  ;;  %v8387_v62 = vadd.f32 %v4281_v61, %v10703_v18  ;;  %v4283_v3 = vpop.f32.mrb[90].mxu1  ;;  %v9058_v63 = vld [vmem:[#allocation8 + $0x524] ss:$16 sps:$4 sm:$0xff]  }
 0x617   : > { %v4822_v55 = vmax.bf16 %v10793_v42, %v4698_v6  ;;  %v8418_v30 = vadd.f32 %v4505_v15, %v10706_v44  ;;  %v4507_v50 = vpop.f32.mrb[153].mxu0  ;;  %v8388_v36 = vadd.f32 %v4283_v3, %v10700_v43  ;;  %v4285_v8 = vpop.f32.mrb[91].mxu1  ;;  %v4624_v14 = vmax.f32 %v8386_v5, 0.0  ;;  %v9061_v42 = vld [vmem:[#allocation8 + $0x52c] ss:$16 sps:$4 sm:$0xff]  }
 0x618   : > { %v4839_v27 = vmax.bf16 %v10797_v12, %v4699_v60  ;;  %v8419_v19 = vadd.f32 %v4507_v50, %v10709_v13  ;;  %v4509_v16 = vpop.f32.mrb[154].mxu0  ;;  %v8389_v22 = vadd.f32 %v4285_v8, %v10703_v18  ;;  %6507 = vmatpush1.bf16.msra.mxu1 %v9044_v38  ;;  %6671 = vmatpush1.bf16.msra.mxu0 %v9047_v39  ;;  %v4625_v4 = vmax.f32 %v8387_v62, 0.0 }
 0x619   : > { %v4632_v10 = vmax.f32 %v8388_v36, 0.0  ;;  %v8420_v1 = vadd.f32 %v4509_v16, %v10706_v44  ;;  %v4511_v23 = vpop.f32.mrb[155].mxu0  ;;  %6508 = vmatprep.subr.bf16.mxu1 %v9052_v9  ;;  %6672 = vmatprep.subr.bf16.mxu0 %v9055_v40  ;;  %v4626_v37 = vmax.f32 %v8418_v30, 0.0  ;;  %v9065_v40 = vld [vmem:[#allocation8 + $0x548] ss:$16 sps:$4 sm:$0xff]  }
 0x61a   : > { %v4633_v29 = vmax.f32 %v8389_v22, 0.0  ;;  %v8421_v51 = vadd.f32 %v4511_v23, %v10709_v13  ;;  %v4627_v33 = vmax.f32 %v8419_v19, 0.0  ;;  %v9068_v16 = vld [vmem:[#allocation8 + $0x560] ss:$16 sps:$4 sm:$0xff]   ;;  %v9071_v22 = vld [vmem:[#allocation8 + $0x568] ss:$16 sps:$4 sm:$0xff]  }
 0x61b   : > { %v4704_v25 = vpack.c.bf16 %v4632_v10, %v4624_v14  ;;  %v4634_v12 = vmax.f32 %v8420_v1, 0.0  ;;  %v9079_v14 = vld [vmem:[#allocation8 + $0x58c] ss:$16 sps:$4 sm:$0xff]  }
 0x61c   : > { %v4705_v31 = vpack.c.bf16 %v4633_v29, %v4625_v4  ;;  %v4635_v2 = vmax.f32 %v8421_v51, 0.0  ;;  %6509 = vmatpush1.bf16.msra.mxu1 %v9050_v53  ;;  %6673 = vmatpush1.bf16.msra.mxu0 %v9053_v35  ;;  %v4289_v54 = vpop.f32.mrb[92].mxu1 }
 0x61d   : > { %v4789_v56 = vmax.bf16 %v4788_v32, %v4704_v25  ;;  %v4706_v24 = vpack.c.bf16 %v4634_v12, %v4626_v37  ;;  %v8390_v0 = vadd.f32 %v4289_v54, %v10700_v43  ;;  %v4291_v20 = vpop.f32.mrb[93].mxu1  ;;  %6510 = vmatprep.subr.bf16.mxu1 %v9058_v63  ;;  %6674 = vmatprep.subr.bf16.mxu0 %v9061_v42  ;;  %v9062_v32 = vld [vmem:[#allocation8 + $0x540] ss:$16 sps:$4 sm:$0xff]   ;;  %v9076_v63 = vld [vmem:[#allocation8 + $0x584] ss:$16 sps:$4 sm:$0xff]  }
 0x61e   : > { %v4806_v28 = vmax.bf16 %v4805_v48, %v4705_v31  ;;  %v4707_v57 = vpack.c.bf16 %v4635_v2, %v4627_v33  ;;  %v4515_v46 = vpop.f32.mrb[156].mxu0  ;;  %v8391_v47 = vadd.f32 %v4291_v20, %v10703_v18  ;;  %v4293_v38 = vpop.f32.mrb[94].mxu1  ;;  %v9070_v48 = vld [vmem:[#allocation8 + $0x564] ss:$16 sps:$4 sm:$0xff]   ;;  %v9074_v37 = vld [vmem:[#allocation8 + $0x580] ss:$16 sps:$4 sm:$0xff]  }
 0x61f   : > { %v4823_v52 = vmax.bf16 %v4822_v55, %v4706_v24  ;;  %v8422_v11 = vadd.f32 %v4515_v46, %v10706_v44  ;;  %v4517_v26 = vpop.f32.mrb[157].mxu0  ;;  %v8392_v7 = vadd.f32 %v4293_v38, %v10700_v43  ;;  %v4295_v39 = vpop.f32.mrb[95].mxu1  ;;  %v4640_v60 = vmax.f32 %v8390_v0, 0.0  ;;  %v9073_v43 = vld [vmem:[#allocation8 + $0x56c] ss:$16 sps:$4 sm:$0xff]  }
 0x620   : > { %v4840_v6 = vmax.bf16 %v4839_v27, %v4707_v57  ;;  %v8423_v5 = vadd.f32 %v4517_v26, %v10709_v13  ;;  %v4519_v61 = vpop.f32.mrb[158].mxu0  ;;  %v8393_v9 = vadd.f32 %v4295_v39, %v10703_v18  ;;  %6511 = vmatpush1.bf16.msra.mxu1 %v9056_v49  ;;  %6675 = vmatpush1.bf16.msra.mxu0 %v9059_v58  ;;  %v4641_v55 = vmax.f32 %v8391_v47, 0.0  ;;  %v9077_v25 = vld [vmem:[#allocation8 + $0x588] ss:$16 sps:$4 sm:$0xff]   ;;  %v9082_v49 = vld [vmem:[#allocation8 + $0x5a4] ss:$16 sps:$4 sm:$0xff]  }
 0x621   : > { %v4648_v15 = vmax.f32 %v8392_v7, 0.0  ;;  %v8424_v62 = vadd.f32 %v4519_v61, %v10706_v44  ;;  %v4521_v3 = vpop.f32.mrb[159].mxu0  ;;  %6512 = vmatprep.subr.bf16.mxu1 %v9064_v59  ;;  %6676 = vmatprep.subr.bf16.mxu0 %v9067_v17  ;;  %v4642_v36 = vmax.f32 %v8422_v11, 0.0  ;;  %v9085_v33 = vld [vmem:[#allocation8 + $0x5ac] ss:$16 sps:$4 sm:$0xff]  }
 0x622   : > { %v4649_v30 = vmax.f32 %v8393_v9, 0.0  ;;  %v8425_v50 = vadd.f32 %v4521_v3, %v10709_v13  ;;  %v4643_v18 = vmax.f32 %v8423_v5, 0.0  ;;  %v9080_v24 = vld [vmem:[#allocation8 + $0x5a0] ss:$16 sps:$4 sm:$0xff]   ;;  %v9083_v0 = vld [vmem:[#allocation8 + $0x5a8] ss:$16 sps:$4 sm:$0xff]  }
 0x623   : > { %v4712_v8 = vpack.c.bf16 %v4648_v15, %v4640_v60  ;;  %v4650_v53 = vmax.f32 %v8424_v62, 0.0  ;;  %v9088_v17 = vld [vmem:[#allocation8 + $0x5c4] ss:$16 sps:$4 sm:$0xff]   ;;  %v9086_v38 = vld [vmem:[#allocation8 + $0x5c0] ss:$16 sps:$4 sm:$0xff]  }
 0x624   : > { %v4713_v27 = vpack.c.bf16 %v4649_v30, %v4641_v55  ;;  %v4651_v19 = vmax.f32 %v8425_v50, 0.0  ;;  %6513 = vmatpush1.bf16.msra.mxu1 %v9062_v32  ;;  %6677 = vmatpush1.bf16.msra.mxu0 %v9065_v40  ;;  %v9094_v7 = vld [vmem:[#allocation8 + $0x5e4] ss:$16 sps:$4 sm:$0xff]   ;;  %v9097_v39 = vld [vmem:[#allocation8 + $0x5ec] ss:$16 sps:$4 sm:$0xff]  }
 0x625   : > { %v4790_v35 = vmax.bf16 %v4789_v56, %v4712_v8  ;;  %v4714_v44 = vpack.c.bf16 %v4650_v53, %v4642_v36  ;;  %6514 = vmatprep.subr.bf16.mxu1 %v9070_v48  ;;  %6678 = vmatprep.subr.bf16.mxu0 %v9073_v43  ;;  %v9092_v9 = vld [vmem:[#allocation8 + $0x5e0] ss:$16 sps:$4 sm:$0xff]   ;;  %v9095_v40 = vld [vmem:[#allocation8 + $0x5e8] ss:$16 sps:$4 sm:$0xff]   ;;  %v9100_v15 = vld [vmem:[#allocation8 + $0x604] ss:$16 sps:$4 sm:$0xff]  }
 0x626   : > { %v4807_v10 = vmax.bf16 %v4806_v28, %v4713_v27  ;;  %v4715_v1 = vpack.c.bf16 %v4651_v19, %v4643_v18  ;;  %v9091_v28 = vld [vmem:[#allocation8 + $0x5cc] ss:$16 sps:$4 sm:$0xff]   ;;  %v9098_v50 = vld [vmem:[#allocation8 + $0x600] ss:$16 sps:$4 sm:$0xff]   ;;  %v9101_v36 = vld [vmem:[#allocation8 + $0x608] ss:$16 sps:$4 sm:$0xff]  }
 0x627   : > { %v4791_v23 = vunpack.i.l.bf16 %v4790_v35  ;;  %v4792_v13 = vunpack.i.h.bf16 %v4790_v35  ;;  %v10826_v42 = vmax.bf16 %v4823_v52, %v4714_v44  ;;  %v9089_v52 = vld [vmem:[#allocation8 + $0x5c8] ss:$16 sps:$4 sm:$0xff]   ;;  %v9103_v62 = vld [vmem:[#allocation8 + $0x60c] ss:$16 sps:$4 sm:$0xff]   ;;  %v9106_v18 = vld [vmem:[#allocation8 + $0x624] ss:$16 sps:$4 sm:$0xff]  }
 0x628   : > { %v4808_v4 = vunpack.i.l.bf16 %v4807_v10  ;;  %v4809_v29 = vunpack.i.h.bf16 %v4807_v10  ;;  %v4841_v51 = vmax.bf16 %v4840_v6, %v4715_v1  ;;  %6515 = vmatpush1.bf16.msra.mxu1 %v9068_v16  ;;  %6679 = vmatpush1.bf16.msra.mxu0 %v9071_v22  ;;  %v9109_v27 = vld [vmem:[#allocation8 + $0x62c] ss:$16 sps:$4 sm:$0xff]   ;;  %v9104_v16 = vld [vmem:[#allocation8 + $0x620] ss:$16 sps:$4 sm:$0xff]   ;;  %v9107_v22 = vld [vmem:[#allocation8 + $0x628] ss:$16 sps:$4 sm:$0xff]  }
 0x629   : > { %v4793_v12 = vmax.f32 %v4791_v23, %v4792_v13  ;;  %6516 = vmatprep.subr.bf16.mxu1 %v9076_v63  ;;  %6680 = vmatprep.subr.bf16.mxu0 %v9079_v14  ;;  %v9112_v35 = vld [vmem:[#allocation8 + $0x644] ss:$16 sps:$4 sm:$0xff]   ;;  %v9115_v44 = vld [vmem:[#allocation8 + $0x64c] ss:$16 sps:$4 sm:$0xff]   ;;  %v9110_v63 = vld [vmem:[#allocation8 + $0x640] ss:$16 sps:$4 sm:$0xff]  }
 0x62a   : > { %v4810_v31 = vmax.f32 %v4808_v4, %v4809_v29  ;;  %v4842_v2 = vunpack.i.l.bf16 %v4841_v51  ;;  %v4843_v54 = vunpack.i.h.bf16 %v4841_v51  ;;  %v9113_v14 = vld [vmem:[#allocation8 + $0x648] ss:$16 sps:$4 sm:$0xff]   ;;  %v9118_v10 = vld [vmem:[#allocation8 + $0x664] ss:$16 sps:$4 sm:$0xff]   ;;  %v9121_v1 = vld [vmem:[#allocation8 + $0x66c] ss:$16 sps:$4 sm:$0xff]  }
 0x62b   : > { %v4794_v58 = vrot.slane %v4793_v12, 4  ;;  %v9116_v23 = vld [vmem:[#allocation8 + $0x660] ss:$16 sps:$4 sm:$0xff]   ;;  %v9119_v13 = vld [vmem:[#allocation8 + $0x668] ss:$16 sps:$4 sm:$0xff]  }
 0x62c   : > { %v4844_v56 = vmax.f32 %v4842_v2, %v4843_v54  ;;  %6517 = vmatpush1.bf16.msra.mxu1 %v9074_v37  ;;  %6681 = vmatpush1.bf16.msra.mxu0 %v9077_v25  ;;  %v4811_v20 = vrot.slane %v4810_v31, 4  ;;  %v9124_v4 = vld [vmem:[#allocation8 + $0x684] ss:$16 sps:$4 sm:$0xff]   ;;  %v9127_v29 = vld [vmem:[#allocation8 + $0x68c] ss:$16 sps:$4 sm:$0xff]  }
 0x62d   : > { %v4795_v59 = vmax.f32 %v4793_v12, %v4794_v58  ;;  %6518 = vmatprep.subr.bf16.mxu1 %v9082_v49  ;;  %6682 = vmatprep.subr.bf16.mxu0 %v9085_v33  ;;  %v9122_v51 = vld [vmem:[#allocation8 + $0x680] ss:$16 sps:$4 sm:$0xff]   ;;  %v9125_v37 = vld [vmem:[#allocation8 + $0x688] ss:$16 sps:$4 sm:$0xff]   ;;  %v9130_v25 = vld [vmem:[#allocation8 + $0x6a4] ss:$16 sps:$4 sm:$0xff]  }
 0x62e   : > { %v4812_v57 = vmax.f32 %v4810_v31, %v4811_v20  ;;  %v4845_v46 = vrot.slane %v4844_v56, 4  ;;  %v9133_v12 = vld [vmem:[#allocation8 + $0x6ac] ss:$16 sps:$4 sm:$0xff]   ;;  %v9128_v49 = vld [vmem:[#allocation8 + $0x6a0] ss:$16 sps:$4 sm:$0xff]  }
 0x62f   : > { %v4796_v47 = vrot.slane %v4795_v59, 2  ;;  %v9131_v33 = vld [vmem:[#allocation8 + $0x6a8] ss:$16 sps:$4 sm:$0xff]   ;;  %v9136_v31 = vld [vmem:[#allocation8 + $0x6c4] ss:$16 sps:$4 sm:$0xff]  }
 0x630   : > { %6519 = vmatpush1.bf16.msra.mxu1 %v9080_v24  ;;  %6683 = vmatpush1.bf16.msra.mxu0 %v9083_v0  ;;  %v4813_v11 = vrot.slane %v4812_v57, 2  ;;  %v4846_v26 = vmax.f32 %v4844_v56, %v4845_v46  ;;  %v9139_v2 = vld [vmem:[#allocation8 + $0x6cc] ss:$16 sps:$4 sm:$0xff]   ;;  %v9134_v54 = vld [vmem:[#allocation8 + $0x6c0] ss:$16 sps:$4 sm:$0xff]   ;;  %v4825_v46 = vunpack.i.l.bf16 %v10826_v42 }
 0x631   : > { %6520 = vmatprep.subr.bf16.mxu1 %v9088_v17  ;;  %6684 = vmatprep.subr.bf16.mxu0 %v9091_v28  ;;  %v4797_v32 = vmax.f32 %v4795_v59, %v4796_v47  ;;  %v9137_v58 = vld [vmem:[#allocation8 + $0x6c8] ss:$16 sps:$4 sm:$0xff]   ;;  %v9142_v56 = vld [vmem:[#allocation8 + $0x6e4] ss:$16 sps:$4 sm:$0xff]   ;;  %v9145_v24 = vld [vmem:[#allocation8 + $0x6ec] ss:$16 sps:$4 sm:$0xff]   ;;  %v4826_v47 = vunpack.i.h.bf16 %v10826_v42 }
 0x632   : > { %v4814_v6 = vmax.f32 %v4812_v57, %v4813_v11  ;;  %v4847_v5 = vrot.slane %v4846_v26, 2  ;;  %v9140_v0 = vld [vmem:[#allocation8 + $0x6e0] ss:$16 sps:$4 sm:$0xff]   ;;  %v9143_v20 = vld [vmem:[#allocation8 + $0x6e8] ss:$16 sps:$4 sm:$0xff]  }
 0x633   : > { %v4798_v61 = vrot.slane %v4797_v32, 1  ;;  %v9148_v59 = vld [vmem:[#allocation8 + $0x704] ss:$16 sps:$4 sm:$0xff]   ;;  %v9151_v17 = vld [vmem:[#allocation8 + $0x70c] ss:$16 sps:$4 sm:$0xff]  }
 0x634   : > { %6521 = vmatpush1.bf16.msra.mxu1 %v9086_v38  ;;  %6685 = vmatpush1.bf16.msra.mxu0 %v9089_v52  ;;  %v4815_v48 = vrot.slane %v4814_v6, 1  ;;  %v4848_v60 = vmax.f32 %v4846_v26, %v4847_v5  ;;  %v9146_v28 = vld [vmem:[#allocation8 + $0x700] ss:$16 sps:$4 sm:$0xff]   ;;  %v9149_v57 = vld [vmem:[#allocation8 + $0x708] ss:$16 sps:$4 sm:$0xff]  }
 0x635   : > { %6522 = vmatprep.subr.bf16.mxu1 %v9094_v7  ;;  %6686 = vmatprep.subr.bf16.mxu0 %v9097_v39  ;;  %v4799_v3 = vmax.f32 %v4797_v32, %v4798_v61  ;;  %v9154_v38 = vld [vmem:[#allocation8 + $0x724] ss:$16 sps:$4 sm:$0xff]   ;;  %v9157_v52 = vld [vmem:[#allocation8 + $0x72c] ss:$16 sps:$4 sm:$0xff]   ;;  %v9152_v11 = vld [vmem:[#allocation8 + $0x720] ss:$16 sps:$4 sm:$0xff]   ;;  %v4827_v7 = vmax.f32 %v4825_v46, %v4826_v47 }
 0x636   : > { %v4816_v43 = vmax.f32 %v4814_v6, %v4815_v48  ;;  %v4849_v55 = vrot.slane %v4848_v60, 1  ;;  %v9155_v26 = vld [vmem:[#allocation8 + $0x728] ss:$16 sps:$4 sm:$0xff]   ;;  %v9160_v39 = vld [vmem:[#allocation8 + $0x744] ss:$16 sps:$4 sm:$0xff]  }
 0x637   : > { %v4800_v53 = vpack.i.bf16 %v4799_v3, %v4799_v3  ;;  %v9163_v32 = vld [vmem:[#allocation8 + $0x74c] ss:$16 sps:$4 sm:$0xff]   ;;  %v9158_v6 = vld [vmem:[#allocation8 + $0x740] ss:$16 sps:$4 sm:$0xff]   ;;  %v9161_v5 = vld [vmem:[#allocation8 + $0x748] ss:$16 sps:$4 sm:$0xff]  }
 0x638   : > { %6523 = vmatpush1.bf16.msra.mxu1 %v9092_v9  ;;  %6687 = vmatpush1.bf16.msra.mxu0 %v9095_v40  ;;  %v4817_v30 = vpack.i.bf16 %v4816_v43, %v4816_v43  ;;  %v4850_v8 = vmax.f32 %v4848_v60, %v4849_v55  ;;  %v4828_v61 = vrot.slane %v4827_v7, 4  ;;  %v9166_v42 = vld [vmem:[#allocation8 + $0x764] ss:$16 sps:$4 sm:$0xff]   ;;  %v9169_v9 = vld [vmem:[#allocation8 + $0x76c] ss:$16 sps:$4 sm:$0xff]  }
 0x639   : > { %6533 = vmatprep.subr.bf16.mxu1 %v9100_v15  ;;  %6697 = vmatprep.subr.bf16.mxu0 %v9103_v62  ;;  %v9164_v40 = vld [vmem:[#allocation8 + $0x760] ss:$16 sps:$4 sm:$0xff]   ;;  %v9167_v48 = vld [vmem:[#allocation8 + $0x768] ss:$16 sps:$4 sm:$0xff]   ;;  %v9172_v15 = vld [vmem:[#allocation8 + $0x784] ss:$16 sps:$4 sm:$0xff]  }
 0x63a   : > { %6524 = vmatprep.mubr.bf16.mxu1 %v4817_v30  ;;  %6688 = vmatprep.mubr.bf16.mxu0 %v4817_v30  ;;  %v4851_v19 = vpack.i.bf16 %v4850_v8, %v4850_v8  ;;  %v4829_v60 = vmax.f32 %v4827_v7, %v4828_v61  ;;  %v9175_v62 = vld [vmem:[#allocation8 + $0x78c] ss:$16 sps:$4 sm:$0xff]   ;;  %v9170_v3 = vld [vmem:[#allocation8 + $0x780] ss:$16 sps:$4 sm:$0xff]   ;;  %v9173_v43 = vld [vmem:[#allocation8 + $0x788] ss:$16 sps:$4 sm:$0xff]  }
 0x63b   : > { %6525 = vmatmul.mubr.bf16.vlgmr.msra.gmra.mrb[96].mxu1 %v4800_v53  ;;  %6689 = vmatmul.mubr.bf16.vlgmr.msra.gmra.mrb[160].mxu0 %v4800_v53  ;;  %v9178_v55 = vld [vmem:[#allocation8 + $0x7a4] ss:$16 sps:$4 sm:$0xff]   ;;  %v9181_v30 = vld [vmem:[#allocation8 + $0x7ac] ss:$16 sps:$4 sm:$0xff]   ;;  %v9179_v8 = vld [vmem:[#allocation8 + $0x7a8] ss:$16 sps:$4 sm:$0xff]  }
 0x63c   : > { %6534 = vmatpush1.bf16.msra.mxu1 %v9098_v50  ;;  %6698 = vmatpush1.bf16.msra.mxu0 %v9101_v36  ;;  %v4830_v50 = vrot.slane %v4829_v60, 2  ;;  %v9176_v36 = vld [vmem:[#allocation8 + $0x7a0] ss:$16 sps:$4 sm:$0xff]   ;;  %v9184_v53 = vld [vmem:[#allocation8 + $0x7c4] ss:$16 sps:$4 sm:$0xff]  }
 0x63d   : > { %6565 = vmatprep.mubr.bf16.mxu1 %v4851_v19  ;;  %6729 = vmatprep.mubr.bf16.mxu0 %v4851_v19  ;;  %v9182_v19 = vld [vmem:[#allocation8 + $0x7c0] ss:$16 sps:$4 sm:$0xff]   ;;  %v9229_v46 = vld [vmem:[#allocation10 + $0xb4] ss:$8 sps:$4 sm:$0xff]   ;;  %v9238_v7 = vld [vmem:[#allocation10 + $0xe4] ss:$8 sps:$4 sm:$0xff]  }
 0x63e   : > { %6535 = vmatprep.subr.bf16.mxu1 %v9106_v18  ;;  %6699 = vmatprep.subr.bf16.mxu0 %v9109_v27  ;;  %v9187_v18 = vld [vmem:[#allocation8 + $0x7cc] ss:$16 sps:$4 sm:$0xff]   ;;  %v4831_v27 = vmax.f32 %v4829_v60, %v4830_v50  ;;  %v9227_v47 = vld [vmem:[#allocation10 + $0xb0] ss:$8 sps:$4 sm:$0xff]   ;;  %v7246_v61 = vld [vmem:[%s11013_s15 + $0x80] sm:$0xff] }
 0x63f   : > { %v7248_v60 = vld [vmem:[%s11013_s15 + $0x90] sm:$0xff]  ;;  %v7251_v50 = vld [vmem:[%s11013_s15 + $0xa8] sm:$0xff] }
 0x640   : > { %6536 = vmatpush1.bf16.msra.mxu1 %v9104_v16  ;;  %6700 = vmatpush1.bf16.msra.mxu0 %v9107_v22  ;;  %v9185_v16 = vld [vmem:[#allocation8 + $0x7c8] ss:$16 sps:$4 sm:$0xff]   ;;  %v9190_v22 = vld [vmem:[#allocation8 + $0x7e4] ss:$16 sps:$4 sm:$0xff]  }
 0x641   : > { %6537 = vmatprep.subr.bf16.mxu1 %v9112_v35  ;;  %6701 = vmatprep.subr.bf16.mxu0 %v9115_v44  ;;  %v9193_v35 = vld [vmem:[#allocation8 + $0x7ec] ss:$16 sps:$4 sm:$0xff]   ;;  %v4832_v44 = vrot.slane %v4831_v27, 1 }
 0x644   : > { %6538 = vmatpush1.bf16.msra.mxu1 %v9110_v63  ;;  %6702 = vmatpush1.bf16.msra.mxu0 %v9113_v14  ;;  %v9188_v63 = vld [vmem:[#allocation8 + $0x7e0] ss:$16 sps:$4 sm:$0xff]   ;;  %v9191_v14 = vld [vmem:[#allocation8 + $0x7e8] ss:$16 sps:$4 sm:$0xff]  }
 0x645   : > { %6539 = vmatprep.subr.bf16.mxu1 %v9118_v10  ;;  %6703 = vmatprep.subr.bf16.mxu0 %v9121_v1  ;;  %v4833_v10 = vmax.f32 %v4831_v27, %v4832_v44  ;;  %v9196_v1 = vld [vmem:[#allocation10 + $0x4] ss:$8 sps:$4 sm:$0xff]   ;;  %v7252_v27 = vld [vmem:[%s11013_s15 + $0xb0] sm:$0xff]  ;;  %v7237_v44 = vld [vmem:[%s11013_s15 + $0x38] sm:$0xff] }
 0x648   : > { %6540 = vmatpush1.bf16.msra.mxu1 %v9116_v23  ;;  %6704 = vmatpush1.bf16.msra.mxu0 %v9119_v13  ;;  %v9194_v23 = vld [vmem:[#allocation10] ss:$8 sps:$4 sm:$0xff]   ;;  %v4834_v13 = vpack.i.bf16 %v4833_v10, %v4833_v10 }
 0x649   : > { %6541 = vmatprep.subr.bf16.mxu1 %v9124_v4  ;;  %6705 = vmatprep.subr.bf16.mxu0 %v9127_v29  ;;  %v9199_v4 = vld [vmem:[#allocation10 + $0x14] ss:$8 sps:$4 sm:$0xff]   ;;  %v9197_v29 = vld [vmem:[#allocation10 + $0x10] ss:$8 sps:$4 sm:$0xff]  }
 0x64c   : > { %6542 = vmatpush1.bf16.msra.mxu1 %v9122_v51  ;;  %6706 = vmatpush1.bf16.msra.mxu0 %v9125_v37  ;;  %v9202_v51 = vld [vmem:[#allocation10 + $0x24] ss:$8 sps:$4 sm:$0xff]   ;;  %v9200_v37 = vld [vmem:[#allocation10 + $0x20] ss:$8 sps:$4 sm:$0xff]  }
 0x64d   : > { %6543 = vmatprep.subr.bf16.mxu1 %v9130_v25  ;;  %6707 = vmatprep.subr.bf16.mxu0 %v9133_v12  ;;  %v9205_v25 = vld [vmem:[#allocation10 + $0x34] ss:$8 sps:$4 sm:$0xff]   ;;  %v9203_v12 = vld [vmem:[#allocation10 + $0x30] ss:$8 sps:$4 sm:$0xff]  }
 0x650   : > { %6544 = vmatpush1.bf16.msra.mxu1 %v9128_v49  ;;  %6708 = vmatpush1.bf16.msra.mxu0 %v9131_v33  ;;  %v9208_v49 = vld [vmem:[#allocation10 + $0x44] ss:$8 sps:$4 sm:$0xff]   ;;  %v9206_v33 = vld [vmem:[#allocation10 + $0x40] ss:$8 sps:$4 sm:$0xff]  }
 0x651   : > { %6545 = vmatprep.subr.bf16.mxu1 %v9136_v31  ;;  %6709 = vmatprep.subr.bf16.mxu0 %v9139_v2  ;;  %v9211_v31 = vld [vmem:[#allocation10 + $0x54] ss:$8 sps:$4 sm:$0xff]   ;;  %v9209_v2 = vld [vmem:[#allocation10 + $0x50] ss:$8 sps:$4 sm:$0xff]  }
 0x654   : > { %6546 = vmatpush1.bf16.msra.mxu1 %v9134_v54  ;;  %6710 = vmatpush1.bf16.msra.mxu0 %v9137_v58  ;;  %v9214_v54 = vld [vmem:[#allocation10 + $0x64] ss:$8 sps:$4 sm:$0xff]   ;;  %v9212_v58 = vld [vmem:[#allocation10 + $0x60] ss:$8 sps:$4 sm:$0xff]  }
 0x655   : > { %6547 = vmatprep.subr.bf16.mxu1 %v9142_v56  ;;  %6711 = vmatprep.subr.bf16.mxu0 %v9145_v24  ;;  %v9217_v56 = vld [vmem:[#allocation10 + $0x74] ss:$8 sps:$4 sm:$0xff]   ;;  %v9215_v24 = vld [vmem:[#allocation10 + $0x70] ss:$8 sps:$4 sm:$0xff]  }
 0x658   : > { %6548 = vmatpush1.bf16.msra.mxu1 %v9140_v0  ;;  %6712 = vmatpush1.bf16.msra.mxu0 %v9143_v20  ;;  %v9220_v0 = vld [vmem:[#allocation10 + $0x84] ss:$8 sps:$4 sm:$0xff]   ;;  %v9218_v20 = vld [vmem:[#allocation10 + $0x80] ss:$8 sps:$4 sm:$0xff]  }
 0x659   : > { %6549 = vmatprep.subr.bf16.mxu1 %v9148_v59  ;;  %6713 = vmatprep.subr.bf16.mxu0 %v9151_v17  ;;  %v9223_v59 = vld [vmem:[#allocation10 + $0x94] ss:$8 sps:$4 sm:$0xff]   ;;  %v9221_v17 = vld [vmem:[#allocation10 + $0x90] ss:$8 sps:$4 sm:$0xff]  }
 0x65c   : > { %6550 = vmatpush1.bf16.msra.mxu1 %v9146_v28  ;;  %6714 = vmatpush1.bf16.msra.mxu0 %v9149_v57  ;;  %v9226_v28 = vld [vmem:[#allocation10 + $0xa4] ss:$8 sps:$4 sm:$0xff]   ;;  %v9224_v57 = vld [vmem:[#allocation10 + $0xa0] ss:$8 sps:$4 sm:$0xff]  }
 0x65d   : > { %6551 = vmatprep.subr.bf16.mxu1 %v9154_v38  ;;  %6715 = vmatprep.subr.bf16.mxu0 %v9157_v52  ;;  %v9232_v38 = vld [vmem:[#allocation10 + $0xc4] ss:$8 sps:$4 sm:$0xff]   ;;  %v9230_v52 = vld [vmem:[#allocation10 + $0xc0] ss:$8 sps:$4 sm:$0xff]  }
 0x660   : > { %6552 = vmatpush1.bf16.msra.mxu1 %v9152_v11  ;;  %6716 = vmatpush1.bf16.msra.mxu0 %v9155_v26  ;;  %v9235_v11 = vld [vmem:[#allocation10 + $0xd4] ss:$8 sps:$4 sm:$0xff]   ;;  %v9233_v26 = vld [vmem:[#allocation10 + $0xd0] ss:$8 sps:$4 sm:$0xff]  }
 0x661   : > { %6553 = vmatprep.subr.bf16.mxu1 %v9160_v39  ;;  %6717 = vmatprep.subr.bf16.mxu0 %v9163_v32  ;;  %v9236_v39 = vld [vmem:[#allocation10 + $0xe0] ss:$8 sps:$4 sm:$0xff]   ;;  %v9241_v32 = vld [vmem:[#allocation10 + $0xf4] ss:$8 sps:$4 sm:$0xff]  }
 0x664   : > { %6554 = vmatpush1.bf16.msra.mxu1 %v9158_v6  ;;  %6718 = vmatpush1.bf16.msra.mxu0 %v9161_v5  ;;  %v9239_v6 = vld [vmem:[#allocation10 + $0xf0] ss:$8 sps:$4 sm:$0xff]   ;;  %v9244_v5 = vld [vmem:[#allocation10 + $0x104] ss:$8 sps:$4 sm:$0xff]  }
 0x665   : > { %6555 = vmatprep.subr.bf16.mxu1 %v9166_v42  ;;  %6719 = vmatprep.subr.bf16.mxu0 %v9169_v9  ;;  %v7247_v42 = vld [vmem:[%s11013_s15 + $0x88] sm:$0xff]  ;;  %v7230_v9 = vld [vmem:[%s11013_s15] sm:$0xff] }
 0x668   : > { %6556 = vmatpush1.bf16.msra.mxu1 %v9164_v40  ;;  %6720 = vmatpush1.bf16.msra.mxu0 %v9167_v48  ;;  %v8266_v40 = vpack.c.bf16 %v7247_v42, %v7246_v61  ;;  %v7231_v48 = vld [vmem:[%s11013_s15 + $0x8] sm:$0xff]  ;;  %v9247_v61 = vld [vmem:[#allocation10 + $0x114] ss:$8 sps:$4 sm:$0xff]   ;;  %v9245_v42 = vld [vmem:[#allocation10 + $0x110] ss:$8 sps:$4 sm:$0xff]  }
 0x669   : > { %6557 = vmatprep.subr.bf16.mxu1 %v9172_v15  ;;  %6721 = vmatprep.subr.bf16.mxu0 %v9175_v62  ;;  %v7249_v15 = vld [vmem:[%s11013_s15 + $0x98] sm:$0xff]  ;;  %v8268_v62 = vpack.c.bf16 %v7231_v48, %v7230_v9  ;;  %v9250_v9 = vld [vmem:[#allocation10 + $0x124] ss:$8 sps:$4 sm:$0xff]  }
 0x66a   : > { %v9253_v48 = vld [vmem:[#allocation10 + $0x134] ss:$8 sps:$4 sm:$0xff]  }
 0x66c   : > { %6558 = vmatpush1.bf16.msra.mxu1 %v9170_v3  ;;  %6722 = vmatpush1.bf16.msra.mxu0 %v9173_v43  ;;  %v8270_v3 = vpack.c.bf16 %v7249_v15, %v7248_v60  ;;  %v7232_v43 = vld [vmem:[%s11013_s15 + $0x10] sm:$0xff]  ;;  %v9256_v15 = vld [vmem:[#allocation10 + $0x144] ss:$8 sps:$4 sm:$0xff]  }
 0x66d   : > { %6559 = vmatprep.subr.bf16.mxu1 %v9178_v55  ;;  %6723 = vmatprep.subr.bf16.mxu0 %v9181_v30  ;;  %v7233_v55 = vld [vmem:[%s11013_s15 + $0x18] sm:$0xff]  ;;  %v7250_v30 = vld [vmem:[%s11013_s15 + $0xa0] sm:$0xff] }
 0x66e   : > { %v9251_v60 = vld [vmem:[#allocation10 + $0x130] ss:$8 sps:$4 sm:$0xff]  }
 0x670   : > { %6560 = vmatpush1.bf16.msra.mxu1 %v9176_v36  ;;  %6724 = vmatpush1.bf16.msra.mxu0 %v9179_v8  ;;  %v8272_v36 = vpack.c.bf16 %v7233_v55, %v7232_v43  ;;  %v8274_v8 = vpack.c.bf16 %v7251_v50, %v7250_v30  ;;  %v9257_v43 = vld [vmem:[#allocation10 + $0x150] ss:$8 sps:$4 sm:$0xff]   ;;  %v9262_v55 = vld [vmem:[#allocation10 + $0x164] ss:$8 sps:$4 sm:$0xff]   ;;  %v9260_v30 = vld [vmem:[#allocation10 + $0x160] ss:$8 sps:$4 sm:$0xff]  }
 0x671   : > { %6561 = vmatprep.subr.bf16.mxu1 %v9184_v53  ;;  %6725 = vmatprep.subr.bf16.mxu0 %v9187_v18  ;;  %v7234_v53 = vld [vmem:[%s11013_s15 + $0x20] sm:$0xff]  ;;  %v7235_v18 = vld [vmem:[%s11013_s15 + $0x28] sm:$0xff]  ;;  %v9265_v50 = vld [vmem:[#allocation10 + $0x174] ss:$8 sps:$4 sm:$0xff]  }
 0x674   : > { %6562 = vmatpush1.bf16.msra.mxu1 %v9182_v19  ;;  %6726 = vmatpush1.bf16.msra.mxu0 %v9185_v16  ;;  %v7253_v19 = vld [vmem:[%s11013_s15 + $0xb8] sm:$0xff]  ;;  %v8276_v16 = vpack.c.bf16 %v7235_v18, %v7234_v53  ;;  %v9266_v53 = vld [vmem:[#allocation10 + $0x180] ss:$8 sps:$4 sm:$0xff]  }
 0x675   : > { %6563 = vmatprep.subr.bf16.mxu1 %v9190_v22  ;;  %6727 = vmatprep.subr.bf16.mxu0 %v9193_v35  ;;  %v8278_v22 = vpack.c.bf16 %v7253_v19, %v7252_v27  ;;  %v7236_v35 = vld [vmem:[%s11013_s15 + $0x30] sm:$0xff]  ;;  %v9274_v19 = vld [vmem:[#allocation10 + $0x1a4] ss:$8 sps:$4 sm:$0xff]  }
 0x676   : > { %v8280_v10 = vpack.c.bf16 %v7237_v44, %v7236_v35  ;;  %v9271_v18 = vld [vmem:[#allocation10 + $0x194] ss:$8 sps:$4 sm:$0xff]   ;;  %v9269_v27 = vld [vmem:[#allocation10 + $0x190] ss:$8 sps:$4 sm:$0xff]   ;;  %v9280_v44 = vld [vmem:[#allocation10 + $0x1c4] ss:$8 sps:$4 sm:$0xff]  }
 0x677   : > { %v9275_v35 = vld [vmem:[#allocation10 + $0x1b0] ss:$8 sps:$4 sm:$0xff]  }
 0x678   : > { %6564 = vmatpush1.bf16.msra.mxu1 %v9188_v63  ;;  %6728 = vmatpush1.bf16.msra.mxu0 %v9191_v14  ;;  %v7254_v63 = vld [vmem:[%s11013_s15 + $0xc0] sm:$0xff]  ;;  %v7255_v14 = vld [vmem:[%s11013_s15 + $0xc8] sm:$0xff] }
 0x679   : > { %7142 = vmatprep.subr.bf16.mxu1 %v9196_v1  ;;  %8267 = vmatprep.subr.bf16.mxu0 %v8266_v40  ;;  %v8282_v1 = vpack.c.bf16 %v7255_v14, %v7254_v63  ;;  %v9248_v40 = vld [vmem:[#allocation10 + $0x120] ss:$8 sps:$4 sm:$0xff]   ;;  %v9283_v14 = vld [vmem:[#allocation10 + $0x1d4] ss:$8 sps:$4 sm:$0xff]  }
 0x67a   : > { %v9278_v63 = vld [vmem:[#allocation10 + $0x1c0] ss:$8 sps:$4 sm:$0xff]  }
 0x67b   : > { %6566 = vmatmul.mubr.bf16.vlgmr.msra.gmra.mrb[96].mxu1 %v4834_v13  ;;  %6730 = vmatmul.mubr.bf16.vlgmr.msra.gmra.mrb[160].mxu0 %v4834_v13  ;;  %v7239_v13 = vld [vmem:[%s11013_s15 + $0x48] sm:$0xff] }
 0x67c   : > { %7143 = vmatpush1.bf16.msra.mxu1 %v9194_v23  ;;  %8269 = vmatpush3.bf16.msra.mxu0 %v8268_v62  ;;  %v7238_v23 = vld [vmem:[%s11013_s15 + $0x40] sm:$0xff] }
 0x67d   : > { %7144 = vmatprep.subr.bf16.mxu1 %v9199_v4  ;;  %8271 = vmatprep.subr.bf16.mxu0 %v8270_v3  ;;  %v7256_v4 = vld [vmem:[%s11013_s15 + $0xd0] sm:$0xff]  ;;  %v9254_v62 = vld [vmem:[#allocation10 + $0x140] ss:$8 sps:$4 sm:$0xff]  }
 0x67e   : > { %v9259_v3 = vld [vmem:[#allocation10 + $0x154] ss:$8 sps:$4 sm:$0xff]  }
 0x680   : > { %7145 = vmatpush1.bf16.msra.mxu1 %v9197_v29  ;;  %8273 = vmatpush3.bf16.msra.mxu0 %v8272_v36  ;;  %v7257_v29 = vld [vmem:[%s11013_s15 + $0xd8] sm:$0xff] }
 0x681   : > { %7146 = vmatprep.subr.bf16.mxu1 %v9202_v51  ;;  %8275 = vmatprep.subr.bf16.mxu0 %v8274_v8  ;;  %v8284_v51 = vpack.c.bf16 %v7239_v13, %v7238_v23  ;;  %v9263_v36 = vld [vmem:[#allocation10 + $0x170] ss:$8 sps:$4 sm:$0xff]   ;;  %v9268_v8 = vld [vmem:[#allocation10 + $0x184] ss:$8 sps:$4 sm:$0xff]   ;;  %v9284_v13 = vld [vmem:[#allocation10 + $0x1e0] ss:$8 sps:$4 sm:$0xff]  }
 0x682   : > { %v9286_v23 = vld [vmem:[#allocation10 + $0x1e4] ss:$8 sps:$4 sm:$0xff]  }
 0x684   : > { %7147 = vmatpush1.bf16.msra.mxu1 %v9200_v37  ;;  %8277 = vmatpush3.bf16.msra.mxu0 %v8276_v16  ;;  %v8286_v37 = vpack.c.bf16 %v7257_v29, %v7256_v4  ;;  %v9272_v16 = vld [vmem:[#allocation10 + $0x1a0] ss:$8 sps:$4 sm:$0xff]   ;;  %v9289_v29 = vld [vmem:[#allocation10 + $0x1f4] ss:$8 sps:$4 sm:$0xff]  }
 0x685   : > { %7148 = vmatprep.subr.bf16.mxu1 %v9205_v25  ;;  %8279 = vmatprep.subr.bf16.mxu0 %v8278_v22  ;;  %v7240_v25 = vld [vmem:[%s11013_s15 + $0x50] sm:$0xff] }
 0x686   : > { %v9277_v22 = vld [vmem:[#allocation10 + $0x1b4] ss:$8 sps:$4 sm:$0xff]  }
 0x688   : > { %7149 = vmatpush1.bf16.msra.mxu1 %v9203_v12  ;;  %8281 = vmatpush3.bf16.msra.mxu0 %v8280_v10  ;;  %v7241_v12 = vld [vmem:[%s11013_s15 + $0x58] sm:$0xff] }
 0x689   : > { %7150 = vmatprep.subr.bf16.mxu1 %v9208_v49  ;;  %8283 = vmatprep.subr.bf16.mxu0 %v8282_v1  ;;  %v7258_v49 = vld [vmem:[%s11013_s15 + $0xe0] sm:$0xff]  ;;  %v9281_v10 = vld [vmem:[#allocation10 + $0x1d0] ss:$8 sps:$4 sm:$0xff]  }
 0x68c   : > { %7151 = vmatpush1.bf16.msra.mxu1 %v9206_v33  ;;  %v7259_v33 = vld [vmem:[%s11013_s15 + $0xe8] sm:$0xff]  ;;  %8285 = vmatpush3.bf16.msra.mxu0 %v8284_v51  ;;  %v9287_v51 = vld [vmem:[#allocation10 + $0x1f0] ss:$8 sps:$4 sm:$0xff]  }
 0x68d   : > { %7152 = vmatprep.subr.bf16.mxu1 %v9211_v31  ;;  %v8288_v31 = vpack.c.bf16 %v7241_v12, %v7240_v25  ;;  %8287 = vmatprep.subr.bf16.mxu0 %v8286_v37  ;;  %v7242_v12 = vld [vmem:[%s11013_s15 + $0x60] sm:$0xff] }
 0x690   : > { %7153 = vmatpush1.bf16.msra.mxu1 %v9209_v2  ;;  %v8290_v2 = vpack.c.bf16 %v7259_v33, %v7258_v49  ;;  %8289 = vmatpush3.bf16.msra.mxu0 %v8288_v31  ;;  %v7260_v33 = vld [vmem:[%s11013_s15 + $0xf0] sm:$0xff]  ;;  %v7261_v31 = vld [vmem:[%s11013_s15 + $0xf8] sm:$0xff] }
 0x691   : > { %7154 = vmatprep.subr.bf16.mxu1 %v9214_v54  ;;  %v10911_v54 = vld [vmem:[%s11010_s12] sm:$0xf] }
 0x692   : > { %8291 = vmatprep.subr.bf16.mxu0 %v8290_v2  ;;  %v6401_v1 = vrot.slane %v10911_v54, %v11072_v41  ;;  %v7243_v41 = vld [vmem:[%s11013_s15 + $0x68] sm:$0xff]  ;;  %v8294_v2 = vpack.c.bf16 %v7261_v31, %v7260_v33 }
 0x693   : > { %v8292_v49 = vpack.c.bf16 %v7243_v41, %v7242_v12 }
 0x694   : > { %7155 = vmatpush1.bf16.msra.mxu1 %v9212_v58  ;;  %v6393_v58 = vrot.slane %v10911_v54, %v9951_v34 }
 0x695   : > { %7156 = vmatprep.subr.bf16.mxu1 %v9217_v56  ;;  %v6397_v56 = vrot.slane %v10911_v54, %v11073_v21  ;;  %8293 = vmatpush3.bf16.msra.mxu0 %v8292_v49 }
 0x696   : > { %8295 = vmatprep.subr.bf16.mxu0 %v8294_v2 }
 0x698   : > { %7157 = vmatpush1.bf16.msra.mxu1 %v9215_v24  ;;  %v6405_v24 = vrot.slane %v10911_v54, %v11074_v45  ;;  %v7244_v54 = vld [vmem:[%s11013_s15 + $0x70] sm:$0xff] }
 0x699   : > { %7158 = vmatprep.subr.bf16.mxu1 %v9220_v0 }
 0x69c   : > { %7159 = vmatpush1.bf16.msra.mxu1 %v9218_v20 }
 0x69d   : > { %7160 = vmatprep.subr.bf16.mxu1 %v9223_v59 }
 0x6a0   : > { %7161 = vmatpush1.bf16.msra.mxu1 %v9221_v17 }
 0x6a1   : > { %7162 = vmatprep.subr.bf16.mxu1 %v9226_v28 }
 0x6a4   : > { %7163 = vmatpush1.bf16.msra.mxu1 %v9224_v57 }
 0x6a5   : > { %7164 = vmatprep.subr.bf16.mxu1 %v9229_v46 }
 0x6a8   : > { %7165 = vmatpush1.bf16.msra.mxu1 %v9227_v47 }
 0x6a9   : > { %7166 = vmatprep.subr.bf16.mxu1 %v9232_v38 }
 0x6ac   : > { %7167 = vmatpush1.bf16.msra.mxu1 %v9230_v52 }
 0x6ad   : > { %7168 = vmatprep.subr.bf16.mxu1 %v9235_v11 }
 0x6b0   : > { %7169 = vmatpush1.bf16.msra.mxu1 %v9233_v26 }
 0x6b1   : > { %7170 = vmatprep.subr.bf16.mxu1 %v9238_v7 }
 0x6b4   : > { %7171 = vmatpush1.bf16.msra.mxu1 %v9236_v39 }
 0x6b5   : > { %7172 = vmatprep.subr.bf16.mxu1 %v9241_v32 }
 0x6b8   : > { %7173 = vmatpush1.bf16.msra.mxu1 %v9239_v6  ;;  %v9242_v6 = vld [vmem:[#allocation10 + $0x100] ss:$8 sps:$4 sm:$0xff]  }
 0x6b9   : > { %7183 = vmatprep.subr.bf16.mxu1 %v9244_v5 }
 0x74e   : > { %v6567_v0 = vpop.f32.mrb[96].mxu1  ;;  %v10919_v20 = vpop.f32.mrb[160].mxu0 }
 0x74f   : > { %v8426_v59 = vadd.f32 %v6567_v0, %v6393_v58  ;;  %v6569_v17 = vpop.f32.mrb[97].mxu1  ;;  %v6733_v28 = vpop.f32.mrb[161].mxu0  ;;  %v8428_v4 = vadd.f32 %v10919_v20, %v6401_v1  ;;  %v7245_v58 = vld [vmem:[%s11013_s15 + $0x78] sm:$0xff] }
 0x750   : > { %v8427_v57 = vadd.f32 %v6569_v17, %v6397_v56  ;;  %v8429_v46 = vadd.f32 %v6733_v28, %v6405_v24  ;;  %v6571_v47 = vpop.f32.mrb[98].mxu1  ;;  %v6735_v38 = vpop.f32.mrb[162].mxu0  ;;  %v8296_v56 = vpack.c.bf16 %v7245_v58, %v7244_v54  ;;  %v6810_v24 = vld [vmem:[%s11076_s23] sm:$0x3]  ;;  %s9436_s23 = sshll.u32 %s9520_s28, 4  ;;  %s9437_s23 = int_to_ptr.vmem [resolvable:$false] %s9436_s23 }
 0x751   : > { %v6738_v52 = vmax.f32 %v8426_v59, 0.0  ;;  %v6572_v11 = vpop.f32.mrb[99].mxu1  ;;  %v6736_v26 = vpop.f32.mrb[163].mxu0  ;;  %v6740_v37 = vmax.f32 %v8428_v4, 0.0  ;;  %v7135_v0 = vrot.slane %v6810_v24, %v9951_v34  ;;  %v7139_v20 = vrot.slane %v6810_v24, %v11073_v21  ;;  %s9438_s26 = scalar_lea.vmem %s9437_s23, 256  ;;  %p9439_p6 = scmp.lt.s32.totalorder %s10958_s16, %s9437_s23 }
 0x752   : > { %v6739_v7 = vmax.f32 %v8427_v57, 0.0  ;;  %v6741_v39 = vmax.f32 %v8429_v46, 0.0  ;;  %8297 = vmatpush3.bf16.msra.mxu0 %v8296_v56  ;;  %v7262_v26 = vld [vmem:[%s11078_s14] sm:$0x1]  ;;  %p9440_p9 = scmp.lt.s32.totalorder %s9438_s26, %s9432_s24 }
 0x753   : > { %v6742_v5 = vpack.c.bf16 %v6738_v52, %v6738_v52  ;;  %v6744_v25 = vpack.c.bf16 %v6740_v37, %v6740_v37 }
 0x754   : > { %v6743_v32 = vpack.c.bf16 %v6739_v7, %v6739_v7  ;;  %v6745_v45 = vpack.c.bf16 %v6741_v39, %v6741_v39  ;;  %p9441_p5 = por %p9440_p9, %p9439_p6 }
 0x756   : > { %7174 = vmatprep.mubr.bf16.mxu1 %v6743_v32  ;;  %p9442_p0 = pnand %p9441_p5, %p9435_p1 }
 0x757   : > { %7175 = vmatmul.mubr.bf16.vlgmr.msra.gmra.mrb[100].mxu1 %v6742_v5 }
 0x758   : > { %7184 = vmatpush1.bf16.msra.mxu1 %v9242_v6  ;;  %7215 = vmatprep.mubr.bf16.mxu1 %v6745_v45 }
 0x759   : > { %7185 = vmatprep.subr.bf16.mxu1 %v9247_v61 }
 0x75c   : > { %7186 = vmatpush1.bf16.msra.mxu1 %v9245_v42 }
 0x75d   : > { %7187 = vmatprep.subr.bf16.mxu1 %v9250_v9 }
 0x760   : > { %7188 = vmatpush1.bf16.msra.mxu1 %v9248_v40 }
 0x761   : > { %7189 = vmatprep.subr.bf16.mxu1 %v9253_v48 }
 0x764   : > { %7190 = vmatpush1.bf16.msra.mxu1 %v9251_v60 }
 0x765   : > { %7191 = vmatprep.subr.bf16.mxu1 %v9256_v15 }
 0x768   : > { %7192 = vmatpush1.bf16.msra.mxu1 %v9254_v62 }
 0x769   : > { %7193 = vmatprep.subr.bf16.mxu1 %v9259_v3 }
 0x76c   : > { %7194 = vmatpush1.bf16.msra.mxu1 %v9257_v43 }
 0x76d   : > { %7195 = vmatprep.subr.bf16.mxu1 %v9262_v55 }
 0x770   : > { %7196 = vmatpush1.bf16.msra.mxu1 %v9260_v30 }
 0x771   : > { %7197 = vmatprep.subr.bf16.mxu1 %v9265_v50 }
 0x774   : > { %7198 = vmatpush1.bf16.msra.mxu1 %v9263_v36 }
 0x775   : > { %7199 = vmatprep.subr.bf16.mxu1 %v9268_v8 }
 0x778   : > { %7200 = vmatpush1.bf16.msra.mxu1 %v9266_v53 }
 0x779   : > { %7201 = vmatprep.subr.bf16.mxu1 %v9271_v18 }
 0x77c   : > { %7202 = vmatpush1.bf16.msra.mxu1 %v9269_v27 }
 0x77d   : > { %7203 = vmatprep.subr.bf16.mxu1 %v9274_v19 }
 0x780   : > { %7204 = vmatpush1.bf16.msra.mxu1 %v9272_v16 }
 0x781   : > { %7205 = vmatprep.subr.bf16.mxu1 %v9277_v22 }
 0x784   : > { %7206 = vmatpush1.bf16.msra.mxu1 %v9275_v35 }
 0x785   : > { %7207 = vmatprep.subr.bf16.mxu1 %v9280_v44 }
 0x788   : > { %7208 = vmatpush1.bf16.msra.mxu1 %v9278_v63 }
 0x789   : > { %7209 = vmatprep.subr.bf16.mxu1 %v9283_v14 }
 0x78c   : > { %7210 = vmatpush1.bf16.msra.mxu1 %v9281_v10 }
 0x78d   : > { %7211 = vmatprep.subr.bf16.mxu1 %v9286_v23 }
 0x790   : > { %7212 = vmatpush1.bf16.msra.mxu1 %v9284_v13 }
 0x791   : > { %7213 = vmatprep.subr.bf16.mxu1 %v9289_v29 }
 0x794   : > { %7214 = vmatpush1.bf16.msra.mxu1 %v9287_v51 }
 0x797   : > { %7216 = vmatmul.mubr.bf16.vlgmr.msra.gmra.mrb[100].mxu1 %v6744_v25 }
 0x86a   : > { %v7217_v59 = vpop.f32.mrb[100].mxu1 }
 0x86b   : > { %v8430_v17 = vadd.f32 %v7217_v59, %v7135_v0  ;;  %v7219_v28 = vpop.f32.mrb[101].mxu1 }
 0x86c   : > { %v8431_v57 = vadd.f32 %v7219_v28, %v7139_v20  ;;  %v7221_v46 = vpop.f32.mrb[102].mxu1 }
 0x86d   : > { %v7222_v47 = vpop.f32.mrb[103].mxu1  ;;  %v7224_v52 = vmax.f32 %v8430_v17, 0.0 }
 0x86e   : > { %v7225_v38 = vmax.f32 %v8431_v57, 0.0 }
 0x870   : > { %7327 = vmatprep.mubr.f32.mxu0 %v7225_v38 }
 0x871   : > { %7328 = vmatmul.mubr.f32.vlgmr.msra.gmra.mrb[164].mxu0 %v7224_v52 }
 0x944   : > { %v8221_v11 = vpop.f32.mrb[164].mxu0 }
 0x945   : > { %v8222_v7 = vpop.f32.mrb[165].mxu0 }
 0x946   : > { %v8223_v39 = vadd.f32 %v8222_v7, %v8221_v11 }
 0x948   : > { %v7330_v21 = vadd.f32 %v8223_v39, %v7262_v26 }
 0x94a   : > { %v7333_v32 = vmul.f32 %v7330_v21, %v7330_v21 }
 0x94c   : > { %v7335_v6 = vsel %vm7334_vm3, %v7333_v32, 0.0 }
 0x94d   : > { %7336 = vadd.xlane.f32.xlu0 %v7335_v6 }
 0x9da   : > { %v7337_v5 = vpop.xlane.xlu0 %7336 }
 0x9db   : > { %v7338_v61 = vmax.f32 %v7337_v5, 1e-24 }
 0x9dd   : > { %9290 = vrsqrt.f32 %v7338_v61 }
 0x9e7   : > { %v9291_v45 = vpop.eup %9290 }
 0x9e8   : > { %v7340_v42 = vmul.f32 %v9291_v45, %v7330_v21 }
 0x9ea   : > { %v7344_v9 = vrot.slane %v7340_v42, %v9951_v34 }
 0x9ec   : > { %7345 = vst [vmem:[%s615_s29] sm:$0xff] %v7344_v9 }
 0x9ed   : > { %9445 = shalt.err (!%p9442_p0)
}
 0x9ee   : > { %s9446_s25 = scalar_lea.hbm %s10956_s30, 128  ;;  %s9450_s27 = scalar_lea.hbm %s11080_s22, 256 }
 0x9ef   : > { %p9447_p10 = scmp.ne.s32.totalorder %s10956_s30, %s9446_s25  ;;  %p9451_p4 = scmp.lt.u32.totalorder %s10956_s30, %s11080_s22 }
 0x9f0   : > { %p9452_p12 = scmp.lt.u32.totalorder %s9450_s27, %s9446_s25  ;;  %p9454_p8 = scmp.lt.u32.totalorder %s9446_s25, %s10956_s30 }
 0x9f1   : > { %p9448_p2 = pnand %p9447_p10, %p11081_p11 }
 0x9f2   : > { %p9453_p7 = por %p9452_p12, %p9451_p4 }
 0x9f3   : > { %p9449_p3 = pneg %p9448_p2 }
 0x9f4   : > { %p9455_p13 = por %p9454_p8, %p9453_p7 }
 0x9f6   : > { %p9456_p1 = pnand %p9455_p13, %p9449_p3 }
 0x9f8   : > { %9459 = shalt.err (!%p9456_p1)
}
 0x9f9   : > { %8609 = dma.vmem_to_hbm [thread:$0]  (%p11081_p11), %s10958_s16, 128, %s10956_s30, %s7347_s19  }
 0x9fa PF: > { %s11082_s29 = sld [smem:[#allocation19_spill]]  ;;  %s11083_s1 = sld [smem:[#allocation16_spill]] }
 0x9fb   : > { %s11084_s20 = sld [smem:[#allocation23_spill]] }
 0xa00   : > { %p8641_p6 = scmp.ge.s32.totalorder %s11082_s29, 2  ;;  %s7372_s24 = sand.u32 1, %s11083_s1  }
 0xa01   : > { %p11085_p9 = scmp.ne.s32.totalorder %s11084_s20, 0  ;;  %s7373_s28 = scalar_lea.sflag [#allocation4], %s7372_s24 }
 0xa03   : > { %p8628_p5 = pnand %p8641_p6, %p11085_p9 }
 0xa05   : > { %9489 = dma.done.wait (!%p8628_p5), %s7373_s28, 128  }
 0xa06   : > { %9491 = vsyncadd (!%p8628_p5), %s7373_s28, 4294967168  ;;  %s11086_s27 = sld [smem:[#allocation20_spill]]  ;;  %s11087_s24 = sld [smem:[#allocation17_spill]] }
 0xa07   : > { %s11088_s25 = sld [smem:[#allocation18_spill]]  ;;  %s11089_s26 = sld [smem:[#allocation21_spill]] }
 0xa0c   : > { %p30_p0 = scmp.ge.s32.totalorder %s11086_s27, 4  }
 0xa0e   :  { %32 = sbr.rel (!%p30_p0) target bundleno = 12 (0xc), region = 144 }
 0xa15   :  { %7378 = vsyncpa [#allocation3], 1 }
 0xa16   :  { %7380 = vsyncpa [#allocation3 + $0x1], 1 }
 0xa17   :  { %7381 = vsyncpa [#allocation6], 1 }
 0xa18   :  { %7382 = vsyncpa [#allocation9], 1 }
 0xa19   :  { %7383 = vsyncpa [#allocation4], 1 }
 0xa1a   :  { %7385 = vsyncpa [#allocation4 + $0x1], 1 }

</bundles_post_ra>
